<compile_context>
chip_gen: v6e
topology: v6e:2x2x1
jax: 0.10.0
libtpu: 0.0.40
codegen_flags: <defaults>
</compile_context>

<pallas_src>
import functools

import numpy as np
import jax
import jax.numpy as jnp
from jax import lax
from jax.experimental import pallas as pl
from jax.experimental.pallas import tpu as pltpu

# Keep the host-side fold / reference numerics in true f32 on TPU.
jax.config.update("jax_default_matmul_precision", "highest")


# ---------------------------------------------------------------------------
# Pallas kernel: fused 3x3 conv + bias + LeakyReLU, NCHW row tile.
#   w_ref : (Cout*Cin*9,) f32, SMEM  -- fused RK, (o, i, dy, dx) flattened
#   b_ref : (Cout,)       f32, SMEM  -- fused RB
#   x_ref : (1, Cin, TH, W+2)        -- main rows of the padded input
#   h_ref : (1, Cin, 8,  W+2)        -- next 8 rows (only the first 2 used)
#   o_ref : (1, Cout, TH, W)         -- output row tile
# The 9 taps are direct slices of the (TH+2, W+2) per-channel window; the
# multiply-accumulate runs on the VPU with f32 accumulators held as values.
# ---------------------------------------------------------------------------
def _edbb_rep3x3_kernel(w_ref, b_ref, x_ref, h_ref, o_ref, *, neg_slope):
    cin = x_ref.shape[1]
    cout, th, w = o_ref.shape[1], o_ref.shape[2], o_ref.shape[3]

    accs = [None] * cout
    for i in range(cin):
        xm = x_ref[0, i].astype(jnp.float32)                 # (TH, W+2)
        xh = h_ref[0, i, 0:2, :].astype(jnp.float32)         # (2,  W+2)
        xw = jnp.concatenate([xm, xh], axis=0)               # (TH+2, W+2)
        for dy in range(3):
            for dx in range(3):
                tap = xw[dy:dy + th, dx:dx + w]               # (TH, W)
                for o in range(cout):
                    k = w_ref[((o * cin + i) * 3 + dy) * 3 + dx]
                    term = k * tap
                    accs[o] = term if accs[o] is None else accs[o] + term

    for o in range(cout):
        a = accs[o] + b_ref[o]                                # f32 bias add
        if neg_slope is not None:                             # fused activation
            a = jnp.where(a >= 0, a, neg_slope * a)
        o_ref[0, o] = a.astype(o_ref.dtype)


def _pick_tile_h(hr, cin, cout, w, in_item, out_item, budget=8 * 1024 * 1024):
    """Largest row-tile TH (multiple of 8, dividing hr) under a VMEM budget."""
    m = hr // 8
    best = 8
    for d in range(1, m + 1):
        if m % d:
            continue
        th = 8 * d
        blk = 2 * cin * (th + 8) * (w + 2) * in_item          # 2x-buffered inputs
        blk += 2 * cout * th * w * out_item                   # 2x-buffered output
        blk += (cin + cout) * th * w * 4                      # f32 working set
        if blk <= budget:
            best = th
    return best


def edbb_rep_conv3x3(x_nchw, rk, rb, *, neg_slope, tile_h=None, out_dtype=None,
                     vmem_limit_bytes=32 * 1024 * 1024):
    """Fused 3x3 conv (weights rk (Cout,Cin,3,3), bias rb) + activation, NCHW."""
    N, Cin, H, W = x_nchw.shape
    Cout = rk.shape[0]
    out_dtype = x_nchw.dtype if out_dtype is None else out_dtype

    hr = ((H + 7) // 8) * 8                                   # 8-row alignment
    in_item = jnp.dtype(x_nchw.dtype).itemsize
    out_item = jnp.dtype(out_dtype).itemsize
    if tile_h is not None and tile_h % 8 == 0 and hr % tile_h == 0:
        th = tile_h
    else:
        th = _pick_tile_h(hr, Cin, Cout, W, in_item, out_item)
    num_t = hr // th
    wp = W + 2

    # Single zero-pad pass: 1-pixel conv halo on all sides plus extra bottom
    # rows so the last tile's 8-row halo block stays in bounds.
    xp = jnp.pad(x_nchw, ((0, 0), (0, 0), (1, hr - H + 7), (1, 1)))
    w_flat = rk.astype(jnp.float32).reshape(-1)               # (Cout*Cin*9,)
    b_vec = rb.astype(jnp.float32).reshape(-1)                # (Cout,)

    kernel = functools.partial(_edbb_rep3x3_kernel, neg_slope=neg_slope)
    y = pl.pallas_call(
        kernel,
        out_shape=jax.ShapeDtypeStruct((N, Cout, hr, W), out_dtype),
        grid_spec=pltpu.PrefetchScalarGridSpec(
            num_scalar_prefetch=0,
            grid=(N, num_t),
            in_specs=[
                pl.BlockSpec(memory_space=pltpu.MemorySpace.SMEM),   # RK flat
                pl.BlockSpec(memory_space=pltpu.MemorySpace.SMEM),   # RB
                # main rows [t*TH, (t+1)*TH) of the padded input
                pl.BlockSpec((1, Cin, th, wp), lambda n, t: (n, 0, t, 0)),
                # halo rows [(t+1)*TH, (t+1)*TH+8) of the same padded input
                pl.BlockSpec((1, Cin, 8, wp),
                             lambda n, t: (n, 0, (t + 1) * (th // 8), 0)),
            ],
            out_specs=pl.BlockSpec((1, Cout, th, W), lambda n, t: (n, 0, t, 0)),
        ),
        compiler_params=pltpu.CompilerParams(
            dimension_semantics=("parallel", "parallel"),
            vmem_limit_bytes=vmem_limit_bytes),
    )(w_flat, b_vec, xp, xp)

    return y if hr == H else y[:, :, :H, :]


# ---------------------------------------------------------------------------
# Fixed SeqConv3x3 masks (mirror the PyTorch __init__ tables).
# ---------------------------------------------------------------------------
def _make_mask(seq_type, out_planes):
    m = np.zeros((out_planes, 1, 3, 3), np.float32)
    if seq_type == 'conv1x1-sobelx':
        m[:, 0, 0, 0], m[:, 0, 1, 0], m[:, 0, 2, 0] = 1.0, 2.0, 1.0
        m[:, 0, 0, 2], m[:, 0, 1, 2], m[:, 0, 2, 2] = -1.0, -2.0, -1.0
    elif seq_type == 'conv1x1-sobely':
        m[:, 0, 0, 0], m[:, 0, 0, 1], m[:, 0, 0, 2] = 1.0, 2.0, 1.0
        m[:, 0, 2, 0], m[:, 0, 2, 1], m[:, 0, 2, 2] = -1.0, -2.0, -1.0
    elif seq_type == 'conv1x1-laplacian':
        m[:, 0, 0, 1] = m[:, 0, 1, 0] = m[:, 0, 1, 2] = m[:, 0, 2, 1] = 1.0
        m[:, 0, 1, 1] = -4.0
    else:
        raise ValueError('unsupported mask type: %s' % seq_type)
    return jnp.asarray(m)


# ---------------------------------------------------------------------------
# EDBB forward in Pallas: all branches folded into one 3x3 conv + activation.
# ---------------------------------------------------------------------------
class EDBBPallas:
    def __init__(self, inp_planes, out_planes, depth_multiplier=2.0,
                 act_type='lrelu', with_idt=True, deploy=False, with_13=True,
                 gv=False, key=None, tile_h=None):
        self.inp_planes, self.out_planes = inp_planes, out_planes
        self.deploy, self.gv, self.with_13 = deploy, gv, with_13
        self.with_idt = bool(with_idt and inp_planes == out_planes)
        self.tile_h = tile_h
        dm = 1.0 if depth_multiplier is None else depth_multiplier
        self.mid_planes = int(out_planes * dm)

        if act_type == 'lrelu':
            self._neg_slope = 0.01          # nn.LeakyReLU default slope
        elif act_type == 'relu':
            self._neg_slope = 0.0
        elif act_type == 'linear':
            self._neg_slope = None
        else:
            # TODO(synk): prelu / rrelu / softplus activations are not fused
            # into the kernel (would need an extra per-channel operand / RNG).
            raise ValueError('unsupported act_type for the Pallas kernel')

        key = jax.random.PRNGKey(0) if key is None else key
        ks = jax.random.split(key, 20)
        C_in, C_out, C_mid = inp_planes, out_planes, self.mid_planes

        def nrm(k, shape, s=0.1):
            return s * jax.random.normal(k, shape, jnp.float32)

        # rep_conv (3x3, padding=1) and conv1x1 (bias=True by default)
        self.rep_w, self.rep_b = nrm(ks[0], (C_out, C_in, 3, 3)), nrm(ks[1], (C_out,))
        self.c11_w, self.c11_b = nrm(ks[2], (C_out, C_in, 1, 1)), nrm(ks[3], (C_out,))
        # SeqConv3x3('conv1x1-conv3x3', ...)
        self.s13_k0, self.s13_b0 = nrm(ks[4], (C_mid, C_in, 1, 1)), nrm(ks[5], (C_mid,))
        self.s13_k1, self.s13_b1 = nrm(ks[6], (C_out, C_mid, 3, 3)), nrm(ks[7], (C_out,))

        # SeqConv3x3 fixed-mask branches (sobelx / sobely / laplacian)
        def fixed_branch(i, seq_type):
            return dict(
                k0=nrm(ks[i], (C_out, C_in, 1, 1)),
                b0=nrm(ks[i + 1], (C_out,)),
                scale=0.001 * jax.random.normal(ks[i + 2], (C_out, 1, 1, 1), jnp.float32),
                bias=0.001 * jax.random.normal(ks[i + 3], (C_out,), jnp.float32),
                mask=_make_mask(seq_type, C_out))
        self.sbx = fixed_branch(8, 'conv1x1-sobelx')
        self.sby = fixed_branch(12, 'conv1x1-sobely')
        self.lpl = fixed_branch(16, 'conv1x1-laplacian')

        # ------------------- reparameterize every branch -------------------
        def seq13_rep():
            k0 = self.s13_k0[:, :, 0, 0]                            # (Cmid, Cin)
            rk = jnp.einsum('omyx,mi->oiyx', self.s13_k1, k0)
            rb = jnp.einsum('omyx,m->o', self.s13_k1, self.s13_b0) + self.s13_b1
            return rk, rb

        def fixed_rep(p):
            w3 = (p['scale'] * p['mask'])[:, 0]                     # (Cout, 3, 3)
            k0 = p['k0'][:, :, 0, 0]                                # (Cout, Cin)
            rk = jnp.einsum('oyx,oi->oiyx', w3, k0)
            rb = jnp.sum(w3, axis=(1, 2)) * p['b0'] + p['bias']
            return rk, rb

        rk_sbx, rb_sbx = fixed_rep(self.sbx)
        rk_sby, rb_sby = fixed_rep(self.sby)
        rk_lpl, rb_lpl = fixed_rep(self.lpl)
        rk_13, rb_13 = seq13_rep()
        k5 = jnp.zeros((C_out, C_in, 3, 3), jnp.float32)
        k5 = k5.at[:, :, 1, 1].set(self.c11_w[:, :, 0, 0])          # 1x1 -> 3x3

        if deploy:
            RK, RB = self.rep_w, self.rep_b
        elif gv:
            assert C_in == C_out
            RK = self.rep_w + rk_sbx + rk_sby + rk_lpl
            RB = self.rep_b + rb_sbx + rb_sby + rb_lpl
            idx = jnp.arange(C_out)
            RK = RK.at[idx, idx, 1, 1].add(1.0)                     # + x
        else:
            RK = self.rep_w + k5 + rk_sbx + rk_sby + rk_lpl
            RB = self.rep_b + self.c11_b + rb_sbx + rb_sby + rb_lpl
            if self.with_idt:
                idx = jnp.arange(C_out)
                RK = RK.at[idx, idx, 1, 1].add(1.0)                 # + x
            if with_13:
                RK, RB = RK + rk_13, RB + rb_13
        self.rep_weight_fused = RK.astype(jnp.float32)
        self.rep_bias_fused = RB.astype(jnp.float32)

    # ------------------------------ forward -------------------------------
    def __call__(self, x_nchw, compute_dtype=None):
        dt = x_nchw.dtype if compute_dtype is None else compute_dtype
        xin = x_nchw.astype(dt)
        return edbb_rep_conv3x3(
            xin, self.rep_weight_fused, self.rep_bias_fused,
            neg_slope=self._neg_slope, tile_h=self.tile_h, out_dtype=dt)

    # ------------- pure-JAX reference: mirrors PyTorch literally ----------
    def reference(self, x):
        dn = ('NCHW', 'OIHW', 'NCHW')
        prec = lax.Precision.HIGHEST

        def conv(xx, w, b=None, pad='VALID', groups=1):
            y = lax.conv_general_dilated(xx, w, (1, 1), pad,
                                         dimension_numbers=dn,
                                         feature_group_count=groups,
                                         precision=prec)
            return y if b is None else y + b[None, :, None, None]

        def seqconv(xx, k0, b0, second):
            y0 = conv(xx, k0, b0)
            y0 = jnp.pad(y0, ((0, 0), (0, 0), (1, 1), (1, 1)))
            bp = b0[None, :, None, None]
            y0 = y0.at[:, :, :1, :].set(bp)
            y0 = y0.at[:, :, -1:, :].set(bp)
            y0 = y0.at[:, :, :, :1].set(bp)
            y0 = y0.at[:, :, :, -1:].set(bp)
            return second(y0)

        rep = conv(x, self.rep_w, self.rep_b, pad=((1, 1), (1, 1)))
        if self.deploy:
            y = rep
        else:
            def fixed(p):
                return seqconv(x, p['k0'], p['b0'],
                               lambda y0: conv(y0, p['scale'] * p['mask'],
                                               p['bias'], groups=self.out_planes))
            sbx, sby, lpl = fixed(self.sbx), fixed(self.sby), fixed(self.lpl)
            if self.gv:
                y = rep + sbx + sby + lpl + x
            else:
                y = rep + conv(x, self.c11_w, self.c11_b) + sbx + sby + lpl
                if self.with_idt:
                    y = y + x
                if self.with_13:
                    y = y + seqconv(x, self.s13_k0, self.s13_b0,
                                    lambda y0: conv(y0, self.s13_k1, self.s13_b1))
        if self._neg_slope is not None:
            y = jnp.where(y >= 0, y, self._neg_slope * y)
        return y


if __name__ == "__main__":
    root = jax.random.PRNGKey(0)
    kx, kmod = jax.random.split(root)

    # Small shapes consistent with the module (NCHW input).
    N, Cin, H, W = 2, 4, 16, 16
    Cout = 4
    x = jax.random.normal(kx, (N, Cin, H, W), jnp.float32)

    mod = EDBBPallas(Cin, Cout, depth_multiplier=2.0, act_type='lrelu',
                     with_idt=True, with_13=True, key=kmod)

    # Exact f32 path.
    y = jax.block_until_ready(mod(x))
    assert y.shape == (N, Cout, H, W)
    ref = mod.reference(x)
    np.testing.assert_allclose(np.asarray(y), np.asarray(ref),
                               rtol=5e-4, atol=5e-4)

    # bf16 in/out path: half the HBM traffic; f32 accumulation + f32 bias kept
    # inside the kernel, so only the input quantization error shows up.
    y_bf16 = jax.block_until_ready(mod(x, compute_dtype=jnp.bfloat16))
    np.testing.assert_allclose(np.asarray(y_bf16.astype(jnp.float32)),
                               np.asarray(ref), rtol=5e-2, atol=5e-2)

    print("KERNEL_OK")
</pallas_src>

<mosaic_0001>
module attributes {stable_mosaic.version = 11 : i64} {
  func.func @_edbb_rep3x3_kernel(%arg0: i32, %arg1: i32, %arg2: memref<144xf32, #tpu.memory_space<smem>>, %arg3: memref<4xf32, #tpu.memory_space<smem>>, %arg4: memref<1x4x16x18xf32, #tpu.memory_space<vmem>>, %arg5: memref<1x4x8x18xf32, #tpu.memory_space<vmem>>, %arg6: memref<1x4x16x16xf32, #tpu.memory_space<vmem>>) attributes {dimension_semantics = [#tpu.dimension_semantics<parallel>, #tpu.dimension_semantics<parallel>], iteration_bounds = array<i64: 2, 1>, scalar_prefetch = 0 : i64, scratch_operands = 0 : i64, tpu.core_type = #tpu.core_type<tc>, window_params = [{transform_indices = @transform_0, window_bounds = array<i64: 144>}, {transform_indices = @transform_1, window_bounds = array<i64: 4>}, {transform_indices = @transform_2, window_bounds = array<i64: 1, 4, 16, 18>}, {transform_indices = @transform_3, window_bounds = array<i64: 1, 4, 8, 18>}, {transform_indices = @transform_4, window_bounds = array<i64: 1, 4, 16, 16>}]} {
    %c0 = arith.constant 0 : index
    %c0_0 = arith.constant 0 : index
    %c0_1 = arith.constant 0 : index
    %c0_2 = arith.constant 0 : index
    %0 = vector.load %arg4[%c0, %c0_0, %c0_1, %c0_2] : memref<1x4x16x18xf32, #tpu.memory_space<vmem>>, vector<1x1x16x18xf32>
    %1 = vector.shape_cast %0 : vector<1x1x16x18xf32> to vector<16x18xf32>
    %c0_3 = arith.constant 0 : index
    %c0_4 = arith.constant 0 : index
    %c0_5 = arith.constant 0 : index
    %c0_6 = arith.constant 0 : index
    %2 = vector.load %arg5[%c0_3, %c0_4, %c0_5, %c0_6] : memref<1x4x8x18xf32, #tpu.memory_space<vmem>>, vector<1x1x2x18xf32>
    %3 = vector.shape_cast %2 : vector<1x1x2x18xf32> to vector<2x18xf32>
    %4 = tpu.concatenate %1, %3 in 0 : vector<16x18xf32>, vector<2x18xf32> -> vector<18x18xf32>
    %5 = vector.extract_strided_slice %4 {offsets = [0, 0], sizes = [16, 16], strides = [1, 1]} : vector<18x18xf32> to vector<16x16xf32>
    %c0_7 = arith.constant 0 : index
    %6 = memref.load %arg2[%c0_7] : memref<144xf32, #tpu.memory_space<smem>>
    %7 = vector.broadcast %6 : f32 to vector<16x16xf32>
    %8 = arith.mulf %7, %5 : vector<16x16xf32>
    %c36 = arith.constant 36 : index
    %9 = memref.load %arg2[%c36] : memref<144xf32, #tpu.memory_space<smem>>
    %10 = vector.broadcast %9 : f32 to vector<16x16xf32>
    %11 = arith.mulf %10, %5 : vector<16x16xf32>
    %c72 = arith.constant 72 : index
    %12 = memref.load %arg2[%c72] : memref<144xf32, #tpu.memory_space<smem>>
    %13 = vector.broadcast %12 : f32 to vector<16x16xf32>
    %14 = arith.mulf %13, %5 : vector<16x16xf32>
    %c108 = arith.constant 108 : index
    %15 = memref.load %arg2[%c108] : memref<144xf32, #tpu.memory_space<smem>>
    %16 = vector.broadcast %15 : f32 to vector<16x16xf32>
    %17 = arith.mulf %16, %5 : vector<16x16xf32>
    %18 = vector.extract_strided_slice %4 {offsets = [0, 1], sizes = [16, 16], strides = [1, 1]} : vector<18x18xf32> to vector<16x16xf32>
    %c1 = arith.constant 1 : index
    %19 = memref.load %arg2[%c1] : memref<144xf32, #tpu.memory_space<smem>>
    %20 = vector.broadcast %19 : f32 to vector<16x16xf32>
    %21 = arith.mulf %20, %18 : vector<16x16xf32>
    %22 = arith.addf %8, %21 : vector<16x16xf32>
    %c37 = arith.constant 37 : index
    %23 = memref.load %arg2[%c37] : memref<144xf32, #tpu.memory_space<smem>>
    %24 = vector.broadcast %23 : f32 to vector<16x16xf32>
    %25 = arith.mulf %24, %18 : vector<16x16xf32>
    %26 = arith.addf %11, %25 : vector<16x16xf32>
    %c73 = arith.constant 73 : index
    %27 = memref.load %arg2[%c73] : memref<144xf32, #tpu.memory_space<smem>>
    %28 = vector.broadcast %27 : f32 to vector<16x16xf32>
    %29 = arith.mulf %28, %18 : vector<16x16xf32>
    %30 = arith.addf %14, %29 : vector<16x16xf32>
    %c109 = arith.constant 109 : index
    %31 = memref.load %arg2[%c109] : memref<144xf32, #tpu.memory_space<smem>>
    %32 = vector.broadcast %31 : f32 to vector<16x16xf32>
    %33 = arith.mulf %32, %18 : vector<16x16xf32>
    %34 = arith.addf %17, %33 : vector<16x16xf32>
    %35 = vector.extract_strided_slice %4 {offsets = [0, 2], sizes = [16, 16], strides = [1, 1]} : vector<18x18xf32> to vector<16x16xf32>
    %c2 = arith.constant 2 : index
    %36 = memref.load %arg2[%c2] : memref<144xf32, #tpu.memory_space<smem>>
    %37 = vector.broadcast %36 : f32 to vector<16x16xf32>
    %38 = arith.mulf %37, %35 : vector<16x16xf32>
    %39 = arith.addf %22, %38 : vector<16x16xf32>
    %c38 = arith.constant 38 : index
    %40 = memref.load %arg2[%c38] : memref<144xf32, #tpu.memory_space<smem>>
    %41 = vector.broadcast %40 : f32 to vector<16x16xf32>
    %42 = arith.mulf %41, %35 : vector<16x16xf32>
    %43 = arith.addf %26, %42 : vector<16x16xf32>
    %c74 = arith.constant 74 : index
    %44 = memref.load %arg2[%c74] : memref<144xf32, #tpu.memory_space<smem>>
    %45 = vector.broadcast %44 : f32 to vector<16x16xf32>
    %46 = arith.mulf %45, %35 : vector<16x16xf32>
    %47 = arith.addf %30, %46 : vector<16x16xf32>
    %c110 = arith.constant 110 : index
    %48 = memref.load %arg2[%c110] : memref<144xf32, #tpu.memory_space<smem>>
    %49 = vector.broadcast %48 : f32 to vector<16x16xf32>
    %50 = arith.mulf %49, %35 : vector<16x16xf32>
    %51 = arith.addf %34, %50 : vector<16x16xf32>
    %52 = vector.extract_strided_slice %4 {offsets = [1, 0], sizes = [16, 16], strides = [1, 1]} : vector<18x18xf32> to vector<16x16xf32>
    %c3 = arith.constant 3 : index
    %53 = memref.load %arg2[%c3] : memref<144xf32, #tpu.memory_space<smem>>
    %54 = vector.broadcast %53 : f32 to vector<16x16xf32>
    %55 = arith.mulf %54, %52 : vector<16x16xf32>
    %56 = arith.addf %39, %55 : vector<16x16xf32>
    %c39 = arith.constant 39 : index
    %57 = memref.load %arg2[%c39] : memref<144xf32, #tpu.memory_space<smem>>
    %58 = vector.broadcast %57 : f32 to vector<16x16xf32>
    %59 = arith.mulf %58, %52 : vector<16x16xf32>
    %60 = arith.addf %43, %59 : vector<16x16xf32>
    %c75 = arith.constant 75 : index
    %61 = memref.load %arg2[%c75] : memref<144xf32, #tpu.memory_space<smem>>
    %62 = vector.broadcast %61 : f32 to vector<16x16xf32>
    %63 = arith.mulf %62, %52 : vector<16x16xf32>
    %64 = arith.addf %47, %63 : vector<16x16xf32>
    %c111 = arith.constant 111 : index
    %65 = memref.load %arg2[%c111] : memref<144xf32, #tpu.memory_space<smem>>
    %66 = vector.broadcast %65 : f32 to vector<16x16xf32>
    %67 = arith.mulf %66, %52 : vector<16x16xf32>
    %68 = arith.addf %51, %67 : vector<16x16xf32>
    %69 = vector.extract_strided_slice %4 {offsets = [1, 1], sizes = [16, 16], strides = [1, 1]} : vector<18x18xf32> to vector<16x16xf32>
    %c4 = arith.constant 4 : index
    %70 = memref.load %arg2[%c4] : memref<144xf32, #tpu.memory_space<smem>>
    %71 = vector.broadcast %70 : f32 to vector<16x16xf32>
    %72 = arith.mulf %71, %69 : vector<16x16xf32>
    %73 = arith.addf %56, %72 : vector<16x16xf32>
    %c40 = arith.constant 40 : index
    %74 = memref.load %arg2[%c40] : memref<144xf32, #tpu.memory_space<smem>>
    %75 = vector.broadcast %74 : f32 to vector<16x16xf32>
    %76 = arith.mulf %75, %69 : vector<16x16xf32>
    %77 = arith.addf %60, %76 : vector<16x16xf32>
    %c76 = arith.constant 76 : index
    %78 = memref.load %arg2[%c76] : memref<144xf32, #tpu.memory_space<smem>>
    %79 = vector.broadcast %78 : f32 to vector<16x16xf32>
    %80 = arith.mulf %79, %69 : vector<16x16xf32>
    %81 = arith.addf %64, %80 : vector<16x16xf32>
    %c112 = arith.constant 112 : index
    %82 = memref.load %arg2[%c112] : memref<144xf32, #tpu.memory_space<smem>>
    %83 = vector.broadcast %82 : f32 to vector<16x16xf32>
    %84 = arith.mulf %83, %69 : vector<16x16xf32>
    %85 = arith.addf %68, %84 : vector<16x16xf32>
    %86 = vector.extract_strided_slice %4 {offsets = [1, 2], sizes = [16, 16], strides = [1, 1]} : vector<18x18xf32> to vector<16x16xf32>
    %c5 = arith.constant 5 : index
    %87 = memref.load %arg2[%c5] : memref<144xf32, #tpu.memory_space<smem>>
    %88 = vector.broadcast %87 : f32 to vector<16x16xf32>
    %89 = arith.mulf %88, %86 : vector<16x16xf32>
    %90 = arith.addf %73, %89 : vector<16x16xf32>
    %c41 = arith.constant 41 : index
    %91 = memref.load %arg2[%c41] : memref<144xf32, #tpu.memory_space<smem>>
    %92 = vector.broadcast %91 : f32 to vector<16x16xf32>
    %93 = arith.mulf %92, %86 : vector<16x16xf32>
    %94 = arith.addf %77, %93 : vector<16x16xf32>
    %c77 = arith.constant 77 : index
    %95 = memref.load %arg2[%c77] : memref<144xf32, #tpu.memory_space<smem>>
    %96 = vector.broadcast %95 : f32 to vector<16x16xf32>
    %97 = arith.mulf %96, %86 : vector<16x16xf32>
    %98 = arith.addf %81, %97 : vector<16x16xf32>
    %c113 = arith.constant 113 : index
    %99 = memref.load %arg2[%c113] : memref<144xf32, #tpu.memory_space<smem>>
    %100 = vector.broadcast %99 : f32 to vector<16x16xf32>
    %101 = arith.mulf %100, %86 : vector<16x16xf32>
    %102 = arith.addf %85, %101 : vector<16x16xf32>
    %103 = vector.extract_strided_slice %4 {offsets = [2, 0], sizes = [16, 16], strides = [1, 1]} : vector<18x18xf32> to vector<16x16xf32>
    %c6 = arith.constant 6 : index
    %104 = memref.load %arg2[%c6] : memref<144xf32, #tpu.memory_space<smem>>
    %105 = vector.broadcast %104 : f32 to vector<16x16xf32>
    %106 = arith.mulf %105, %103 : vector<16x16xf32>
    %107 = arith.addf %90, %106 : vector<16x16xf32>
    %c42 = arith.constant 42 : index
    %108 = memref.load %arg2[%c42] : memref<144xf32, #tpu.memory_space<smem>>
    %109 = vector.broadcast %108 : f32 to vector<16x16xf32>
    %110 = arith.mulf %109, %103 : vector<16x16xf32>
    %111 = arith.addf %94, %110 : vector<16x16xf32>
    %c78 = arith.constant 78 : index
    %112 = memref.load %arg2[%c78] : memref<144xf32, #tpu.memory_space<smem>>
    %113 = vector.broadcast %112 : f32 to vector<16x16xf32>
    %114 = arith.mulf %113, %103 : vector<16x16xf32>
    %115 = arith.addf %98, %114 : vector<16x16xf32>
    %c114 = arith.constant 114 : index
    %116 = memref.load %arg2[%c114] : memref<144xf32, #tpu.memory_space<smem>>
    %117 = vector.broadcast %116 : f32 to vector<16x16xf32>
    %118 = arith.mulf %117, %103 : vector<16x16xf32>
    %119 = arith.addf %102, %118 : vector<16x16xf32>
    %120 = vector.extract_strided_slice %4 {offsets = [2, 1], sizes = [16, 16], strides = [1, 1]} : vector<18x18xf32> to vector<16x16xf32>
    %c7 = arith.constant 7 : index
    %121 = memref.load %arg2[%c7] : memref<144xf32, #tpu.memory_space<smem>>
    %122 = vector.broadcast %121 : f32 to vector<16x16xf32>
    %123 = arith.mulf %122, %120 : vector<16x16xf32>
    %124 = arith.addf %107, %123 : vector<16x16xf32>
    %c43 = arith.constant 43 : index
    %125 = memref.load %arg2[%c43] : memref<144xf32, #tpu.memory_space<smem>>
    %126 = vector.broadcast %125 : f32 to vector<16x16xf32>
    %127 = arith.mulf %126, %120 : vector<16x16xf32>
    %128 = arith.addf %111, %127 : vector<16x16xf32>
    %c79 = arith.constant 79 : index
    %129 = memref.load %arg2[%c79] : memref<144xf32, #tpu.memory_space<smem>>
    %130 = vector.broadcast %129 : f32 to vector<16x16xf32>
    %131 = arith.mulf %130, %120 : vector<16x16xf32>
    %132 = arith.addf %115, %131 : vector<16x16xf32>
    %c115 = arith.constant 115 : index
    %133 = memref.load %arg2[%c115] : memref<144xf32, #tpu.memory_space<smem>>
    %134 = vector.broadcast %133 : f32 to vector<16x16xf32>
    %135 = arith.mulf %134, %120 : vector<16x16xf32>
    %136 = arith.addf %119, %135 : vector<16x16xf32>
    %137 = vector.extract_strided_slice %4 {offsets = [2, 2], sizes = [16, 16], strides = [1, 1]} : vector<18x18xf32> to vector<16x16xf32>
    %c8 = arith.constant 8 : index
    %138 = memref.load %arg2[%c8] : memref<144xf32, #tpu.memory_space<smem>>
    %139 = vector.broadcast %138 : f32 to vector<16x16xf32>
    %140 = arith.mulf %139, %137 : vector<16x16xf32>
    %141 = arith.addf %124, %140 : vector<16x16xf32>
    %c44 = arith.constant 44 : index
    %142 = memref.load %arg2[%c44] : memref<144xf32, #tpu.memory_space<smem>>
    %143 = vector.broadcast %142 : f32 to vector<16x16xf32>
    %144 = arith.mulf %143, %137 : vector<16x16xf32>
    %145 = arith.addf %128, %144 : vector<16x16xf32>
    %c80 = arith.constant 80 : index
    %146 = memref.load %arg2[%c80] : memref<144xf32, #tpu.memory_space<smem>>
    %147 = vector.broadcast %146 : f32 to vector<16x16xf32>
    %148 = arith.mulf %147, %137 : vector<16x16xf32>
    %149 = arith.addf %132, %148 : vector<16x16xf32>
    %c116 = arith.constant 116 : index
    %150 = memref.load %arg2[%c116] : memref<144xf32, #tpu.memory_space<smem>>
    %151 = vector.broadcast %150 : f32 to vector<16x16xf32>
    %152 = arith.mulf %151, %137 : vector<16x16xf32>
    %153 = arith.addf %136, %152 : vector<16x16xf32>
    %c0_8 = arith.constant 0 : index
    %c1_9 = arith.constant 1 : index
    %c0_10 = arith.constant 0 : index
    %c0_11 = arith.constant 0 : index
    %154 = vector.load %arg4[%c0_8, %c1_9, %c0_10, %c0_11] : memref<1x4x16x18xf32, #tpu.memory_space<vmem>>, vector<1x1x16x18xf32>
    %155 = vector.shape_cast %154 : vector<1x1x16x18xf32> to vector<16x18xf32>
    %c0_12 = arith.constant 0 : index
    %c1_13 = arith.constant 1 : index
    %c0_14 = arith.constant 0 : index
    %c0_15 = arith.constant 0 : index
    %156 = vector.load %arg5[%c0_12, %c1_13, %c0_14, %c0_15] : memref<1x4x8x18xf32, #tpu.memory_space<vmem>>, vector<1x1x2x18xf32>
    %157 = vector.shape_cast %156 : vector<1x1x2x18xf32> to vector<2x18xf32>
    %158 = tpu.concatenate %155, %157 in 0 : vector<16x18xf32>, vector<2x18xf32> -> vector<18x18xf32>
    %159 = vector.extract_strided_slice %158 {offsets = [0, 0], sizes = [16, 16], strides = [1, 1]} : vector<18x18xf32> to vector<16x16xf32>
    %c9 = arith.constant 9 : index
    %160 = memref.load %arg2[%c9] : memref<144xf32, #tpu.memory_space<smem>>
    %161 = vector.broadcast %160 : f32 to vector<16x16xf32>
    %162 = arith.mulf %161, %159 : vector<16x16xf32>
    %163 = arith.addf %141, %162 : vector<16x16xf32>
    %c45 = arith.constant 45 : index
    %164 = memref.load %arg2[%c45] : memref<144xf32, #tpu.memory_space<smem>>
    %165 = vector.broadcast %164 : f32 to vector<16x16xf32>
    %166 = arith.mulf %165, %159 : vector<16x16xf32>
    %167 = arith.addf %145, %166 : vector<16x16xf32>
    %c81 = arith.constant 81 : index
    %168 = memref.load %arg2[%c81] : memref<144xf32, #tpu.memory_space<smem>>
    %169 = vector.broadcast %168 : f32 to vector<16x16xf32>
    %170 = arith.mulf %169, %159 : vector<16x16xf32>
    %171 = arith.addf %149, %170 : vector<16x16xf32>
    %c117 = arith.constant 117 : index
    %172 = memref.load %arg2[%c117] : memref<144xf32, #tpu.memory_space<smem>>
    %173 = vector.broadcast %172 : f32 to vector<16x16xf32>
    %174 = arith.mulf %173, %159 : vector<16x16xf32>
    %175 = arith.addf %153, %174 : vector<16x16xf32>
    %176 = vector.extract_strided_slice %158 {offsets = [0, 1], sizes = [16, 16], strides = [1, 1]} : vector<18x18xf32> to vector<16x16xf32>
    %c10 = arith.constant 10 : index
    %177 = memref.load %arg2[%c10] : memref<144xf32, #tpu.memory_space<smem>>
    %178 = vector.broadcast %177 : f32 to vector<16x16xf32>
    %179 = arith.mulf %178, %176 : vector<16x16xf32>
    %180 = arith.addf %163, %179 : vector<16x16xf32>
    %c46 = arith.constant 46 : index
    %181 = memref.load %arg2[%c46] : memref<144xf32, #tpu.memory_space<smem>>
    %182 = vector.broadcast %181 : f32 to vector<16x16xf32>
    %183 = arith.mulf %182, %176 : vector<16x16xf32>
    %184 = arith.addf %167, %183 : vector<16x16xf32>
    %c82 = arith.constant 82 : index
    %185 = memref.load %arg2[%c82] : memref<144xf32, #tpu.memory_space<smem>>
    %186 = vector.broadcast %185 : f32 to vector<16x16xf32>
    %187 = arith.mulf %186, %176 : vector<16x16xf32>
    %188 = arith.addf %171, %187 : vector<16x16xf32>
    %c118 = arith.constant 118 : index
    %189 = memref.load %arg2[%c118] : memref<144xf32, #tpu.memory_space<smem>>
    %190 = vector.broadcast %189 : f32 to vector<16x16xf32>
    %191 = arith.mulf %190, %176 : vector<16x16xf32>
    %192 = arith.addf %175, %191 : vector<16x16xf32>
    %193 = vector.extract_strided_slice %158 {offsets = [0, 2], sizes = [16, 16], strides = [1, 1]} : vector<18x18xf32> to vector<16x16xf32>
    %c11 = arith.constant 11 : index
    %194 = memref.load %arg2[%c11] : memref<144xf32, #tpu.memory_space<smem>>
    %195 = vector.broadcast %194 : f32 to vector<16x16xf32>
    %196 = arith.mulf %195, %193 : vector<16x16xf32>
    %197 = arith.addf %180, %196 : vector<16x16xf32>
    %c47 = arith.constant 47 : index
    %198 = memref.load %arg2[%c47] : memref<144xf32, #tpu.memory_space<smem>>
    %199 = vector.broadcast %198 : f32 to vector<16x16xf32>
    %200 = arith.mulf %199, %193 : vector<16x16xf32>
    %201 = arith.addf %184, %200 : vector<16x16xf32>
    %c83 = arith.constant 83 : index
    %202 = memref.load %arg2[%c83] : memref<144xf32, #tpu.memory_space<smem>>
    %203 = vector.broadcast %202 : f32 to vector<16x16xf32>
    %204 = arith.mulf %203, %193 : vector<16x16xf32>
    %205 = arith.addf %188, %204 : vector<16x16xf32>
    %c119 = arith.constant 119 : index
    %206 = memref.load %arg2[%c119] : memref<144xf32, #tpu.memory_space<smem>>
    %207 = vector.broadcast %206 : f32 to vector<16x16xf32>
    %208 = arith.mulf %207, %193 : vector<16x16xf32>
    %209 = arith.addf %192, %208 : vector<16x16xf32>
    %210 = vector.extract_strided_slice %158 {offsets = [1, 0], sizes = [16, 16], strides = [1, 1]} : vector<18x18xf32> to vector<16x16xf32>
    %c12 = arith.constant 12 : index
    %211 = memref.load %arg2[%c12] : memref<144xf32, #tpu.memory_space<smem>>
    %212 = vector.broadcast %211 : f32 to vector<16x16xf32>
    %213 = arith.mulf %212, %210 : vector<16x16xf32>
    %214 = arith.addf %197, %213 : vector<16x16xf32>
    %c48 = arith.constant 48 : index
    %215 = memref.load %arg2[%c48] : memref<144xf32, #tpu.memory_space<smem>>
    %216 = vector.broadcast %215 : f32 to vector<16x16xf32>
    %217 = arith.mulf %216, %210 : vector<16x16xf32>
    %218 = arith.addf %201, %217 : vector<16x16xf32>
    %c84 = arith.constant 84 : index
    %219 = memref.load %arg2[%c84] : memref<144xf32, #tpu.memory_space<smem>>
    %220 = vector.broadcast %219 : f32 to vector<16x16xf32>
    %221 = arith.mulf %220, %210 : vector<16x16xf32>
    %222 = arith.addf %205, %221 : vector<16x16xf32>
    %c120 = arith.constant 120 : index
    %223 = memref.load %arg2[%c120] : memref<144xf32, #tpu.memory_space<smem>>
    %224 = vector.broadcast %223 : f32 to vector<16x16xf32>
    %225 = arith.mulf %224, %210 : vector<16x16xf32>
    %226 = arith.addf %209, %225 : vector<16x16xf32>
    %227 = vector.extract_strided_slice %158 {offsets = [1, 1], sizes = [16, 16], strides = [1, 1]} : vector<18x18xf32> to vector<16x16xf32>
    %c13 = arith.constant 13 : index
    %228 = memref.load %arg2[%c13] : memref<144xf32, #tpu.memory_space<smem>>
    %229 = vector.broadcast %228 : f32 to vector<16x16xf32>
    %230 = arith.mulf %229, %227 : vector<16x16xf32>
    %231 = arith.addf %214, %230 : vector<16x16xf32>
    %c49 = arith.constant 49 : index
    %232 = memref.load %arg2[%c49] : memref<144xf32, #tpu.memory_space<smem>>
    %233 = vector.broadcast %232 : f32 to vector<16x16xf32>
    %234 = arith.mulf %233, %227 : vector<16x16xf32>
    %235 = arith.addf %218, %234 : vector<16x16xf32>
    %c85 = arith.constant 85 : index
    %236 = memref.load %arg2[%c85] : memref<144xf32, #tpu.memory_space<smem>>
    %237 = vector.broadcast %236 : f32 to vector<16x16xf32>
    %238 = arith.mulf %237, %227 : vector<16x16xf32>
    %239 = arith.addf %222, %238 : vector<16x16xf32>
    %c121 = arith.constant 121 : index
    %240 = memref.load %arg2[%c121] : memref<144xf32, #tpu.memory_space<smem>>
    %241 = vector.broadcast %240 : f32 to vector<16x16xf32>
    %242 = arith.mulf %241, %227 : vector<16x16xf32>
    %243 = arith.addf %226, %242 : vector<16x16xf32>
    %244 = vector.extract_strided_slice %158 {offsets = [1, 2], sizes = [16, 16], strides = [1, 1]} : vector<18x18xf32> to vector<16x16xf32>
    %c14 = arith.constant 14 : index
    %245 = memref.load %arg2[%c14] : memref<144xf32, #tpu.memory_space<smem>>
    %246 = vector.broadcast %245 : f32 to vector<16x16xf32>
    %247 = arith.mulf %246, %244 : vector<16x16xf32>
    %248 = arith.addf %231, %247 : vector<16x16xf32>
    %c50 = arith.constant 50 : index
    %249 = memref.load %arg2[%c50] : memref<144xf32, #tpu.memory_space<smem>>
    %250 = vector.broadcast %249 : f32 to vector<16x16xf32>
    %251 = arith.mulf %250, %244 : vector<16x16xf32>
    %252 = arith.addf %235, %251 : vector<16x16xf32>
    %c86 = arith.constant 86 : index
    %253 = memref.load %arg2[%c86] : memref<144xf32, #tpu.memory_space<smem>>
    %254 = vector.broadcast %253 : f32 to vector<16x16xf32>
    %255 = arith.mulf %254, %244 : vector<16x16xf32>
    %256 = arith.addf %239, %255 : vector<16x16xf32>
    %c122 = arith.constant 122 : index
    %257 = memref.load %arg2[%c122] : memref<144xf32, #tpu.memory_space<smem>>
    %258 = vector.broadcast %257 : f32 to vector<16x16xf32>
    %259 = arith.mulf %258, %244 : vector<16x16xf32>
    %260 = arith.addf %243, %259 : vector<16x16xf32>
    %261 = vector.extract_strided_slice %158 {offsets = [2, 0], sizes = [16, 16], strides = [1, 1]} : vector<18x18xf32> to vector<16x16xf32>
    %c15 = arith.constant 15 : index
    %262 = memref.load %arg2[%c15] : memref<144xf32, #tpu.memory_space<smem>>
    %263 = vector.broadcast %262 : f32 to vector<16x16xf32>
    %264 = arith.mulf %263, %261 : vector<16x16xf32>
    %265 = arith.addf %248, %264 : vector<16x16xf32>
    %c51 = arith.constant 51 : index
    %266 = memref.load %arg2[%c51] : memref<144xf32, #tpu.memory_space<smem>>
    %267 = vector.broadcast %266 : f32 to vector<16x16xf32>
    %268 = arith.mulf %267, %261 : vector<16x16xf32>
    %269 = arith.addf %252, %268 : vector<16x16xf32>
    %c87 = arith.constant 87 : index
    %270 = memref.load %arg2[%c87] : memref<144xf32, #tpu.memory_space<smem>>
    %271 = vector.broadcast %270 : f32 to vector<16x16xf32>
    %272 = arith.mulf %271, %261 : vector<16x16xf32>
    %273 = arith.addf %256, %272 : vector<16x16xf32>
    %c123 = arith.constant 123 : index
    %274 = memref.load %arg2[%c123] : memref<144xf32, #tpu.memory_space<smem>>
    %275 = vector.broadcast %274 : f32 to vector<16x16xf32>
    %276 = arith.mulf %275, %261 : vector<16x16xf32>
    %277 = arith.addf %260, %276 : vector<16x16xf32>
    %278 = vector.extract_strided_slice %158 {offsets = [2, 1], sizes = [16, 16], strides = [1, 1]} : vector<18x18xf32> to vector<16x16xf32>
    %c16 = arith.constant 16 : index
    %279 = memref.load %arg2[%c16] : memref<144xf32, #tpu.memory_space<smem>>
    %280 = vector.broadcast %279 : f32 to vector<16x16xf32>
    %281 = arith.mulf %280, %278 : vector<16x16xf32>
    %282 = arith.addf %265, %281 : vector<16x16xf32>
    %c52 = arith.constant 52 : index
    %283 = memref.load %arg2[%c52] : memref<144xf32, #tpu.memory_space<smem>>
    %284 = vector.broadcast %283 : f32 to vector<16x16xf32>
    %285 = arith.mulf %284, %278 : vector<16x16xf32>
    %286 = arith.addf %269, %285 : vector<16x16xf32>
    %c88 = arith.constant 88 : index
    %287 = memref.load %arg2[%c88] : memref<144xf32, #tpu.memory_space<smem>>
    %288 = vector.broadcast %287 : f32 to vector<16x16xf32>
    %289 = arith.mulf %288, %278 : vector<16x16xf32>
    %290 = arith.addf %273, %289 : vector<16x16xf32>
    %c124 = arith.constant 124 : index
    %291 = memref.load %arg2[%c124] : memref<144xf32, #tpu.memory_space<smem>>
    %292 = vector.broadcast %291 : f32 to vector<16x16xf32>
    %293 = arith.mulf %292, %278 : vector<16x16xf32>
    %294 = arith.addf %277, %293 : vector<16x16xf32>
    %295 = vector.extract_strided_slice %158 {offsets = [2, 2], sizes = [16, 16], strides = [1, 1]} : vector<18x18xf32> to vector<16x16xf32>
    %c17 = arith.constant 17 : index
    %296 = memref.load %arg2[%c17] : memref<144xf32, #tpu.memory_space<smem>>
    %297 = vector.broadcast %296 : f32 to vector<16x16xf32>
    %298 = arith.mulf %297, %295 : vector<16x16xf32>
    %299 = arith.addf %282, %298 : vector<16x16xf32>
    %c53 = arith.constant 53 : index
    %300 = memref.load %arg2[%c53] : memref<144xf32, #tpu.memory_space<smem>>
    %301 = vector.broadcast %300 : f32 to vector<16x16xf32>
    %302 = arith.mulf %301, %295 : vector<16x16xf32>
    %303 = arith.addf %286, %302 : vector<16x16xf32>
    %c89 = arith.constant 89 : index
    %304 = memref.load %arg2[%c89] : memref<144xf32, #tpu.memory_space<smem>>
    %305 = vector.broadcast %304 : f32 to vector<16x16xf32>
    %306 = arith.mulf %305, %295 : vector<16x16xf32>
    %307 = arith.addf %290, %306 : vector<16x16xf32>
    %c125 = arith.constant 125 : index
    %308 = memref.load %arg2[%c125] : memref<144xf32, #tpu.memory_space<smem>>
    %309 = vector.broadcast %308 : f32 to vector<16x16xf32>
    %310 = arith.mulf %309, %295 : vector<16x16xf32>
    %311 = arith.addf %294, %310 : vector<16x16xf32>
    %c0_16 = arith.constant 0 : index
    %c2_17 = arith.constant 2 : index
    %c0_18 = arith.constant 0 : index
    %c0_19 = arith.constant 0 : index
    %312 = vector.load %arg4[%c0_16, %c2_17, %c0_18, %c0_19] : memref<1x4x16x18xf32, #tpu.memory_space<vmem>>, vector<1x1x16x18xf32>
    %313 = vector.shape_cast %312 : vector<1x1x16x18xf32> to vector<16x18xf32>
    %c0_20 = arith.constant 0 : index
    %c2_21 = arith.constant 2 : index
    %c0_22 = arith.constant 0 : index
    %c0_23 = arith.constant 0 : index
    %314 = vector.load %arg5[%c0_20, %c2_21, %c0_22, %c0_23] : memref<1x4x8x18xf32, #tpu.memory_space<vmem>>, vector<1x1x2x18xf32>
    %315 = vector.shape_cast %314 : vector<1x1x2x18xf32> to vector<2x18xf32>
    %316 = tpu.concatenate %313, %315 in 0 : vector<16x18xf32>, vector<2x18xf32> -> vector<18x18xf32>
    %317 = vector.extract_strided_slice %316 {offsets = [0, 0], sizes = [16, 16], strides = [1, 1]} : vector<18x18xf32> to vector<16x16xf32>
    %c18 = arith.constant 18 : index
    %318 = memref.load %arg2[%c18] : memref<144xf32, #tpu.memory_space<smem>>
    %319 = vector.broadcast %318 : f32 to vector<16x16xf32>
    %320 = arith.mulf %319, %317 : vector<16x16xf32>
    %321 = arith.addf %299, %320 : vector<16x16xf32>
    %c54 = arith.constant 54 : index
    %322 = memref.load %arg2[%c54] : memref<144xf32, #tpu.memory_space<smem>>
    %323 = vector.broadcast %322 : f32 to vector<16x16xf32>
    %324 = arith.mulf %323, %317 : vector<16x16xf32>
    %325 = arith.addf %303, %324 : vector<16x16xf32>
    %c90 = arith.constant 90 : index
    %326 = memref.load %arg2[%c90] : memref<144xf32, #tpu.memory_space<smem>>
    %327 = vector.broadcast %326 : f32 to vector<16x16xf32>
    %328 = arith.mulf %327, %317 : vector<16x16xf32>
    %329 = arith.addf %307, %328 : vector<16x16xf32>
    %c126 = arith.constant 126 : index
    %330 = memref.load %arg2[%c126] : memref<144xf32, #tpu.memory_space<smem>>
    %331 = vector.broadcast %330 : f32 to vector<16x16xf32>
    %332 = arith.mulf %331, %317 : vector<16x16xf32>
    %333 = arith.addf %311, %332 : vector<16x16xf32>
    %334 = vector.extract_strided_slice %316 {offsets = [0, 1], sizes = [16, 16], strides = [1, 1]} : vector<18x18xf32> to vector<16x16xf32>
    %c19 = arith.constant 19 : index
    %335 = memref.load %arg2[%c19] : memref<144xf32, #tpu.memory_space<smem>>
    %336 = vector.broadcast %335 : f32 to vector<16x16xf32>
    %337 = arith.mulf %336, %334 : vector<16x16xf32>
    %338 = arith.addf %321, %337 : vector<16x16xf32>
    %c55 = arith.constant 55 : index
    %339 = memref.load %arg2[%c55] : memref<144xf32, #tpu.memory_space<smem>>
    %340 = vector.broadcast %339 : f32 to vector<16x16xf32>
    %341 = arith.mulf %340, %334 : vector<16x16xf32>
    %342 = arith.addf %325, %341 : vector<16x16xf32>
    %c91 = arith.constant 91 : index
    %343 = memref.load %arg2[%c91] : memref<144xf32, #tpu.memory_space<smem>>
    %344 = vector.broadcast %343 : f32 to vector<16x16xf32>
    %345 = arith.mulf %344, %334 : vector<16x16xf32>
    %346 = arith.addf %329, %345 : vector<16x16xf32>
    %c127 = arith.constant 127 : index
    %347 = memref.load %arg2[%c127] : memref<144xf32, #tpu.memory_space<smem>>
    %348 = vector.broadcast %347 : f32 to vector<16x16xf32>
    %349 = arith.mulf %348, %334 : vector<16x16xf32>
    %350 = arith.addf %333, %349 : vector<16x16xf32>
    %351 = vector.extract_strided_slice %316 {offsets = [0, 2], sizes = [16, 16], strides = [1, 1]} : vector<18x18xf32> to vector<16x16xf32>
    %c20 = arith.constant 20 : index
    %352 = memref.load %arg2[%c20] : memref<144xf32, #tpu.memory_space<smem>>
    %353 = vector.broadcast %352 : f32 to vector<16x16xf32>
    %354 = arith.mulf %353, %351 : vector<16x16xf32>
    %355 = arith.addf %338, %354 : vector<16x16xf32>
    %c56 = arith.constant 56 : index
    %356 = memref.load %arg2[%c56] : memref<144xf32, #tpu.memory_space<smem>>
    %357 = vector.broadcast %356 : f32 to vector<16x16xf32>
    %358 = arith.mulf %357, %351 : vector<16x16xf32>
    %359 = arith.addf %342, %358 : vector<16x16xf32>
    %c92 = arith.constant 92 : index
    %360 = memref.load %arg2[%c92] : memref<144xf32, #tpu.memory_space<smem>>
    %361 = vector.broadcast %360 : f32 to vector<16x16xf32>
    %362 = arith.mulf %361, %351 : vector<16x16xf32>
    %363 = arith.addf %346, %362 : vector<16x16xf32>
    %c128 = arith.constant 128 : index
    %364 = memref.load %arg2[%c128] : memref<144xf32, #tpu.memory_space<smem>>
    %365 = vector.broadcast %364 : f32 to vector<16x16xf32>
    %366 = arith.mulf %365, %351 : vector<16x16xf32>
    %367 = arith.addf %350, %366 : vector<16x16xf32>
    %368 = vector.extract_strided_slice %316 {offsets = [1, 0], sizes = [16, 16], strides = [1, 1]} : vector<18x18xf32> to vector<16x16xf32>
    %c21 = arith.constant 21 : index
    %369 = memref.load %arg2[%c21] : memref<144xf32, #tpu.memory_space<smem>>
    %370 = vector.broadcast %369 : f32 to vector<16x16xf32>
    %371 = arith.mulf %370, %368 : vector<16x16xf32>
    %372 = arith.addf %355, %371 : vector<16x16xf32>
    %c57 = arith.constant 57 : index
    %373 = memref.load %arg2[%c57] : memref<144xf32, #tpu.memory_space<smem>>
    %374 = vector.broadcast %373 : f32 to vector<16x16xf32>
    %375 = arith.mulf %374, %368 : vector<16x16xf32>
    %376 = arith.addf %359, %375 : vector<16x16xf32>
    %c93 = arith.constant 93 : index
    %377 = memref.load %arg2[%c93] : memref<144xf32, #tpu.memory_space<smem>>
    %378 = vector.broadcast %377 : f32 to vector<16x16xf32>
    %379 = arith.mulf %378, %368 : vector<16x16xf32>
    %380 = arith.addf %363, %379 : vector<16x16xf32>
    %c129 = arith.constant 129 : index
    %381 = memref.load %arg2[%c129] : memref<144xf32, #tpu.memory_space<smem>>
    %382 = vector.broadcast %381 : f32 to vector<16x16xf32>
    %383 = arith.mulf %382, %368 : vector<16x16xf32>
    %384 = arith.addf %367, %383 : vector<16x16xf32>
    %385 = vector.extract_strided_slice %316 {offsets = [1, 1], sizes = [16, 16], strides = [1, 1]} : vector<18x18xf32> to vector<16x16xf32>
    %c22 = arith.constant 22 : index
    %386 = memref.load %arg2[%c22] : memref<144xf32, #tpu.memory_space<smem>>
    %387 = vector.broadcast %386 : f32 to vector<16x16xf32>
    %388 = arith.mulf %387, %385 : vector<16x16xf32>
    %389 = arith.addf %372, %388 : vector<16x16xf32>
    %c58 = arith.constant 58 : index
    %390 = memref.load %arg2[%c58] : memref<144xf32, #tpu.memory_space<smem>>
    %391 = vector.broadcast %390 : f32 to vector<16x16xf32>
    %392 = arith.mulf %391, %385 : vector<16x16xf32>
    %393 = arith.addf %376, %392 : vector<16x16xf32>
    %c94 = arith.constant 94 : index
    %394 = memref.load %arg2[%c94] : memref<144xf32, #tpu.memory_space<smem>>
    %395 = vector.broadcast %394 : f32 to vector<16x16xf32>
    %396 = arith.mulf %395, %385 : vector<16x16xf32>
    %397 = arith.addf %380, %396 : vector<16x16xf32>
    %c130 = arith.constant 130 : index
    %398 = memref.load %arg2[%c130] : memref<144xf32, #tpu.memory_space<smem>>
    %399 = vector.broadcast %398 : f32 to vector<16x16xf32>
    %400 = arith.mulf %399, %385 : vector<16x16xf32>
    %401 = arith.addf %384, %400 : vector<16x16xf32>
    %402 = vector.extract_strided_slice %316 {offsets = [1, 2], sizes = [16, 16], strides = [1, 1]} : vector<18x18xf32> to vector<16x16xf32>
    %c23 = arith.constant 23 : index
    %403 = memref.load %arg2[%c23] : memref<144xf32, #tpu.memory_space<smem>>
    %404 = vector.broadcast %403 : f32 to vector<16x16xf32>
    %405 = arith.mulf %404, %402 : vector<16x16xf32>
    %406 = arith.addf %389, %405 : vector<16x16xf32>
    %c59 = arith.constant 59 : index
    %407 = memref.load %arg2[%c59] : memref<144xf32, #tpu.memory_space<smem>>
    %408 = vector.broadcast %407 : f32 to vector<16x16xf32>
    %409 = arith.mulf %408, %402 : vector<16x16xf32>
    %410 = arith.addf %393, %409 : vector<16x16xf32>
    %c95 = arith.constant 95 : index
    %411 = memref.load %arg2[%c95] : memref<144xf32, #tpu.memory_space<smem>>
    %412 = vector.broadcast %411 : f32 to vector<16x16xf32>
    %413 = arith.mulf %412, %402 : vector<16x16xf32>
    %414 = arith.addf %397, %413 : vector<16x16xf32>
    %c131 = arith.constant 131 : index
    %415 = memref.load %arg2[%c131] : memref<144xf32, #tpu.memory_space<smem>>
    %416 = vector.broadcast %415 : f32 to vector<16x16xf32>
    %417 = arith.mulf %416, %402 : vector<16x16xf32>
    %418 = arith.addf %401, %417 : vector<16x16xf32>
    %419 = vector.extract_strided_slice %316 {offsets = [2, 0], sizes = [16, 16], strides = [1, 1]} : vector<18x18xf32> to vector<16x16xf32>
    %c24 = arith.constant 24 : index
    %420 = memref.load %arg2[%c24] : memref<144xf32, #tpu.memory_space<smem>>
    %421 = vector.broadcast %420 : f32 to vector<16x16xf32>
    %422 = arith.mulf %421, %419 : vector<16x16xf32>
    %423 = arith.addf %406, %422 : vector<16x16xf32>
    %c60 = arith.constant 60 : index
    %424 = memref.load %arg2[%c60] : memref<144xf32, #tpu.memory_space<smem>>
    %425 = vector.broadcast %424 : f32 to vector<16x16xf32>
    %426 = arith.mulf %425, %419 : vector<16x16xf32>
    %427 = arith.addf %410, %426 : vector<16x16xf32>
    %c96 = arith.constant 96 : index
    %428 = memref.load %arg2[%c96] : memref<144xf32, #tpu.memory_space<smem>>
    %429 = vector.broadcast %428 : f32 to vector<16x16xf32>
    %430 = arith.mulf %429, %419 : vector<16x16xf32>
    %431 = arith.addf %414, %430 : vector<16x16xf32>
    %c132 = arith.constant 132 : index
    %432 = memref.load %arg2[%c132] : memref<144xf32, #tpu.memory_space<smem>>
    %433 = vector.broadcast %432 : f32 to vector<16x16xf32>
    %434 = arith.mulf %433, %419 : vector<16x16xf32>
    %435 = arith.addf %418, %434 : vector<16x16xf32>
    %436 = vector.extract_strided_slice %316 {offsets = [2, 1], sizes = [16, 16], strides = [1, 1]} : vector<18x18xf32> to vector<16x16xf32>
    %c25 = arith.constant 25 : index
    %437 = memref.load %arg2[%c25] : memref<144xf32, #tpu.memory_space<smem>>
    %438 = vector.broadcast %437 : f32 to vector<16x16xf32>
    %439 = arith.mulf %438, %436 : vector<16x16xf32>
    %440 = arith.addf %423, %439 : vector<16x16xf32>
    %c61 = arith.constant 61 : index
    %441 = memref.load %arg2[%c61] : memref<144xf32, #tpu.memory_space<smem>>
    %442 = vector.broadcast %441 : f32 to vector<16x16xf32>
    %443 = arith.mulf %442, %436 : vector<16x16xf32>
    %444 = arith.addf %427, %443 : vector<16x16xf32>
    %c97 = arith.constant 97 : index
    %445 = memref.load %arg2[%c97] : memref<144xf32, #tpu.memory_space<smem>>
    %446 = vector.broadcast %445 : f32 to vector<16x16xf32>
    %447 = arith.mulf %446, %436 : vector<16x16xf32>
    %448 = arith.addf %431, %447 : vector<16x16xf32>
    %c133 = arith.constant 133 : index
    %449 = memref.load %arg2[%c133] : memref<144xf32, #tpu.memory_space<smem>>
    %450 = vector.broadcast %449 : f32 to vector<16x16xf32>
    %451 = arith.mulf %450, %436 : vector<16x16xf32>
    %452 = arith.addf %435, %451 : vector<16x16xf32>
    %453 = vector.extract_strided_slice %316 {offsets = [2, 2], sizes = [16, 16], strides = [1, 1]} : vector<18x18xf32> to vector<16x16xf32>
    %c26 = arith.constant 26 : index
    %454 = memref.load %arg2[%c26] : memref<144xf32, #tpu.memory_space<smem>>
    %455 = vector.broadcast %454 : f32 to vector<16x16xf32>
    %456 = arith.mulf %455, %453 : vector<16x16xf32>
    %457 = arith.addf %440, %456 : vector<16x16xf32>
    %c62 = arith.constant 62 : index
    %458 = memref.load %arg2[%c62] : memref<144xf32, #tpu.memory_space<smem>>
    %459 = vector.broadcast %458 : f32 to vector<16x16xf32>
    %460 = arith.mulf %459, %453 : vector<16x16xf32>
    %461 = arith.addf %444, %460 : vector<16x16xf32>
    %c98 = arith.constant 98 : index
    %462 = memref.load %arg2[%c98] : memref<144xf32, #tpu.memory_space<smem>>
    %463 = vector.broadcast %462 : f32 to vector<16x16xf32>
    %464 = arith.mulf %463, %453 : vector<16x16xf32>
    %465 = arith.addf %448, %464 : vector<16x16xf32>
    %c134 = arith.constant 134 : index
    %466 = memref.load %arg2[%c134] : memref<144xf32, #tpu.memory_space<smem>>
    %467 = vector.broadcast %466 : f32 to vector<16x16xf32>
    %468 = arith.mulf %467, %453 : vector<16x16xf32>
    %469 = arith.addf %452, %468 : vector<16x16xf32>
    %c0_24 = arith.constant 0 : index
    %c3_25 = arith.constant 3 : index
    %c0_26 = arith.constant 0 : index
    %c0_27 = arith.constant 0 : index
    %470 = vector.load %arg4[%c0_24, %c3_25, %c0_26, %c0_27] : memref<1x4x16x18xf32, #tpu.memory_space<vmem>>, vector<1x1x16x18xf32>
    %471 = vector.shape_cast %470 : vector<1x1x16x18xf32> to vector<16x18xf32>
    %c0_28 = arith.constant 0 : index
    %c3_29 = arith.constant 3 : index
    %c0_30 = arith.constant 0 : index
    %c0_31 = arith.constant 0 : index
    %472 = vector.load %arg5[%c0_28, %c3_29, %c0_30, %c0_31] : memref<1x4x8x18xf32, #tpu.memory_space<vmem>>, vector<1x1x2x18xf32>
    %473 = vector.shape_cast %472 : vector<1x1x2x18xf32> to vector<2x18xf32>
    %474 = tpu.concatenate %471, %473 in 0 : vector<16x18xf32>, vector<2x18xf32> -> vector<18x18xf32>
    %475 = vector.extract_strided_slice %474 {offsets = [0, 0], sizes = [16, 16], strides = [1, 1]} : vector<18x18xf32> to vector<16x16xf32>
    %c27 = arith.constant 27 : index
    %476 = memref.load %arg2[%c27] : memref<144xf32, #tpu.memory_space<smem>>
    %477 = vector.broadcast %476 : f32 to vector<16x16xf32>
    %478 = arith.mulf %477, %475 : vector<16x16xf32>
    %479 = arith.addf %457, %478 : vector<16x16xf32>
    %c63 = arith.constant 63 : index
    %480 = memref.load %arg2[%c63] : memref<144xf32, #tpu.memory_space<smem>>
    %481 = vector.broadcast %480 : f32 to vector<16x16xf32>
    %482 = arith.mulf %481, %475 : vector<16x16xf32>
    %483 = arith.addf %461, %482 : vector<16x16xf32>
    %c99 = arith.constant 99 : index
    %484 = memref.load %arg2[%c99] : memref<144xf32, #tpu.memory_space<smem>>
    %485 = vector.broadcast %484 : f32 to vector<16x16xf32>
    %486 = arith.mulf %485, %475 : vector<16x16xf32>
    %487 = arith.addf %465, %486 : vector<16x16xf32>
    %c135 = arith.constant 135 : index
    %488 = memref.load %arg2[%c135] : memref<144xf32, #tpu.memory_space<smem>>
    %489 = vector.broadcast %488 : f32 to vector<16x16xf32>
    %490 = arith.mulf %489, %475 : vector<16x16xf32>
    %491 = arith.addf %469, %490 : vector<16x16xf32>
    %492 = vector.extract_strided_slice %474 {offsets = [0, 1], sizes = [16, 16], strides = [1, 1]} : vector<18x18xf32> to vector<16x16xf32>
    %c28 = arith.constant 28 : index
    %493 = memref.load %arg2[%c28] : memref<144xf32, #tpu.memory_space<smem>>
    %494 = vector.broadcast %493 : f32 to vector<16x16xf32>
    %495 = arith.mulf %494, %492 : vector<16x16xf32>
    %496 = arith.addf %479, %495 : vector<16x16xf32>
    %c64 = arith.constant 64 : index
    %497 = memref.load %arg2[%c64] : memref<144xf32, #tpu.memory_space<smem>>
    %498 = vector.broadcast %497 : f32 to vector<16x16xf32>
    %499 = arith.mulf %498, %492 : vector<16x16xf32>
    %500 = arith.addf %483, %499 : vector<16x16xf32>
    %c100 = arith.constant 100 : index
    %501 = memref.load %arg2[%c100] : memref<144xf32, #tpu.memory_space<smem>>
    %502 = vector.broadcast %501 : f32 to vector<16x16xf32>
    %503 = arith.mulf %502, %492 : vector<16x16xf32>
    %504 = arith.addf %487, %503 : vector<16x16xf32>
    %c136 = arith.constant 136 : index
    %505 = memref.load %arg2[%c136] : memref<144xf32, #tpu.memory_space<smem>>
    %506 = vector.broadcast %505 : f32 to vector<16x16xf32>
    %507 = arith.mulf %506, %492 : vector<16x16xf32>
    %508 = arith.addf %491, %507 : vector<16x16xf32>
    %509 = vector.extract_strided_slice %474 {offsets = [0, 2], sizes = [16, 16], strides = [1, 1]} : vector<18x18xf32> to vector<16x16xf32>
    %c29 = arith.constant 29 : index
    %510 = memref.load %arg2[%c29] : memref<144xf32, #tpu.memory_space<smem>>
    %511 = vector.broadcast %510 : f32 to vector<16x16xf32>
    %512 = arith.mulf %511, %509 : vector<16x16xf32>
    %513 = arith.addf %496, %512 : vector<16x16xf32>
    %c65 = arith.constant 65 : index
    %514 = memref.load %arg2[%c65] : memref<144xf32, #tpu.memory_space<smem>>
    %515 = vector.broadcast %514 : f32 to vector<16x16xf32>
    %516 = arith.mulf %515, %509 : vector<16x16xf32>
    %517 = arith.addf %500, %516 : vector<16x16xf32>
    %c101 = arith.constant 101 : index
    %518 = memref.load %arg2[%c101] : memref<144xf32, #tpu.memory_space<smem>>
    %519 = vector.broadcast %518 : f32 to vector<16x16xf32>
    %520 = arith.mulf %519, %509 : vector<16x16xf32>
    %521 = arith.addf %504, %520 : vector<16x16xf32>
    %c137 = arith.constant 137 : index
    %522 = memref.load %arg2[%c137] : memref<144xf32, #tpu.memory_space<smem>>
    %523 = vector.broadcast %522 : f32 to vector<16x16xf32>
    %524 = arith.mulf %523, %509 : vector<16x16xf32>
    %525 = arith.addf %508, %524 : vector<16x16xf32>
    %526 = vector.extract_strided_slice %474 {offsets = [1, 0], sizes = [16, 16], strides = [1, 1]} : vector<18x18xf32> to vector<16x16xf32>
    %c30 = arith.constant 30 : index
    %527 = memref.load %arg2[%c30] : memref<144xf32, #tpu.memory_space<smem>>
    %528 = vector.broadcast %527 : f32 to vector<16x16xf32>
    %529 = arith.mulf %528, %526 : vector<16x16xf32>
    %530 = arith.addf %513, %529 : vector<16x16xf32>
    %c66 = arith.constant 66 : index
    %531 = memref.load %arg2[%c66] : memref<144xf32, #tpu.memory_space<smem>>
    %532 = vector.broadcast %531 : f32 to vector<16x16xf32>
    %533 = arith.mulf %532, %526 : vector<16x16xf32>
    %534 = arith.addf %517, %533 : vector<16x16xf32>
    %c102 = arith.constant 102 : index
    %535 = memref.load %arg2[%c102] : memref<144xf32, #tpu.memory_space<smem>>
    %536 = vector.broadcast %535 : f32 to vector<16x16xf32>
    %537 = arith.mulf %536, %526 : vector<16x16xf32>
    %538 = arith.addf %521, %537 : vector<16x16xf32>
    %c138 = arith.constant 138 : index
    %539 = memref.load %arg2[%c138] : memref<144xf32, #tpu.memory_space<smem>>
    %540 = vector.broadcast %539 : f32 to vector<16x16xf32>
    %541 = arith.mulf %540, %526 : vector<16x16xf32>
    %542 = arith.addf %525, %541 : vector<16x16xf32>
    %543 = vector.extract_strided_slice %474 {offsets = [1, 1], sizes = [16, 16], strides = [1, 1]} : vector<18x18xf32> to vector<16x16xf32>
    %c31 = arith.constant 31 : index
    %544 = memref.load %arg2[%c31] : memref<144xf32, #tpu.memory_space<smem>>
    %545 = vector.broadcast %544 : f32 to vector<16x16xf32>
    %546 = arith.mulf %545, %543 : vector<16x16xf32>
    %547 = arith.addf %530, %546 : vector<16x16xf32>
    %c67 = arith.constant 67 : index
    %548 = memref.load %arg2[%c67] : memref<144xf32, #tpu.memory_space<smem>>
    %549 = vector.broadcast %548 : f32 to vector<16x16xf32>
    %550 = arith.mulf %549, %543 : vector<16x16xf32>
    %551 = arith.addf %534, %550 : vector<16x16xf32>
    %c103 = arith.constant 103 : index
    %552 = memref.load %arg2[%c103] : memref<144xf32, #tpu.memory_space<smem>>
    %553 = vector.broadcast %552 : f32 to vector<16x16xf32>
    %554 = arith.mulf %553, %543 : vector<16x16xf32>
    %555 = arith.addf %538, %554 : vector<16x16xf32>
    %c139 = arith.constant 139 : index
    %556 = memref.load %arg2[%c139] : memref<144xf32, #tpu.memory_space<smem>>
    %557 = vector.broadcast %556 : f32 to vector<16x16xf32>
    %558 = arith.mulf %557, %543 : vector<16x16xf32>
    %559 = arith.addf %542, %558 : vector<16x16xf32>
    %560 = vector.extract_strided_slice %474 {offsets = [1, 2], sizes = [16, 16], strides = [1, 1]} : vector<18x18xf32> to vector<16x16xf32>
    %c32 = arith.constant 32 : index
    %561 = memref.load %arg2[%c32] : memref<144xf32, #tpu.memory_space<smem>>
    %562 = vector.broadcast %561 : f32 to vector<16x16xf32>
    %563 = arith.mulf %562, %560 : vector<16x16xf32>
    %564 = arith.addf %547, %563 : vector<16x16xf32>
    %c68 = arith.constant 68 : index
    %565 = memref.load %arg2[%c68] : memref<144xf32, #tpu.memory_space<smem>>
    %566 = vector.broadcast %565 : f32 to vector<16x16xf32>
    %567 = arith.mulf %566, %560 : vector<16x16xf32>
    %568 = arith.addf %551, %567 : vector<16x16xf32>
    %c104 = arith.constant 104 : index
    %569 = memref.load %arg2[%c104] : memref<144xf32, #tpu.memory_space<smem>>
    %570 = vector.broadcast %569 : f32 to vector<16x16xf32>
    %571 = arith.mulf %570, %560 : vector<16x16xf32>
    %572 = arith.addf %555, %571 : vector<16x16xf32>
    %c140 = arith.constant 140 : index
    %573 = memref.load %arg2[%c140] : memref<144xf32, #tpu.memory_space<smem>>
    %574 = vector.broadcast %573 : f32 to vector<16x16xf32>
    %575 = arith.mulf %574, %560 : vector<16x16xf32>
    %576 = arith.addf %559, %575 : vector<16x16xf32>
    %577 = vector.extract_strided_slice %474 {offsets = [2, 0], sizes = [16, 16], strides = [1, 1]} : vector<18x18xf32> to vector<16x16xf32>
    %c33 = arith.constant 33 : index
    %578 = memref.load %arg2[%c33] : memref<144xf32, #tpu.memory_space<smem>>
    %579 = vector.broadcast %578 : f32 to vector<16x16xf32>
    %580 = arith.mulf %579, %577 : vector<16x16xf32>
    %581 = arith.addf %564, %580 : vector<16x16xf32>
    %c69 = arith.constant 69 : index
    %582 = memref.load %arg2[%c69] : memref<144xf32, #tpu.memory_space<smem>>
    %583 = vector.broadcast %582 : f32 to vector<16x16xf32>
    %584 = arith.mulf %583, %577 : vector<16x16xf32>
    %585 = arith.addf %568, %584 : vector<16x16xf32>
    %c105 = arith.constant 105 : index
    %586 = memref.load %arg2[%c105] : memref<144xf32, #tpu.memory_space<smem>>
    %587 = vector.broadcast %586 : f32 to vector<16x16xf32>
    %588 = arith.mulf %587, %577 : vector<16x16xf32>
    %589 = arith.addf %572, %588 : vector<16x16xf32>
    %c141 = arith.constant 141 : index
    %590 = memref.load %arg2[%c141] : memref<144xf32, #tpu.memory_space<smem>>
    %591 = vector.broadcast %590 : f32 to vector<16x16xf32>
    %592 = arith.mulf %591, %577 : vector<16x16xf32>
    %593 = arith.addf %576, %592 : vector<16x16xf32>
    %594 = vector.extract_strided_slice %474 {offsets = [2, 1], sizes = [16, 16], strides = [1, 1]} : vector<18x18xf32> to vector<16x16xf32>
    %c34 = arith.constant 34 : index
    %595 = memref.load %arg2[%c34] : memref<144xf32, #tpu.memory_space<smem>>
    %596 = vector.broadcast %595 : f32 to vector<16x16xf32>
    %597 = arith.mulf %596, %594 : vector<16x16xf32>
    %598 = arith.addf %581, %597 : vector<16x16xf32>
    %c70 = arith.constant 70 : index
    %599 = memref.load %arg2[%c70] : memref<144xf32, #tpu.memory_space<smem>>
    %600 = vector.broadcast %599 : f32 to vector<16x16xf32>
    %601 = arith.mulf %600, %594 : vector<16x16xf32>
    %602 = arith.addf %585, %601 : vector<16x16xf32>
    %c106 = arith.constant 106 : index
    %603 = memref.load %arg2[%c106] : memref<144xf32, #tpu.memory_space<smem>>
    %604 = vector.broadcast %603 : f32 to vector<16x16xf32>
    %605 = arith.mulf %604, %594 : vector<16x16xf32>
    %606 = arith.addf %589, %605 : vector<16x16xf32>
    %c142 = arith.constant 142 : index
    %607 = memref.load %arg2[%c142] : memref<144xf32, #tpu.memory_space<smem>>
    %608 = vector.broadcast %607 : f32 to vector<16x16xf32>
    %609 = arith.mulf %608, %594 : vector<16x16xf32>
    %610 = arith.addf %593, %609 : vector<16x16xf32>
    %611 = vector.extract_strided_slice %474 {offsets = [2, 2], sizes = [16, 16], strides = [1, 1]} : vector<18x18xf32> to vector<16x16xf32>
    %c35 = arith.constant 35 : index
    %612 = memref.load %arg2[%c35] : memref<144xf32, #tpu.memory_space<smem>>
    %613 = vector.broadcast %612 : f32 to vector<16x16xf32>
    %614 = arith.mulf %613, %611 : vector<16x16xf32>
    %615 = arith.addf %598, %614 : vector<16x16xf32>
    %c71 = arith.constant 71 : index
    %616 = memref.load %arg2[%c71] : memref<144xf32, #tpu.memory_space<smem>>
    %617 = vector.broadcast %616 : f32 to vector<16x16xf32>
    %618 = arith.mulf %617, %611 : vector<16x16xf32>
    %619 = arith.addf %602, %618 : vector<16x16xf32>
    %c107 = arith.constant 107 : index
    %620 = memref.load %arg2[%c107] : memref<144xf32, #tpu.memory_space<smem>>
    %621 = vector.broadcast %620 : f32 to vector<16x16xf32>
    %622 = arith.mulf %621, %611 : vector<16x16xf32>
    %623 = arith.addf %606, %622 : vector<16x16xf32>
    %c143 = arith.constant 143 : index
    %624 = memref.load %arg2[%c143] : memref<144xf32, #tpu.memory_space<smem>>
    %625 = vector.broadcast %624 : f32 to vector<16x16xf32>
    %626 = arith.mulf %625, %611 : vector<16x16xf32>
    %627 = arith.addf %610, %626 : vector<16x16xf32>
    %c0_32 = arith.constant 0 : index
    %628 = memref.load %arg3[%c0_32] : memref<4xf32, #tpu.memory_space<smem>>
    %629 = vector.broadcast %628 : f32 to vector<16x16xf32>
    %630 = arith.addf %615, %629 : vector<16x16xf32>
    %cst = arith.constant 0.000000e+00 : f32
    %631 = vector.broadcast %cst : f32 to vector<16x16xf32>
    %632 = arith.cmpf oge, %630, %631 : vector<16x16xf32>
    %cst_33 = arith.constant 0.00999999977 : f32
    %633 = vector.broadcast %cst_33 : f32 to vector<16x16xf32>
    %634 = arith.mulf %633, %630 : vector<16x16xf32>
    %635 = arith.select %632, %630, %634 : vector<16x16xi1>, vector<16x16xf32>
    %c0_34 = arith.constant 0 : index
    %c0_35 = arith.constant 0 : index
    %c0_36 = arith.constant 0 : index
    %c0_37 = arith.constant 0 : index
    %636 = vector.load %arg6[%c0_34, %c0_35, %c0_36, %c0_37] : memref<1x4x16x16xf32, #tpu.memory_space<vmem>>, vector<1x1x16x16xf32>
    %637 = vector.shape_cast %636 : vector<1x1x16x16xf32> to vector<16x16xf32>
    %638 = vector.shape_cast %635 : vector<16x16xf32> to vector<1x1x16x16xf32>
    tpu.vector_store %arg6[%c0_34, %c0_35, %c0_36, %c0_37], %638 {strides = array<i32>} : memref<1x4x16x16xf32, #tpu.memory_space<vmem>>, vector<1x1x16x16xf32>,
    %c1_38 = arith.constant 1 : index
    %639 = memref.load %arg3[%c1_38] : memref<4xf32, #tpu.memory_space<smem>>
    %640 = vector.broadcast %639 : f32 to vector<16x16xf32>
    %641 = arith.addf %619, %640 : vector<16x16xf32>
    %cst_39 = arith.constant 0.000000e+00 : f32
    %642 = vector.broadcast %cst_39 : f32 to vector<16x16xf32>
    %643 = arith.cmpf oge, %641, %642 : vector<16x16xf32>
    %cst_40 = arith.constant 0.00999999977 : f32
    %644 = vector.broadcast %cst_40 : f32 to vector<16x16xf32>
    %645 = arith.mulf %644, %641 : vector<16x16xf32>
    %646 = arith.select %643, %641, %645 : vector<16x16xi1>, vector<16x16xf32>
    %c0_41 = arith.constant 0 : index
    %c1_42 = arith.constant 1 : index
    %c0_43 = arith.constant 0 : index
    %c0_44 = arith.constant 0 : index
    %647 = vector.load %arg6[%c0_41, %c1_42, %c0_43, %c0_44] : memref<1x4x16x16xf32, #tpu.memory_space<vmem>>, vector<1x1x16x16xf32>
    %648 = vector.shape_cast %647 : vector<1x1x16x16xf32> to vector<16x16xf32>
    %649 = vector.shape_cast %646 : vector<16x16xf32> to vector<1x1x16x16xf32>
    tpu.vector_store %arg6[%c0_41, %c1_42, %c0_43, %c0_44], %649 {strides = array<i32>} : memref<1x4x16x16xf32, #tpu.memory_space<vmem>>, vector<1x1x16x16xf32>,
    %c2_45 = arith.constant 2 : index
    %650 = memref.load %arg3[%c2_45] : memref<4xf32, #tpu.memory_space<smem>>
    %651 = vector.broadcast %650 : f32 to vector<16x16xf32>
    %652 = arith.addf %623, %651 : vector<16x16xf32>
    %cst_46 = arith.constant 0.000000e+00 : f32
    %653 = vector.broadcast %cst_46 : f32 to vector<16x16xf32>
    %654 = arith.cmpf oge, %652, %653 : vector<16x16xf32>
    %cst_47 = arith.constant 0.00999999977 : f32
    %655 = vector.broadcast %cst_47 : f32 to vector<16x16xf32>
    %656 = arith.mulf %655, %652 : vector<16x16xf32>
    %657 = arith.select %654, %652, %656 : vector<16x16xi1>, vector<16x16xf32>
    %c0_48 = arith.constant 0 : index
    %c2_49 = arith.constant 2 : index
    %c0_50 = arith.constant 0 : index
    %c0_51 = arith.constant 0 : index
    %658 = vector.load %arg6[%c0_48, %c2_49, %c0_50, %c0_51] : memref<1x4x16x16xf32, #tpu.memory_space<vmem>>, vector<1x1x16x16xf32>
    %659 = vector.shape_cast %658 : vector<1x1x16x16xf32> to vector<16x16xf32>
    %660 = vector.shape_cast %657 : vector<16x16xf32> to vector<1x1x16x16xf32>
    tpu.vector_store %arg6[%c0_48, %c2_49, %c0_50, %c0_51], %660 {strides = array<i32>} : memref<1x4x16x16xf32, #tpu.memory_space<vmem>>, vector<1x1x16x16xf32>,
    %c3_52 = arith.constant 3 : index
    %661 = memref.load %arg3[%c3_52] : memref<4xf32, #tpu.memory_space<smem>>
    %662 = vector.broadcast %661 : f32 to vector<16x16xf32>
    %663 = arith.addf %627, %662 : vector<16x16xf32>
    %cst_53 = arith.constant 0.000000e+00 : f32
    %664 = vector.broadcast %cst_53 : f32 to vector<16x16xf32>
    %665 = arith.cmpf oge, %663, %664 : vector<16x16xf32>
    %cst_54 = arith.constant 0.00999999977 : f32
    %666 = vector.broadcast %cst_54 : f32 to vector<16x16xf32>
    %667 = arith.mulf %666, %663 : vector<16x16xf32>
    %668 = arith.select %665, %663, %667 : vector<16x16xi1>, vector<16x16xf32>
    %c0_55 = arith.constant 0 : index
    %c3_56 = arith.constant 3 : index
    %c0_57 = arith.constant 0 : index
    %c0_58 = arith.constant 0 : index
    %669 = vector.load %arg6[%c0_55, %c3_56, %c0_57, %c0_58] : memref<1x4x16x16xf32, #tpu.memory_space<vmem>>, vector<1x1x16x16xf32>
    %670 = vector.shape_cast %669 : vector<1x1x16x16xf32> to vector<16x16xf32>
    %671 = vector.shape_cast %668 : vector<16x16xf32> to vector<1x1x16x16xf32>
    tpu.vector_store %arg6[%c0_55, %c3_56, %c0_57, %c0_58], %671 {strides = array<i32>} : memref<1x4x16x16xf32, #tpu.memory_space<vmem>>, vector<1x1x16x16xf32>,
    return
  }
  func.func @transform_0(%arg0: i32, %arg1: i32) -> i32 {
    %c0_i32 = arith.constant 0 : i32
    %c0_i32_0 = arith.constant 0 : i32
    return %c0_i32 : i32
  }
  func.func @transform_1(%arg0: i32, %arg1: i32) -> i32 {
    %c0_i32 = arith.constant 0 : i32
    %c0_i32_0 = arith.constant 0 : i32
    return %c0_i32 : i32
  }
  func.func @transform_2(%arg0: i32, %arg1: i32) -> (i32, i32, i32, i32) {
    %c0_i32 = arith.constant 0 : i32
    %c0_i32_0 = arith.constant 0 : i32
    %c0_i32_1 = arith.constant 0 : i32
    return %arg0, %c0_i32, %arg1, %c0_i32_0 : i32, i32, i32, i32
  }
  func.func @transform_3(%arg0: i32, %arg1: i32) -> (i32, i32, i32, i32) {
    %c1_i32 = arith.constant 1 : i32
    %0 = arith.addi %arg1, %c1_i32 : i32
    %c2_i32 = arith.constant 2 : i32
    %1 = arith.muli %0, %c2_i32 : i32
    %c0_i32 = arith.constant 0 : i32
    %c0_i32_0 = arith.constant 0 : i32
    %c0_i32_1 = arith.constant 0 : i32
    return %arg0, %c0_i32, %1, %c0_i32_0 : i32, i32, i32, i32
  }
  func.func @transform_4(%arg0: i32, %arg1: i32) -> (i32, i32, i32, i32) {
    %c0_i32 = arith.constant 0 : i32
    %c0_i32_0 = arith.constant 0 : i32
    %c0_i32_1 = arith.constant 0 : i32
    return %arg0, %c0_i32, %arg1, %c0_i32_0 : i32, i32, i32, i32
  }
}

</mosaic_0001>

<bundles_post_ra>
// kernel: tpu_custom_call.1
= control target key start
LH: loop header
LB: loop body
LE: loop exit
PB: predicated region body
PF: predicated region fallthrough
CT: control target
= control target key end

     0   :  { %9 = vsyncpa [#allocation4], 0  ;;  %s5878_s0 = inlined_call_operand.vmem [shape: f32[144], index: 0, kind: input, shape index: {}]   ;;  %s5879_s1 = inlined_call_operand.vmem [shape: f32[4], index: 1, kind: input, shape index: {}]   ;;  %s5880_s2 = inlined_call_operand.vmem [shape: f32[2,4,24,18], index: 2, kind: input, shape index: {}]   ;;  %s5881_s3 = inlined_call_operand.vmem [shape: f32[2,4,24,18], index: 3, kind: input, shape index: {}]   ;;  %s5882_s4 = inlined_call_operand.hbm [shape: f32[2,4,16,16], index: 4, kind: output, shape index: {}]  }
   0x1   :  { %10 = vsyncpa [#allocation6], 0 }
   0x2   :  { %11 = vsyncpa [#allocation3], 0 }
   0x3   :  { %13 = vsyncpa [#allocation3 + $0x1], 0  ;;  %s3650_s15 = smov 0   ;;  %s3652_s16 = smov 0  }
   0x4   :  { %s3654_s17 = smov 0   ;;  %s3656_s18 = smov 0  }
   0x5   :  { %s3658_s19 = smov 0   ;;  %s3660_s20 = smov 0  }
   0x6 LB: > { %s3162_s21 = sadd.s32 4294967295, %s3612_s20   ;;  %s3163_s22 = sadd.s32 4294967294, %s3612_s20   ;;  %s3612_s20 = sphi %s3660_s20, %s19_s20   ;;  %s3608_s19 = sphi %s3658_s19, %s6093_s19   ;;  %s3604_s18 = sphi %s3656_s18, %s6092_s18   ;;  %s3600_s17 = sphi %s3654_s17, %s6091_s17   ;;  %s3596_s16 = sphi %s3652_s16, %s6090_s16   ;;  %s3592_s15 = sphi %s3650_s15, %s6089_s15  }
   0x7   : > { %s31_s23 = sadd.s32 1, %s3608_s19  ;;  %s82_s24 = sadd.s32 1, %s3600_s17 }
   0x8   : > { %p33_p0 = scmp.ge.s32.totalorder %s31_s23, 2  ;;  %p89_p1 = scmp.ne.s32.totalorder %s3600_s17, %s3596_s16 }
   0x9   : > { %p90_p2 = scmp.eq.s32.totalorder %s3612_s20, 0  ;;  %p153_p3 = scmp.eq.s32.totalorder %s3162_s21, 1 }
   0xa   : > { %s6095_s23 = smov (%p33_p0, %s31_s23), 0  ;;  %p158_p6 = scmp.ne.s32.totalorder %s3596_s16, %s3592_s15 }
   0xb   : > { %p3689_p4 = por %p90_p2, %p89_p1  ;;  %p3693_p5 = por %p153_p3, %p89_p1 }
   0xc   : > { %s77_s27 = ssub.s32 %s3608_s19, %s6095_s23  ;;  %p159_p8 = scmp.eq.s32.totalorder %s3163_s22, 1 }
   0xd   : > { %s5888_s25 = scalar_select %p3689_p4, 1, 0 }
   0xe   : > { %s5889_s26 = scalar_select %p3693_p5, 1, 0 }
   0xf   : > { %p80_p7 = scmp.eq.s32.totalorder %s77_s27, 0  ;;  %p3164_p9 = scmp.ge.s32.totalorder %s3612_s20, 1 }
  0x10   : > { %p166_p10 = scmp.lt.s32.totalorder %s3612_s20, 3  ;;  %p3706_p11 = por %p159_p8, %p158_p6 }
  0x11   : > { %s3704_s28 = scalar_select %p80_p7, %s3600_s17, %s82_s24  }
  0x12   : > { %s5890_s29 = scalar_select %p3706_p11, 1, 0 }
  0x13   : > { %p3710_p12 = pnand %p3164_p9, %p166_p10  ;;  %p3714_p13 = scmp.eq.s32.totalorder %s3162_s21, 0 }
  0x14   : > { %s179_s8 = sshll.u32 %s5878_s0, 4  ;;  %s190_s12 = sshll.u32 %s5879_s1, 4  ;;  %s180_s8 = int_to_ptr.vmem [resolvable:$true] %s179_s8  ;;  %s191_s12 = int_to_ptr.vmem [resolvable:$true] %s190_s12 }
  0x15   : > { %s5891_s30 = scalar_select %p3710_p12, 1, 0 }
  0x16   : > { %s5892_s5 = scalar_select %p3714_p13, 1, 0 }
  0x17   : > { %p3368_p0 = pneg %p3710_p12  ;;  %s3482_s13 = scalar_lea.vmem %s180_s8, 32 }
  0x18   : > { %p3483_p2 = scmp.ne.s32.totalorder %s180_s8, %s3482_s13  ;;  %p3490_p8 = scmp.lt.s32.totalorder %s180_s8, %s180_s8 }
  0x19   : > { %p3725_p1 = pnand %p3714_p13, %p3368_p0  ;;  %p3491_p9 = scmp.lt.s32.totalorder %s3482_s13, %s3482_s13 }
  0x1b   : > { %p3484_p3 = pneg %p3725_p1  ;;  %p3492_p10 = por %p3491_p9, %p3490_p8 }
  0x1d   : > { %p3485_p6 = pnand %p3484_p3, %p3483_p2 }
  0x1f   : > { %p3486_p7 = pneg %p3485_p6 }
  0x21   : > { %p3493_p11 = pnand %p3492_p10, %p3486_p7 }
  0x23   : > { %3496 = shalt.err (!%p3493_p11)
}
  0x24   : > { %s3618_s14 = smov [#allocation2]   ;;  %s3497_s21 = scalar_lea.vmem %s191_s12, 16 }
  0x25   : > { %3371 = dma.vmem_to_smem (!%p3725_p1), %s180_s8, 32, %s3618_s14, [#allocation4]  }
  0x26   : > { %p3498_p0 = scmp.ne.s32.totalorder %s191_s12, %s3497_s21  ;;  %p3505_p12 = scmp.lt.s32.totalorder %s191_s12, %s191_s12 }
  0x27   : > { %p3506_p4 = scmp.lt.s32.totalorder %s3497_s21, %s3497_s21 }
  0x28   : > { %p3500_p5 = pnand %p3498_p0, %p3484_p3 }
  0x29   : > { %p3507_p2 = por %p3506_p4, %p3505_p12 }
  0x2a   : > { %p3501_p13 = pneg %p3500_p5 }
  0x2c   : > { %p3508_p6 = pnand %p3507_p2, %p3501_p13 }
  0x2e   : > { %3511 = shalt.err (!%p3508_p6)
}
  0x2f   : > { %s3619_s22 = smov [#allocation5]   ;;  %p3167_p11 = scmp.ge.s32.totalorder %s3612_s20, 2 }
  0x30   : > { %3374 = dma.vmem_to_smem (!%p3725_p1), %s191_s12, 16, %s3619_s22, [#allocation6]  }
  0x31   : > { %197 = sbr.rel (%p3167_p11) target bundleno = 74 (0x4a), region = 24  ;;  %p5894_p7 = scmp.ne.s32.totalorder (!%p3167_p11), %s5888_s25, 0 }
  0x36   : > { %200 = sbr.rel (!%p5894_p7) target bundleno = 67 (0x43), region = 28  ;;  %s202_s24 = sand.u32 (%p5894_p7), 1, %s3600_s17  }
  0x37   : > { %s3357_s27 = smul.u32 (%p5894_p7), 96, %s3608_s19  ;;  %s3168_s6 = sshll.u32 (%p5894_p7), %s202_s24, 6 }
  0x38   : > { %s204_s11 = scalar_lea.vmem (%p5894_p7), [#allocation7], %s3168_s6   ;;  %s3614_s9 = smov (%p5894_p7), 0  }
  0x39   : > { %s214_s10 = scalar_lea.vmem (%p5894_p7), %s5880_s2, %s3357_s27  }
  0x3b LB: >> { %v300_v0 = vld [vmem:[%s214_s10] sm:$0xff]  ;;  %v302_v1 = vld [vmem:[%s214_s10 + $0x8] sm:$0xff]  ;;  %v304_v2 = vld [vmem:[%s214_s10 + $0x18] sm:$0xff]  ;;  %s294_s9 = sadd.s32 1, %s3616_s9   ;;  %s3616_s9 = sphi %s3614_s9, %s294_s9  }
  0x3c   : >> { %301 = vst [vmem:[%s204_s11] sm:$0xff] %v300_v0  ;;  %303 = vst [vmem:[%s204_s11 + $0x8] sm:$0xff] %v302_v1  ;;  %v306_v3 = vld [vmem:[%s214_s10 + $0x20] sm:$0xff]  ;;  %v308_v4 = vld [vmem:[%s214_s10 + $0x30] sm:$0xff]  ;;  %p293_p4 = scmp.ge.s32.totalorder %s294_s9, 1 }
  0x3d   : >> { %305 = vst [vmem:[%s204_s11 + $0x10] sm:$0xff] %v304_v2  ;;  %v310_v5 = vld [vmem:[%s214_s10 + $0x38] sm:$0xff]  ;;  %307 = vst [vmem:[%s204_s11 + $0x18] sm:$0xff] %v306_v3  ;;  %v312_v6 = vld [vmem:[%s214_s10 + $0x48] sm:$0xff] }
  0x3e   : >> { %309 = vst [vmem:[%s204_s11 + $0x20] sm:$0xff] %v308_v4  ;;  %311 = vst [vmem:[%s204_s11 + $0x28] sm:$0xff] %v310_v5  ;;  %v314_v7 = vld [vmem:[%s214_s10 + $0x50] sm:$0xff]  ;;  %296 = sbr.rel (!%p293_p4) target bundleno = 59 (0x3b), region = 200 }
  0x3f   : >> { %313 = vst [vmem:[%s204_s11 + $0x30] sm:$0xff] %v312_v6  ;;  %315 = vst [vmem:[%s204_s11 + $0x38] sm:$0xff] %v314_v7 }
  0x43 PF: > { %p5895_p5 = scmp.ne.s32.totalorder %s5888_s25, 0 }
  0x44   : > { %s361_s12 = sand.u32 (%p5895_p5), 1, %s3600_s17   ;;  %s3179_s13 = smul.u32 (%p5895_p5), 96, %s3608_s19 }
  0x45   : > { %359 = sbr.rel (!%p5895_p5) target bundleno = 74 (0x4a), region = 80  ;;  %s3178_s14 = sshll.u32 (%p5895_p5), %s361_s12, 5 }
  0x46   : > { %s3053_s24 = scalar_lea.vmem (%p5895_p5), %s5881_s3, %s3179_s13  ;;  %s363_s27 = scalar_lea.vmem (%p5895_p5), [#allocation8], %s3178_s14 }
  0x47   : > { %v3180_v8 = vld [vmem:[%s3053_s24 + $0x10] sm:$0xff] (%p5895_p5)  ;;  %v3181_v9 = vld [vmem:[%s3053_s24 + $0x28] sm:$0xff] (%p5895_p5)  ;;  %v3182_v10 = vld [vmem:[%s3053_s24 + $0x40] sm:$0xff] (%p5895_p5) }
  0x48   : > { %405 = vst [vmem:[%s363_s27] sm:$0xff] (%p5895_p5), %v3180_v8  ;;  %407 = vst [vmem:[%s363_s27 + $0x8] sm:$0xff] (%p5895_p5), %v3181_v9  ;;  %v3183_v11 = vld [vmem:[%s3053_s24 + $0x58] sm:$0xff] (%p5895_p5) }
  0x49   : > { %409 = vst [vmem:[%s363_s27 + $0x10] sm:$0xff] (%p5895_p5), %v3182_v10  ;;  %411 = vst [vmem:[%s363_s27 + $0x18] sm:$0xff] (%p5895_p5), %v3183_v11 }
  0x4a PF: > { %p5896_p12 = scmp.ne.s32.totalorder %s5891_s30, 0 }
  0x4c   : > { %420 = sbr.rel (%p5896_p12) target bundleno = 616 (0x268), region = 118 }
  0x51   : > { %p5897_p13 = scmp.ne.s32.totalorder %s5892_s5, 0 }
  0x53   : > { %3579 = dma.done.wait (%p5897_p13), [#allocation4], 32  }
  0x54   : > { %3581 = vsyncadd (%p5897_p13), [#allocation4], 4294967264 }
  0x55   : > { %3583 = dma.done.wait (%p5897_p13), [#allocation6], 16  }
  0x56   : > { %3585 = vsyncadd (%p5897_p13), [#allocation6], 4294967280  ;;  %s3766_s25 = sand.u32 1, %s3596_s16  }
  0x57   : > { %s5887_s30 = sshll.u32 %s3766_s25, 6  ;;  %s3188_s6 = sshll.u32 %s3766_s25, 5 }
  0x58   : > { %s3772_s7 = scalar_lea.vmem [#allocation7], %s5887_s30  ;;  %s3774_s8 = scalar_lea.vmem [#allocation8], %s3188_s6 }
  0x59   : > { %444 = sfence }
  0x5a   : > { %s3194_s10 = sld [smem:[#allocation2 + $0x25]]  ;;  %v3777_v12 = vld [vmem:[%s3772_s7] sm:$0xff]  ;;  %v3780_v13 = vld [vmem:[%s3772_s7 + $0x8] sm:$0xff]  ;;  %s3620_s12 = smov 127   ;;  %vm615_vm0 = vcmask 1046528   ;;  %vm852_vm1 = vcmask 1045504  }
  0x5b   : > { %s3193_s11 = sld [smem:[#allocation2 + $0x1]]  ;;  %s3621_s6 = smov 126   ;;  %v3805_v33 = vld [vmem:[%s3774_s8] sm:$0x3]  ;;  %vm2930_vm2 = vcmask 130048  }
  0x5c   : > { %s3195_s5 = sld [smem:[#allocation2 + $0x49]]  ;;  %p6087_p3 = scmp.ne.s32.totalorder %s5889_s26, 0 }
  0x5d   : > { %s3196_s9 = sld [smem:[#allocation2 + $0x6d]] }
  0x5e   : > { %s3197_s13 = sld [smem:[#allocation2 + $0x2]] }
  0x5f   : > { %s3198_s14 = sld [smem:[#allocation2 + $0x26]] }
  0x60   : > { %v510_v14 = vstv %s3194_s10  ;;  %s3199_s21 = sld [smem:[#allocation2 + $0x4a]] }
  0x61   : > { %v511_v15 = vmul.f32 %v510_v14, %v3777_v12  ;;  %v496_v16 = vstv %s3193_s11  ;;  %v512_v18 = vmul.f32 %v510_v14, %v3780_v13  ;;  %s3205_s22 = sld [smem:[#allocation2 + $0x4]] }
  0x62   : > { %v497_v17 = vmul.f32 %v496_v16, %v3777_v12  ;;  %v498_v19 = vmul.f32 %v496_v16, %v3780_v13  ;;  %v524_v20 = vstv %s3195_s5  ;;  %s3200_s24 = sld [smem:[#allocation2 + $0x6e]] }
  0x63   : > { %515 = vrot.lane.b32.xlu1 %v511_v15, %s3620_s12  ;;  %v526_v21 = vmul.f32 %v524_v20, %v3780_v13  ;;  %v525_v22 = vmul.f32 %v524_v20, %v3777_v12  ;;  %v538_v23 = vstv %s3196_s9  ;;  %s3206_s27 = sld [smem:[#allocation2 + $0x28]] }
  0x64   : > { %501 = vrot.lane.b32.xlu0 %v497_v17, %s3620_s12  ;;  %v540_v24 = vmul.f32 %v538_v23, %v3780_v13  ;;  %v539_v25 = vmul.f32 %v538_v23, %v3777_v12  ;;  %v552_v26 = vstv %s3197_s13  ;;  %s3207_s10 = sld [smem:[#allocation2 + $0x4c]] }
  0x65   : > { %v554_v27 = vmul.f32 %v552_v26, %v3780_v13  ;;  %v553_v28 = vmul.f32 %v552_v26, %v3777_v12  ;;  %v566_v29 = vstv %s3198_s14  ;;  %s3208_s11 = sld [smem:[#allocation2 + $0x70]] }
  0x66   : > { %v568_v30 = vmul.f32 %v566_v29, %v3780_v13  ;;  %v567_v31 = vmul.f32 %v566_v29, %v3777_v12  ;;  %v580_v32 = vstv %s3199_s21  ;;  %s3209_s5 = sld [smem:[#allocation2 + $0x5]] }
  0x67   : > { %517 = vrot.lane.b32.xlu1 %v512_v18, %s3620_s12  ;;  %v677_v34 = vstv %s3205_s22  ;;  %v582_v35 = vmul.f32 %v580_v32, %v3780_v13  ;;  %v581_v36 = vmul.f32 %v580_v32, %v3777_v12  ;;  %s3210_s9 = sld [smem:[#allocation2 + $0x29]] }
  0x68   : > { %503 = vrot.lane.b32.xlu0 %v498_v19, %s3620_s12  ;;  %v594_v37 = vstv %s3200_s24  ;;  %v679_v38 = vmul.f32 %v677_v34, %v3780_v13  ;;  %v680_v39 = vmul.f32 %v677_v34, %v3805_v33  ;;  %v678_v41 = vmul.f32 %v677_v34, %v3777_v12  ;;  %s3211_s13 = sld [smem:[#allocation2 + $0x4d]] }
  0x69   : > { %v698_v40 = vstv %s3206_s27  ;;  %v596_v42 = vmul.f32 %v594_v37, %v3780_v13  ;;  %v595_v43 = vmul.f32 %v594_v37, %v3777_v12  ;;  %s3212_s14 = sld [smem:[#allocation2 + $0x71]] }
  0x6a   : > { %v700_v44 = vmul.f32 %v698_v40, %v3780_v13  ;;  %v685_v45 = vrot.slane %v679_v38, 1  ;;  %v687_v46 = vrot.slane %v680_v39, 1  ;;  %v701_v47 = vmul.f32 %v698_v40, %v3805_v33  ;;  %s3217_s21 = sld [smem:[#allocation2 + $0x7]] }
  0x6b   : > { %531 = vrot.lane.b32.xlu1 %v526_v21, %s3620_s12  ;;  %v719_v48 = vstv %s3207_s10  ;;  %v684_v49 = vrot.slane %v678_v41, 1  ;;  %v699_v50 = vmul.f32 %v698_v40, %v3777_v12  ;;  %v740_v59 = vstv %s3208_s11  ;;  %s3218_s22 = sld [smem:[#allocation2 + $0x2b]] }
  0x6c   : > { %529 = vrot.lane.b32.xlu0 %v525_v22, %s3620_s12  ;;  %v721_v51 = vmul.f32 %v719_v48, %v3780_v13  ;;  %v722_v52 = vmul.f32 %v719_v48, %v3805_v33  ;;  %v688_v53 = vsel %vm615_vm0, %v685_v45, %v687_v46  ;;  %v706_v54 = vrot.slane %v700_v44, 1  ;;  %s3219_s24 = sld [smem:[#allocation2 + $0x4f]] }
  0x6d   : > { %v708_v55 = vrot.slane %v701_v47, 1  ;;  %v686_v56 = vsel %vm615_vm0, %v684_v49, %v685_v45  ;;  %v705_v57 = vrot.slane %v699_v50, 1  ;;  %v720_v58 = vmul.f32 %v719_v48, %v3777_v12  ;;  %s3220_s27 = sld [smem:[#allocation2 + $0x73]] }
  0x6e   : > { %v727_v60 = vrot.slane %v721_v51, 1  ;;  %v729_v61 = vrot.slane %v722_v52, 1  ;;  %v742_v63 = vmul.f32 %v740_v59, %v3780_v13  ;;  %v743_v0 = vmul.f32 %v740_v59, %v3805_v33  ;;  %s3221_s10 = sld [smem:[#allocation2 + $0x8]] }
  0x6f   : > { %545 = vrot.lane.b32.xlu1 %v540_v24, %s3620_s12  ;;  %v709_v62 = vsel %vm615_vm0, %v706_v54, %v708_v55  ;;  %v707_v1 = vsel %vm615_vm0, %v705_v57, %v706_v54  ;;  %v726_v2 = vrot.slane %v720_v58, 1  ;;  %v741_v3 = vmul.f32 %v740_v59, %v3777_v12  ;;  %s3222_s11 = sld [smem:[#allocation2 + $0x2c]] }
  0x70   : > { %543 = vrot.lane.b32.xlu0 %v539_v25, %s3620_s12  ;;  %v761_v4 = vstv %s3209_s5  ;;  %v730_v5 = vsel %vm615_vm0, %v727_v60, %v729_v61  ;;  %v782_v6 = vstv %s3210_s9  ;;  %v748_v7 = vrot.slane %v742_v63, 1  ;;  %s3223_s5 = sld [smem:[#allocation2 + $0x50]] }
  0x71   : > { %v750_v8 = vrot.slane %v743_v0, 1  ;;  %v763_v9 = vmul.f32 %v761_v4, %v3780_v13  ;;  %v764_v10 = vmul.f32 %v761_v4, %v3805_v33  ;;  %v728_v11 = vsel %vm615_vm0, %v726_v2, %v727_v60  ;;  %s3224_s9 = sld [smem:[#allocation2 + $0x74]] }
  0x72   : > { %v747_v14 = vrot.slane %v741_v3, 1  ;;  %v762_v15 = vmul.f32 %v761_v4, %v3777_v12  ;;  %v784_v16 = vmul.f32 %v782_v6, %v3780_v13  ;;  %v803_v17 = vstv %s3211_s13  ;;  %s3232_s13 = sld [smem:[#allocation2 + $0xa]] }
  0x73   : > { %559 = vrot.lane.b32.xlu1 %v554_v27, %s3621_s6  ;;  %v751_v18 = vsel %vm615_vm0, %v748_v7, %v750_v8  ;;  %v769_v19 = vrot.slane %v763_v9, 1  ;;  %v771_v20 = vrot.slane %v764_v10, 1  ;;  %v785_v21 = vmul.f32 %v782_v6, %v3805_v33  ;;  %s4949_s30 = sld [smem:[#allocation2 + $0x5a]] }
  0x74   : > { %557 = vrot.lane.b32.xlu0 %v553_v28, %s3621_s6  ;;  %v749_v22 = vsel %vm615_vm0, %v747_v14, %v748_v7  ;;  %v768_v23 = vrot.slane %v762_v15, 1  ;;  %v783_v24 = vmul.f32 %v782_v6, %v3777_v12  ;;  %v805_v25 = vmul.f32 %v803_v17, %v3780_v13 }
  0x75   : > { %v806_v26 = vmul.f32 %v803_v17, %v3805_v33  ;;  %v772_v27 = vsel %vm615_vm0, %v769_v19, %v771_v20  ;;  %v790_v28 = vrot.slane %v784_v16, 1  ;;  %v792_v29 = vrot.slane %v785_v21, 1 }
  0x76   : > { %v804_v32 = vmul.f32 %v803_v17, %v3777_v12  ;;  %v824_v34 = vstv %s3212_s14  ;;  %v935_v45 = vstv %s3218_s22  ;;  %v956_v54 = vstv %s3219_s24  ;;  %s3233_s14 = sld [smem:[#allocation2 + $0x2e]] }
  0x77   : > { %573 = vrot.lane.b32.xlu1 %v568_v30, %s3621_s6  ;;  %v770_v30 = vsel %vm615_vm0, %v768_v23, %v769_v19  ;;  %v793_v37 = vsel %vm615_vm0, %v790_v28, %v792_v29  ;;  %v826_v38 = vmul.f32 %v824_v34, %v3780_v13  ;;  %v827_v39 = vmul.f32 %v824_v34, %v3805_v33  ;;  %s3235_s22 = sld [smem:[#allocation2 + $0x76]] }
  0x78   : > { %571 = vrot.lane.b32.xlu0 %v567_v31, %s3621_s6  ;;  %v789_v31 = vrot.slane %v783_v24, 1  ;;  %v810_v41 = vrot.slane %v804_v32, 1  ;;  %v938_v58 = vmul.f32 %v935_v45, %v3805_v33  ;;  %v936_v61 = vmul.f32 %v935_v45, %v3777_v12  ;;  %s3236_s24 = sld [smem:[#allocation2 + $0xb]] }
  0x79   : > { %v832_v46 = vrot.slane %v826_v38, 1  ;;  %v834_v47 = vrot.slane %v827_v39, 1  ;;  %v959_v63 = vmul.f32 %v956_v54, %v3805_v33  ;;  %v977_v6 = vstv %s3220_s27  ;;  %s3237_s27 = sld [smem:[#allocation2 + $0x2f]] }
  0x7a   : > { %v791_v40 = vsel %vm615_vm0, %v789_v31, %v790_v28  ;;  %v945_v2 = vrot.slane %v938_v58, 2  ;;  %v942_v4 = vrot.slane %v936_v61, 2  ;;  %v979_v10 = vmul.f32 %v977_v6, %v3780_v13  ;;  %v3931_v61 = vld [vmem:[%s3772_s7 + $0x10] sm:$0xff] }
  0x7b   : > { %587 = vrot.lane.b32.xlu1 %v582_v35, %s3621_s6  ;;  %v811_v35 = vrot.slane %v805_v25, 1  ;;  %v835_v55 = vsel %vm615_vm0, %v832_v46, %v834_v47  ;;  %v966_v8 = vrot.slane %v959_v63, 2  ;;  %v978_v16 = vmul.f32 %v977_v6, %v3777_v12 }
  0x7c   : > { %585 = vrot.lane.b32.xlu0 %v581_v36, %s3621_s6  ;;  %v813_v36 = vrot.slane %v806_v26, 1  ;;  %v998_v17 = vstv %s3221_s10  ;;  %v1019_v19 = vstv %s3222_s11  ;;  %v985_v20 = vrot.slane %v979_v10, 2  ;;  %s3238_s10 = sld [smem:[#allocation2 + $0x53]] }
  0x7d   : > { %v812_v50 = vsel %vm615_vm0, %v810_v41, %v811_v35  ;;  %v1001_v23 = vmul.f32 %v998_v17, %v3805_v33  ;;  %v984_v25 = vrot.slane %v978_v16, 2  ;;  %v999_v26 = vmul.f32 %v998_v17, %v3777_v12  ;;  %s3244_s11 = sld [smem:[#allocation2 + $0xd]] }
  0x7e   : > { %v814_v44 = vsel %vm615_vm0, %v811_v35, %v813_v36  ;;  %v1022_v28 = vmul.f32 %v1019_v19, %v3805_v33  ;;  %v1020_v35 = vmul.f32 %v1019_v19, %v3777_v12  ;;  %v1040_v36 = vstv %s3223_s5  ;;  %s3239_s5 = sld [smem:[#allocation2 + $0x77]] }
  0x7f   : > { %601 = vrot.lane.b32.xlu1 %v596_v42, %s3621_s6  ;;  %v825_v42 = vmul.f32 %v824_v34, %v3777_v12  ;;  %v1008_v31 = vrot.slane %v1001_v23, 2  ;;  %v986_v32 = vsel %vm852_vm1, %v984_v25, %v985_v20  ;;  %v1005_v34 = vrot.slane %v999_v26, 2 }
  0x80   : > { %599 = vrot.lane.b32.xlu0 %v595_v43, %s3621_s6  ;;  %v914_v43 = vstv %s3217_s21  ;;  %v1029_v38 = vrot.slane %v1022_v28, 2  ;;  %v1043_v41 = vmul.f32 %v1040_v36, %v3805_v33  ;;  %s3234_s21 = sld [smem:[#allocation2 + $0x52]] }
  0x81   : > { %v916_v48 = vmul.f32 %v914_v43, %v3780_v13  ;;  %v917_v49 = vmul.f32 %v914_v43, %v3805_v33  ;;  %v831_v51 = vrot.slane %v825_v42, 1  ;;  %v915_v52 = vmul.f32 %v914_v43, %v3777_v12 }
  0x82   : > { %v1026_v43 = vrot.slane %v1020_v35, 2 }
  0x83   : > { %691 = vrot.lane.b32.xlu1 %v688_v53, %s3620_s12  ;;  %v937_v53 = vmul.f32 %v935_v45, %v3780_v13  ;;  %v924_v57 = vrot.slane %v917_v49, 2  ;;  %v833_v59 = vsel %vm615_vm0, %v831_v51, %v832_v46  ;;  %v921_v60 = vrot.slane %v915_v52, 2 }
  0x84   : > { %689 = vrot.lane.b32.xlu0 %v686_v56, %s3620_s12  ;;  %v922_v56 = vrot.slane %v916_v48, 2  ;;  %v1061_v45 = vstv %s3224_s9  ;;  %v1050_v48 = vrot.slane %v1043_v41, 2  ;;  %s3245_s9 = sld [smem:[#allocation2 + $0x31]] }
  0x85   : > { %v1063_v49 = vmul.f32 %v1061_v45, %v3780_v13 }
  0x86   : > { %v925_v0 = vsel %vm852_vm1, %v922_v56, %v924_v57  ;;  %v923_v3 = vsel %vm852_vm1, %v921_v60, %v922_v56 }
  0x87   : > { %712 = vrot.lane.b32.xlu1 %v709_v62, %s3620_s12  ;;  %v958_v62 = vmul.f32 %v956_v54, %v3780_v13 }
  0x88   : > { %710 = vrot.lane.b32.xlu0 %v707_v1, %s3620_s12  ;;  %v943_v1 = vrot.slane %v937_v53, 2  ;;  %v1062_v53 = vmul.f32 %v1061_v45, %v3777_v12 }
  0x89   : > { %v964_v7 = vrot.slane %v958_v62, 2 }
  0x8a   : > { %v946_v9 = vsel %vm852_vm1, %v943_v1, %v945_v2  ;;  %v944_v14 = vsel %vm852_vm1, %v942_v4, %v943_v1  ;;  %v1068_v57 = vrot.slane %v1062_v53, 2 }
  0x8b   : > { %733 = vrot.lane.b32.xlu1 %v730_v5, %s3620_s12  ;;  %v957_v5 = vmul.f32 %v956_v54, %v3777_v12 }
  0x8c   : > { %731 = vrot.lane.b32.xlu0 %v728_v11, %s3620_s12  ;;  %v980_v11 = vmul.f32 %v977_v6, %v3805_v33  ;;  %v1153_v6 = vstv %s3235_s22  ;;  %s3249_s22 = sld [smem:[#allocation2 + $0x32]] }
  0x8d   : > { %v963_v15 = vrot.slane %v957_v5, 2 }
  0x8e   : > { %v987_v21 = vrot.slane %v980_v11, 2 }
  0x8f   : > { %754 = vrot.lane.b32.xlu1 %v751_v18, %s3620_s12  ;;  %v967_v18 = vsel %vm852_vm1, %v964_v7, %v966_v8  ;;  %v965_v24 = vsel %vm852_vm1, %v963_v15, %v964_v7  ;;  %v1154_v8 = vmul.f32 %v3931_v61, %v1153_v6 }
  0x90   : > { %752 = vrot.lane.b32.xlu0 %v749_v22, %s3620_s12  ;;  %v1000_v22 = vmul.f32 %v998_v17, %v3780_v13  ;;  %v988_v29 = vsel %vm852_vm1, %v985_v20, %v987_v21  ;;  %v1195_v17 = vstv %s3238_s10  ;;  %v1291_v20 = vstv %s3244_s11  ;;  %s3256_s10 = sld [smem:[#allocation2 + $0x10]] }
  0x91   : > { %v1196_v23 = vmul.f32 %v3931_v61, %v1195_v17  ;;  %v1292_v28 = vmul.f32 %v3931_v61, %v1291_v20  ;;  %s3257_s11 = sld [smem:[#allocation2 + $0x34]] }
  0x93   : > { %775 = vrot.lane.b32.xlu1 %v772_v27, %s3621_s6  ;;  %v1021_v27 = vmul.f32 %v1019_v19, %v3780_v13  ;;  %v3960_v19 = vld [vmem:[%s3774_s8 + $0x8] sm:$0x3] }
  0x94   : > { %773 = vrot.lane.b32.xlu0 %v770_v30, %s3621_s6  ;;  %v1006_v30 = vrot.slane %v1000_v22, 2  ;;  %v1294_v26 = vmul.f32 %v3960_v19, %v1291_v20 }
  0x96   : > { %v1009_v39 = vsel %vm852_vm1, %v1006_v30, %v1008_v31  ;;  %v1007_v42 = vsel %vm852_vm1, %v1005_v34, %v1006_v30 }
  0x97   : > { %796 = vrot.lane.b32.xlu1 %v793_v37, %s3621_s6  ;;  %v1027_v37 = vrot.slane %v1021_v27, 2 }
  0x98   : > { %794 = vrot.lane.b32.xlu0 %v791_v40, %s3621_s6  ;;  %v1042_v40 = vmul.f32 %v1040_v36, %v3780_v13 }
  0x99   : > { %v1030_v46 = vsel %vm852_vm1, %v1027_v37, %v1029_v38  ;;  %v1028_v51 = vsel %vm852_vm1, %v1026_v43, %v1027_v37 }
  0x9a   : > { %v1048_v47 = vrot.slane %v1042_v40, 2  ;;  %v1298_v40 = vrot.slane %v1292_v28, 1 }
  0x9b   : > { %817 = vrot.lane.b32.xlu1 %v814_v44, %s3621_s6  ;;  %v1041_v44 = vmul.f32 %v1040_v36, %v3777_v12  ;;  %v3927_v12 = vld [vmem:[%s3772_s7 + $0x18] sm:$0xff]  ;;  %v1301_v36 = vrot.slane %v1294_v26, 1 }
  0x9c   : > { %815 = vrot.lane.b32.xlu0 %v812_v50, %s3621_s6  ;;  %v1064_v50 = vmul.f32 %v1061_v45, %v3805_v33  ;;  %v1051_v54 = vsel %vm852_vm1, %v1048_v47, %v1050_v48  ;;  %v1155_v7 = vmul.f32 %v3927_v12, %v1153_v6  ;;  %v1197_v22 = vmul.f32 %v3927_v12, %v1195_v17 }
  0x9d   : > { %v1047_v52 = vrot.slane %v1041_v44, 2  ;;  %v1293_v25 = vmul.f32 %v3927_v12, %v1291_v20  ;;  %v1396_v6 = vstv %s3249_s22  ;;  %s4105_s22 = sld [smem:[#allocation2 + $0x7d]] }
  0x9e   : > { %v1071_v56 = vrot.slane %v1064_v50, 2  ;;  %v1397_v26 = vmul.f32 %v3931_v61, %v1396_v6 }
  0x9f   : > { %838 = vrot.lane.b32.xlu1 %v835_v55, %s3621_s6  ;;  %v1069_v55 = vrot.slane %v1063_v49, 2  ;;  %v1049_v13 = vsel %vm852_vm1, %v1047_v52, %v1048_v47  ;;  %v1299_v35 = vrot.slane %v1293_v25, 1 }
  0xa0   : > { %836 = vrot.lane.b32.xlu0 %v833_v59, %s3621_s6  ;;  %v1111_v59 = vstv %s3232_s13  ;;  %s3246_s13 = sld [smem:[#allocation2 + $0x55]] }
  0xa1   : > { %v1072_v58 = vsel %vm852_vm1, %v1069_v55, %v1071_v56  ;;  %v1070_v60 = vsel %vm852_vm1, %v1068_v57, %v1069_v55  ;;  %v1113_v62 = vmul.f32 %v3927_v12, %v1111_v59  ;;  %v1112_v63 = vmul.f32 %v3931_v61, %v1111_v59 }
  0xa2   : > { %v1302_v45 = vsel %vm615_vm0, %v1299_v35, %v1301_v36  ;;  %v1300_v50 = vsel %vm615_vm0, %v1298_v40, %v1299_v35 }
  0xa3   : > { %928 = vrot.lane.b32.xlu1 %v925_v0, %s3620_s12  ;;  %v1125_v0 = vstv %s3233_s14  ;;  %s3247_s14 = sld [smem:[#allocation2 + $0x79]] }
  0xa4   : > { %926 = vrot.lane.b32.xlu0 %v923_v3, %s3620_s12  ;;  %v1127_v1 = vmul.f32 %v3927_v12, %v1125_v0  ;;  %v1126_v2 = vmul.f32 %v3931_v61, %v1125_v0  ;;  %v1139_v3 = vstv %s3234_s21  ;;  %s3248_s21 = sld [smem:[#allocation2 + $0xe]] }
  0xa5   : > { %v1141_v4 = vmul.f32 %v3927_v12, %v1139_v3  ;;  %v1140_v5 = vmul.f32 %v3931_v61, %v1139_v3 }
  0xa6   : > { %v1333_v34 = vstv %s3246_s13  ;;  %s3260_s13 = sld [smem:[#allocation2 + $0x11]] }
  0xa7   : > { %949 = vrot.lane.b32.xlu1 %v946_v9, %s3620_s12  ;;  %v1167_v9 = vstv %s3236_s24  ;;  %v1335_v43 = vmul.f32 %v3927_v12, %v1333_v34  ;;  %v1336_v44 = vmul.f32 %v3960_v19, %v1333_v34  ;;  %v1334_v52 = vmul.f32 %v3931_v61, %v1333_v34  ;;  %s3250_s24 = sld [smem:[#allocation2 + $0x56]] }
  0xa8   : > { %947 = vrot.lane.b32.xlu0 %v944_v14, %s3620_s12  ;;  %v1169_v10 = vmul.f32 %v3927_v12, %v1167_v9  ;;  %v1168_v11 = vmul.f32 %v3931_v61, %v1167_v9  ;;  %v1181_v14 = vstv %s3237_s27  ;;  %s3251_s27 = sld [smem:[#allocation2 + $0x7a]] }
  0xa9   : > { %v1183_v15 = vmul.f32 %v3927_v12, %v1181_v14  ;;  %v1182_v16 = vmul.f32 %v3931_v61, %v1181_v14  ;;  %v1354_v48 = vstv %s3247_s14  ;;  %v1343_v55 = vrot.slane %v1336_v44, 1  ;;  %s3261_s14 = sld [smem:[#allocation2 + $0x35]] }
  0xaa   : > { %v1356_v56 = vmul.f32 %v3927_v12, %v1354_v48  ;;  %v1357_v57 = vmul.f32 %v3960_v19, %v1354_v48  ;;  %v1398_v14 = vmul.f32 %v3927_v12, %v1396_v6 }
  0xab   : > { %970 = vrot.lane.b32.xlu1 %v967_v18, %s3620_s12 }
  0xac   : > { %968 = vrot.lane.b32.xlu0 %v965_v24, %s3620_s12  ;;  %v1209_v24 = vstv %s3239_s5  ;;  %v1364_v3 = vrot.slane %v1357_v57, 1  ;;  %s3258_s5 = sld [smem:[#allocation2 + $0x58]] }
  0xad   : > { %v1211_v31 = vmul.f32 %v3927_v12, %v1209_v24 }
  0xaf   : > { %991 = vrot.lane.b32.xlu1 %v988_v29, %s3620_s12  ;;  %v1312_v29 = vstv %s3245_s9  ;;  %s3259_s9 = sld [smem:[#allocation2 + $0x7c]] }
  0xb0   : > { %989 = vrot.lane.b32.xlu0 %v986_v32, %s3620_s12  ;;  %v1210_v32 = vmul.f32 %v3931_v61, %v1209_v24  ;;  %v1314_v37 = vmul.f32 %v3927_v12, %v1312_v29  ;;  %v1315_v38 = vmul.f32 %v3960_v19, %v1312_v29  ;;  %v1313_v41 = vmul.f32 %v3931_v61, %v1312_v29 }
  0xb1   : > { %v1404_v29 = vrot.slane %v1398_v14, 1 }
  0xb2   : > { %v1322_v47 = vrot.slane %v1315_v38, 1  ;;  %v1403_v38 = vrot.slane %v1397_v26, 1 }
  0xb3   : > { %1012 = vrot.lane.b32.xlu1 %v1009_v39, %s3621_s6 }
  0xb4   : > { %1010 = vrot.lane.b32.xlu0 %v1007_v42, %s3621_s6 }
  0xb5   : > { %v1590_v26 = vstv %s3259_s9  ;;  %s4143_s9 = sld [smem:[#allocation2 + $0x48]] }
  0xb7   : > { %1033 = vrot.lane.b32.xlu1 %v1030_v46, %s3621_s6  ;;  %v1320_v46 = vrot.slane %v1314_v37, 1 }
  0xb8   : > { %1031 = vrot.lane.b32.xlu0 %v1028_v51, %s3621_s6  ;;  %v1319_v51 = vrot.slane %v1313_v41, 1  ;;  %v1438_v41 = vstv %s3251_s27  ;;  %s4116_s27 = sld [smem:[#allocation2]] }
  0xba   : > { %v1321_v59 = vsel %vm615_vm0, %v1319_v51, %v1320_v46 }
  0xbb   : > { %1054 = vrot.lane.b32.xlu1 %v1051_v54, %s3621_s6  ;;  %v1341_v54 = vrot.slane %v1335_v43, 1 }
  0xbc   : > { %1052 = vrot.lane.b32.xlu0 %v1049_v13, %s3621_s6  ;;  %v1323_v13 = vsel %vm615_vm0, %v1320_v46, %v1322_v47  ;;  %v1440_v47 = vmul.f32 %v3927_v12, %v1438_v41 }
  0xbf   : > { %1075 = vrot.lane.b32.xlu1 %v1072_v58, %s3621_s6 }
  0xc0   : > { %1073 = vrot.lane.b32.xlu0 %v1070_v60, %s3621_s6  ;;  %v1340_v60 = vrot.slane %v1334_v52, 1  ;;  %v1405_v52 = vsel %vm615_vm0, %v1403_v38, %v1404_v29 }
  0xc3   : > { %1118 = vrot.lane.b32.xlu1 %v1113_v62, %s3620_s12  ;;  %v1355_v62 = vmul.f32 %v3931_v61, %v1354_v48  ;;  %v1441_v48 = vmul.f32 %v3960_v19, %v1438_v41 }
  0xc4   : > { %1116 = vrot.lane.b32.xlu0 %v1112_v63, %s3620_s12  ;;  %v1375_v63 = vstv %s3248_s21  ;;  %s3262_s21 = sld [smem:[#allocation2 + $0x59]] }
  0xc5   : > { %v1361_v9 = vrot.slane %v1355_v62, 1  ;;  %v1448_v62 = vrot.slane %v1441_v48, 1 }
  0xc7   : > { %1132 = vrot.lane.b32.xlu1 %v1127_v1, %s3620_s12  ;;  %v1344_v1 = vsel %vm615_vm0, %v1341_v54, %v1343_v55  ;;  %v1439_v55 = vmul.f32 %v3931_v61, %v1438_v41 }
  0xc8   : > { %1130 = vrot.lane.b32.xlu0 %v1126_v2, %s3620_s12  ;;  %v1362_v2 = vrot.slane %v1356_v56, 1 }
  0xca   : > { %v1363_v24 = vsel %vm615_vm0, %v1361_v9, %v1362_v2 }
  0xcb   : > { %1146 = vrot.lane.b32.xlu1 %v1141_v4, %s3620_s12  ;;  %v1377_v4 = vmul.f32 %v3927_v12, %v1375_v63 }
  0xcc   : > { %1144 = vrot.lane.b32.xlu0 %v1140_v5, %s3620_s12  ;;  %v1378_v5 = vmul.f32 %v3960_v19, %v1375_v63 }
  0xcd   : > { %v1383_v17 = vrot.slane %v1377_v4, 1  ;;  %v1548_v4 = vstv %s3257_s11  ;;  %s4126_s11 = sld [smem:[#allocation2 + $0x27]] }
  0xce   : > { %v1385_v20 = vrot.slane %v1378_v5, 1  ;;  %v1551_v14 = vmul.f32 %v3960_v19, %v1548_v4 }
  0xcf   : > { %1160 = vrot.lane.b32.xlu1 %v1155_v7, %s3620_s12 }
  0xd0   : > { %1158 = vrot.lane.b32.xlu0 %v1154_v8, %s3620_s12  ;;  %v1342_v8 = vsel %vm615_vm0, %v1340_v60, %v1341_v54  ;;  %v1386_v34 = vsel %vm615_vm0, %v1383_v17, %v1385_v20  ;;  %v1446_v60 = vrot.slane %v1440_v47, 1  ;;  %v1549_v20 = vmul.f32 %v3931_v61, %v1548_v4 }
  0xd2   : > { %v1449_v9 = vsel %vm615_vm0, %v1446_v60, %v1448_v62  ;;  %v1555_v38 = vrot.slane %v1549_v20, 2 }
  0xd3   : > { %1174 = vrot.lane.b32.xlu1 %v1169_v10, %s3621_s6  ;;  %v1376_v10 = vmul.f32 %v3931_v61, %v1375_v63 }
  0xd4   : > { %1172 = vrot.lane.b32.xlu0 %v1168_v11, %s3621_s6 }
  0xd5   : > { %v3957_v18 = vpop.permute.xlu1 %515  ;;  %v1382_v25 = vrot.slane %v1376_v10, 1  ;;  %v1550_v10 = vmul.f32 %v3927_v12, %v1548_v4 }
  0xd6   : > { %v3962_v21 = vpop.permute.xlu0 %501 }
  0xd7   : > { %1188 = vrot.lane.b32.xlu1 %v1183_v15, %s3621_s6  ;;  %v1399_v15 = vmul.f32 %v3960_v19, %v1396_v6  ;;  %v1384_v37 = vsel %vm615_vm0, %v1382_v25, %v1383_v17 }
  0xd8   : > { %1186 = vrot.lane.b32.xlu0 %v1182_v16, %s3621_s6  ;;  %v1365_v16 = vsel %vm615_vm0, %v1362_v2, %v1364_v3  ;;  %v1445_v2 = vrot.slane %v1439_v55, 1  ;;  %v1591_v55 = vmul.f32 %v3931_v61, %v1590_v26 }
  0xd9   : > { %v3970_v27 = vpop.permute.xlu1 %517 }
  0xda   : > { %v3973_v30 = vpop.permute.xlu0 %503 }
  0xdb   : > { %1202 = vrot.lane.b32.xlu1 %v1197_v22, %s3621_s6  ;;  %v1417_v22 = vstv %s3250_s24  ;;  %s4109_s24 = sld [smem:[#allocation2 + $0x24]] }
  0xdc   : > { %1200 = vrot.lane.b32.xlu0 %v1196_v23, %s3621_s6  ;;  %v1420_v35 = vmul.f32 %v3960_v19, %v1417_v22  ;;  %v1418_v40 = vmul.f32 %v3931_v61, %v1417_v22 }
  0xdd   : > { %v3981_v39 = vpop.permute.xlu1 %531 }
  0xde   : > { %v3984_v42 = vpop.permute.xlu0 %529  ;;  %v1427_v46 = vrot.slane %v1420_v35, 1  ;;  %v1424_v54 = vrot.slane %v1418_v40, 1 }
  0xdf   : > { %1216 = vrot.lane.b32.xlu1 %v1211_v31, %s3621_s6  ;;  %v1406_v31 = vrot.slane %v1399_v15, 1 }
  0xe0   : > { %1214 = vrot.lane.b32.xlu0 %v1210_v32, %s3621_s6  ;;  %v1419_v32 = vmul.f32 %v3927_v12, %v1417_v22  ;;  %v1569_v22 = vstv %s3258_s5  ;;  %s4129_s5 = sld [smem:[#allocation2 + $0x4b]] }
  0xe1   : > { %v3991_v49 = vpop.permute.xlu1 %545  ;;  %v1407_v44 = vsel %vm615_vm0, %v1404_v29, %v1406_v31  ;;  %v1556_v29 = vrot.slane %v1550_v10, 2  ;;  %v1558_v31 = vrot.slane %v1551_v14, 2  ;;  %v1570_v40 = vmul.f32 %v3931_v61, %v1569_v22 }
  0xe2   : > { %v3995_v53 = vpop.permute.xlu0 %543 }
  0xe3   : > { %1305 = vrot.lane.b32.xlu1 %v1302_v45, %s3620_s12  ;;  %v1425_v45 = vrot.slane %v1419_v32, 1  ;;  %v1571_v32 = vmul.f32 %v3927_v12, %v1569_v22 }
  0xe4   : > { %1303 = vrot.lane.b32.xlu0 %v1300_v50, %s3620_s12  ;;  %v1527_v50 = vstv %s3256_s10  ;;  %s4122_s10 = sld [smem:[#allocation2 + $0x3]] }
  0xe5   : > { %v4002_v58 = vpop.permute.xlu1 %559  ;;  %v1530_v57 = vmul.f32 %v3960_v19, %v1527_v50  ;;  %v1528_v3 = vmul.f32 %v3931_v61, %v1527_v50  ;;  %v1577_v47 = vrot.slane %v1571_v32, 2  ;;  %v1653_v32 = vstv %s3262_s21  ;;  %s4159_s21 = sld [smem:[#allocation2 + $0x6f]] }
  0xe6   : > { %v4006_v0 = vpop.permute.xlu0 %557 }
  0xe7   : > { %1326 = vrot.lane.b32.xlu1 %v1323_v13, %s3620_s12  ;;  %v1529_v13 = vmul.f32 %v3927_v12, %v1527_v50  ;;  %v1534_v17 = vrot.slane %v1528_v3, 2  ;;  %v1632_v3 = vstv %s3261_s14  ;;  %s4152_s14 = sld [smem:[#allocation2 + $0x6c]] }
  0xe8   : > { %1324 = vrot.lane.b32.xlu0 %v1321_v59, %s3620_s12  ;;  %v1428_v59 = vsel %vm615_vm0, %v1425_v45, %v1427_v46  ;;  %v1559_v46 = vsel %vm852_vm1, %v1556_v29, %v1558_v31  ;;  %v1634_v14 = vmul.f32 %v3927_v12, %v1632_v3  ;;  %v1633_v31 = vmul.f32 %v3931_v61, %v1632_v3 }
  0xe9   : > { %v4013_v7 = vpop.permute.xlu1 %573  ;;  %v1535_v6 = vrot.slane %v1529_v13, 2  ;;  %v1611_v13 = vstv %s3260_s13  ;;  %s4150_s13 = sld [smem:[#allocation2 + $0x13]] }
  0xea   : > { %v4017_v11 = vpop.permute.xlu0 %571 }
  0xeb   : > { %1347 = vrot.lane.b32.xlu1 %v1344_v1, %s3620_s12  ;;  %v1426_v1 = vsel %vm615_vm0, %v1424_v54, %v1425_v45  ;;  %v1593_v45 = vmul.f32 %v3960_v19, %v1590_v26  ;;  %v1576_v54 = vrot.slane %v1570_v40, 2 }
  0xec   : > { %1345 = vrot.lane.b32.xlu0 %v1342_v8, %s3620_s12  ;;  %v1537_v8 = vrot.slane %v1530_v57, 2 }
  0xed   : > { %v4024_v23 = vpop.permute.xlu1 %587 }
  0xee   : > { %v4028_v28 = vpop.permute.xlu0 %585  ;;  %v1538_v25 = vsel %vm852_vm1, %v1535_v6, %v1537_v8  ;;  %v1597_v8 = vrot.slane %v1591_v55, 2 }
  0xef   : > { %1368 = vrot.lane.b32.xlu1 %v1365_v16, %s3620_s12  ;;  %v1447_v16 = vsel %vm615_vm0, %v1445_v2, %v1446_v60  ;;  %v1600_v60 = vrot.slane %v1593_v45, 2  ;;  %v1614_v2 = vmul.f32 %v3960_v19, %v1611_v13  ;;  %v1656_v45 = vmul.f32 %v3960_v19, %v1653_v32 }
  0xf0   : > { %1366 = vrot.lane.b32.xlu0 %v1363_v24, %s3620_s12 }
  0xf1   : > { %v4035_v36 = vpop.permute.xlu1 %601 }
  0xf2   : > { %v4039_v43 = vpop.permute.xlu0 %599 }
  0xf3   : > { %1389 = vrot.lane.b32.xlu1 %v1386_v34, %s3621_s6  ;;  %v1572_v34 = vmul.f32 %v3960_v19, %v1569_v22  ;;  %v1621_v22 = vrot.slane %v1614_v2, 2 }
  0xf4   : > { %1387 = vrot.lane.b32.xlu0 %v1384_v37, %s3621_s6  ;;  %v1536_v37 = vsel %vm852_vm1, %v1534_v17, %v1535_v6  ;;  %v1578_v6 = vsel %vm852_vm1, %v1576_v54, %v1577_v47  ;;  %v1674_v54 = vstv %s4105_s22  ;;  %s4181_s22 = sld [smem:[#allocation2 + $0x37]] }
  0xf5   : > { %v4046_v51 = vpop.permute.xlu1 %691  ;;  %v1579_v48 = vrot.slane %v1572_v34, 2  ;;  %v1677_v2 = vmul.f32 %v3960_v19, %v1674_v54 }
  0xf6   : > { %5898 = vst [vmem:[#allocation13_spill] sm:$0xff] %v4046_v51  ;;  %v4050_v56 = vpop.permute.xlu0 %689 }
  0xf7   : > { %5899 = vst [vmem:[#allocation14_spill] sm:$0xff] %v4050_v56  ;;  %1410 = vrot.lane.b32.xlu1 %v1407_v44, %s3621_s6  ;;  %v1592_v44 = vmul.f32 %v3927_v12, %v1590_v26  ;;  %v1580_v62 = vsel %vm852_vm1, %v1577_v47, %v1579_v48  ;;  %v1639_v48 = vrot.slane %v1633_v31, 2  ;;  %v626_v31 = vstv %s4126_s11  ;;  %s4218_s11 = sld [smem:[#allocation2 + $0x4e]] }
  0xf8   : > { %1408 = vrot.lane.b32.xlu0 %v1405_v52, %s3621_s6  ;;  %v1557_v52 = vsel %vm852_vm1, %v1555_v38, %v1556_v29 }
  0xf9   : > { %v4057_v63 = vpop.permute.xlu1 %712 }
  0xfa   : > { %5900 = vst [vmem:[#allocation15_spill] sm:$0xff] %v4057_v63  ;;  %v4061_v5 = vpop.permute.xlu0 %710 }
  0xfb   : > { %5901 = vst [vmem:[#allocation16_spill] sm:$0xff] %v4061_v5  ;;  %1431 = vrot.lane.b32.xlu1 %v1428_v59, %s3621_s6  ;;  %v1598_v59 = vrot.slane %v1592_v44, 2  ;;  %v1655_v44 = vmul.f32 %v3927_v12, %v1653_v32 }
  0xfc   : > { %1429 = vrot.lane.b32.xlu0 %v1426_v1, %s3621_s6  ;;  %v1613_v1 = vmul.f32 %v3927_v12, %v1611_v13 }
  0xfd   : > { %v4068_v15 = vpop.permute.xlu1 %733  ;;  %v1601_v17 = vsel %vm852_vm1, %v1598_v59, %v1600_v60  ;;  %v1599_v26 = vsel %vm852_vm1, %v1597_v8, %v1598_v59  ;;  %v1661_v60 = vrot.slane %v1655_v44, 2 }
  0xfe   : > { %5902 = vst [vmem:[#allocation17_spill] sm:$0xff] %v4068_v15  ;;  %v4072_v24 = vpop.permute.xlu0 %731  ;;  %v1619_v20 = vrot.slane %v1613_v1, 2  ;;  %v1676_v1 = vmul.f32 %v3927_v12, %v1674_v54 }
  0xff   : > { %5903 = vst [vmem:[#allocation18_spill] sm:$0xff] %v4072_v24  ;;  %1452 = vrot.lane.b32.xlu1 %v1449_v9, %s3621_s6  ;;  %v1612_v9 = vmul.f32 %v3931_v61, %v1611_v13  ;;  %v484_v13 = vstv %s4109_s24  ;;  %s4194_s24 = sld [smem:[#allocation2 + $0x6]] }
 0x100   : > { %1450 = vrot.lane.b32.xlu0 %v1447_v16, %s3621_s6  ;;  %v1635_v16 = vmul.f32 %v3960_v19, %v1632_v3  ;;  %v1622_v40 = vsel %vm852_vm1, %v1619_v20, %v1621_v22  ;;  %v480_v22 = vstv %s4116_s27  ;;  %s4204_s27 = sld [smem:[#allocation2 + $0x2a]] }
 0x101   : > { %v4079_v35 = vpop.permute.xlu1 %754  ;;  %v1618_v29 = vrot.slane %v1612_v9, 2  ;;  %v1675_v9 = vmul.f32 %v3931_v61, %v1674_v54 }
 0x102   : > { %5904 = vst [vmem:[#allocation19_spill] sm:$0xff] %v4079_v35  ;;  %v4083_v41 = vpop.permute.xlu0 %752  ;;  %v1642_v38 = vrot.slane %v1635_v16, 2 }
 0x103   : > { %5905 = vst [vmem:[#allocation20_spill] sm:$0xff] %v4083_v41  ;;  %1541 = vrot.lane.b32.xlu1 %v1538_v25, %s3620_s12  ;;  %v1620_v47 = vsel %vm852_vm1, %v1618_v29, %v1619_v20 }
 0x104   : > { %1539 = vrot.lane.b32.xlu0 %v1536_v37, %s3620_s12  ;;  %v1640_v37 = vrot.slane %v1634_v14, 2  ;;  %v608_v14 = vstv %s4122_s10  ;;  %s4215_s10 = sld [smem:[#allocation2 + $0x5b]] }
 0x105   : > { %v4090_v50 = vpop.permute.xlu1 %775 }
 0x106   : > { %5906 = vst [vmem:[#allocation21_spill] sm:$0xff] %v4090_v50  ;;  %v4094_v57 = vpop.permute.xlu0 %773  ;;  %v1643_v59 = vsel %vm852_vm1, %v1640_v37, %v1642_v38  ;;  %v1682_v38 = vrot.slane %v1676_v1, 2 }
 0x107   : > { %5907 = vst [vmem:[#allocation22_spill] sm:$0xff] %v4094_v57  ;;  %1562 = vrot.lane.b32.xlu1 %v1559_v46, %s3620_s12 }
 0x108   : > { %1560 = vrot.lane.b32.xlu0 %v1557_v52, %s3620_s12  ;;  %v1654_v52 = vmul.f32 %v3931_v61, %v1653_v32  ;;  %v643_v32 = vstv %s4129_s5  ;;  %s4229_s5 = sld [smem:[#allocation2 + $0x72]] }
 0x109   : > { %v4101_v4 = vpop.permute.xlu1 %796 }
 0x10a   : > { %5908 = vst [vmem:[#allocation23_spill] sm:$0xff] %v4101_v4  ;;  %v4107_v10 = vpop.permute.xlu0 %794  ;;  %v1660_v8 = vrot.slane %v1654_v52, 2  ;;  %v1681_v52 = vrot.slane %v1675_v9, 2  ;;  %v488_v9 = vstv %s4143_s9  ;;  %s4239_s9 = sld [smem:[#allocation2 + $0x7f]] }
 0x10b   : > { %5909 = vst [vmem:[#allocation24_spill] sm:$0xff] %v4107_v10  ;;  %1583 = vrot.lane.b32.xlu1 %v1580_v62, %s3620_s12  ;;  %v1663_v62 = vrot.slane %v1656_v45, 2  ;;  %v611_v45 = vmul.f32 %v608_v14, %v3805_v33 }
 0x10c   : > { %1581 = vrot.lane.b32.xlu0 %v1578_v6, %s3620_s12  ;;  %v1641_v6 = vsel %vm852_vm1, %v1639_v48, %v1640_v37  ;;  %v1662_v48 = vsel %vm852_vm1, %v1660_v8, %v1661_v60  ;;  %v646_v8 = vmul.f32 %v643_v32, %v3805_v33 }
 0x10d   : > { %v4118_v25 = vpop.permute.xlu1 %817  ;;  %v1664_v37 = vsel %vm852_vm1, %v1661_v60, %v1663_v62  ;;  %v629_v62 = vmul.f32 %v626_v31, %v3805_v33 }
 0x10e   : > { %5910 = vst [vmem:[#allocation25_spill] sm:$0xff] %v4118_v25  ;;  %v4124_v34 = vpop.permute.xlu0 %815  ;;  %v653_v25 = vrot.slane %v646_v8, 1  ;;  %v3472_v8 = vld [vmem:[%s3774_s8] sm:$0x3] }
 0x10f   : > { %5911 = vst [vmem:[#allocation26_spill] sm:$0xff] %v4124_v34  ;;  %1604 = vrot.lane.b32.xlu1 %v1601_v17, %s3620_s12  ;;  %v4164_v17 = vld [vmem:[%s3772_s7] sm:$0xff] }
 0x110   : > { %1602 = vrot.lane.b32.xlu0 %v1599_v26, %s3620_s12  ;;  %v4167_v20 = vmul.f32 %v4164_v17, %v484_v13  ;;  %v4171_v26 = vld [vmem:[%s3772_s7 + $0x8] sm:$0xff]  ;;  %v4189_v54 = vmul.f32 %v4164_v17, %v480_v22  ;;  %v627_v60 = vmul.f32 %v4164_v17, %v626_v31 }
 0x111   : > { %v4135_v46 = vpop.permute.xlu1 %838  ;;  %v4174_v29 = vmul.f32 %v4171_v26, %v484_v13  ;;  %v610_v44 = vmul.f32 %v4171_v26, %v608_v14  ;;  %v609_v13 = vmul.f32 %v4164_v17, %v608_v14  ;;  %v644_v14 = vmul.f32 %v4164_v17, %v643_v32 }
 0x112   : > { %5912 = vst [vmem:[#allocation27_spill] sm:$0xff] %v4135_v46  ;;  %v4140_v55 = vpop.permute.xlu0 %836  ;;  %v660_v46 = vstv %s4159_s21  ;;  %s4300_s21 = sld [smem:[#allocation2 + $0x2d]] }
 0x113   : > { %5913 = vst [vmem:[#allocation28_spill] sm:$0xff] %v4140_v55  ;;  %1625 = vrot.lane.b32.xlu1 %v1622_v40, %s3621_s6  ;;  %v1684_v40 = vrot.slane %v1677_v2, 2  ;;  %v4199_v2 = vmul.f32 %v4171_v26, %v480_v22  ;;  %v617_v33 = vrot.slane %v610_v44, 1  ;;  %v633_v44 = vrot.slane %v627_v60, 1 }
 0x114   : > { %1623 = vrot.lane.b32.xlu0 %v1620_v47, %s3621_s6 }
 0x115   : > { %v4154_v3 = vpop.permute.xlu1 %928  ;;  %v1685_v22 = vsel %vm852_vm1, %v1682_v38, %v1684_v40  ;;  %v636_v40 = vrot.slane %v629_v62, 1  ;;  %v4242_v62 = vmul.f32 %v4164_v17, %v488_v9 }
 0x116   : > { %5914 = vst [vmem:[#allocation29_spill] sm:$0xff] %v4154_v3  ;;  %v4161_v16 = vpop.permute.xlu0 %926 }
 0x117   : > { %5915 = vst [vmem:[#allocation30_spill] sm:$0xff] %v4161_v16  ;;  %1646 = vrot.lane.b32.xlu1 %v1643_v59, %s3621_s6  ;;  %v628_v59 = vmul.f32 %v4171_v26, %v626_v31  ;;  %v1724_v31 = vstv %s4150_s13  ;;  %v619_v16 = vrot.slane %v611_v45, 1  ;;  %s4285_s13 = sld [smem:[#allocation2 + $0x14]] }
 0x118   : > { %1644 = vrot.lane.b32.xlu0 %v1641_v6, %s3621_s6  ;;  %v645_v6 = vmul.f32 %v4171_v26, %v643_v32  ;;  %v4224_v32 = vld [vmem:[%s3772_s7 + $0x20] sm:$0xff] }
 0x119   : > { %v4185_v47 = vpop.permute.xlu1 %949  ;;  %v634_v55 = vrot.slane %v628_v59, 1  ;;  %v1738_v59 = vstv %s4181_s22  ;;  %s4306_s22 = sld [smem:[#allocation2 + $0x38]] }
 0x11a   : > { %5916 = vst [vmem:[#allocation31_spill] sm:$0xff] %v4185_v47  ;;  %v4196_v1 = vpop.permute.xlu0 %947  ;;  %v492_v47 = vstv %s4152_s14  ;;  %v651_v45 = vrot.slane %v645_v6, 1  ;;  %v4248_v6 = vmul.f32 %v4171_v26, %v660_v46  ;;  %s4293_s14 = sld [smem:[#allocation2 + $0x9]] }
 0x11b   : > { %5917 = vst [vmem:[#allocation32_spill] sm:$0xff] %v4196_v1  ;;  %1667 = vrot.lane.b32.xlu1 %v1664_v37, %s3621_s6  ;;  %v4212_v1 = vld [vmem:[%s3772_s7 + $0x28] sm:$0xff]  ;;  %v1683_v37 = vsel %vm852_vm1, %v1681_v52, %v1682_v38  ;;  %v4234_v38 = vmul.f32 %v4171_v26, %v488_v9  ;;  %v650_v52 = vrot.slane %v644_v14, 1  ;;  %v4245_v60 = vmul.f32 %v4171_v26, %v492_v47 }
 0x11c   : > { %1665 = vrot.lane.b32.xlu0 %v1662_v48, %s3621_s6  ;;  %v616_v48 = vrot.slane %v609_v13, 1  ;;  %v1725_v13 = vmul.f32 %v4224_v32, %v1724_v31  ;;  %v4251_v14 = vmul.f32 %v3472_v8, %v660_v46  ;;  %v4270_v4 = vsel %vm615_vm0, %v633_v44, %v634_v55 }
 0x11d   : > { %v4220_v3 = vpop.permute.xlu1 %970  ;;  %v880_v44 = vstv %s4218_s11  ;;  %s4327_s11 = sld [smem:[#allocation2 + $0x80]] }
 0x11e   : > { %5918 = vst [vmem:[#allocation33_spill] sm:$0xff] %v4220_v3  ;;  %v4227_v34 = vpop.permute.xlu0 %968  ;;  %v1726_v3 = vmul.f32 %v4212_v1, %v1724_v31  ;;  %v4256_v31 = vmul.f32 %v4164_v17, %v492_v47  ;;  %v4262_v9 = vsel %vm615_vm0, %v616_v48, %v617_v33  ;;  %v845_v47 = vstv %s4194_s24  ;;  %s4312_s24 = sld [smem:[#allocation2 + $0x16]] }
 0x11f   : > { %5919 = vst [vmem:[#allocation34_spill] sm:$0xff] %v4227_v34  ;;  %1688 = vrot.lane.b32.xlu1 %v1685_v22, %s3621_s6  ;;  %v4265_v34 = vsel %vm615_vm0, %v634_v55, %v636_v40  ;;  %v863_v48 = vstv %s4204_s27  ;;  %v1739_v40 = vmul.f32 %v4224_v32, %v1738_v59  ;;  %v670_v55 = vrot.slane %v4251_v14, 1  ;;  %s4319_s27 = sld [smem:[#allocation2 + $0x51]] }
 0x120   : > { %1686 = vrot.lane.b32.xlu0 %v1683_v37, %s3621_s6  ;;  %v4259_v37 = vsel %vm615_vm0, %v617_v33, %v619_v16  ;;  %v1740_v16 = vmul.f32 %v4212_v1, %v1738_v59  ;;  %v4279_v33 = vsel %vm615_vm0, %v650_v52, %v651_v45  ;;  %v848_v52 = vmul.f32 %v3472_v8, %v845_v47 }
 0x121   : > { %v4253_v22 = vpop.permute.xlu1 %991  ;;  %5923 = vst [vmem:[#allocation38_spill] sm:$0xff] %v4279_v33  ;;  %v897_v59 = vstv %s4229_s5  ;;  %v866_v14 = vmul.f32 %v3472_v8, %v863_v48  ;;  %v882_v50 = vmul.f32 %v4171_v26, %v880_v44  ;;  %v883_v35 = vmul.f32 %v3472_v8, %v880_v44  ;;  %s4332_s5 = sld [smem:[#allocation2 + $0x3a]] }
 0x122   : > { %5920 = vst [vmem:[#allocation35_spill] sm:$0xff] %v4253_v22  ;;  %v4267_v10 = vpop.permute.xlu0 %989  ;;  %v4273_v22 = vsel %vm615_vm0, %v651_v45, %v653_v25  ;;  %v668_v25 = vrot.slane %v4248_v6, 1  ;;  %v847_v45 = vmul.f32 %v4171_v26, %v845_v47  ;;  %v865_v6 = vmul.f32 %v4171_v26, %v863_v48 }
 0x123   : > { %5921 = vst [vmem:[#allocation36_spill] sm:$0xff] %v4267_v10  ;;  %5922 = vst [vmem:[#allocation37_spill] sm:$0xff] %v4273_v22  ;;  %1731 = vrot.lane.b32.xlu1 %v1726_v3, %s3620_s12  ;;  %v1752_v10 = vstv %s4215_s10  ;;  %v661_v3 = vmul.f32 %v4164_v17, %v660_v46  ;;  %v864_v46 = vmul.f32 %v4164_v17, %v863_v48  ;;  %s4323_s10 = sld [smem:[#allocation2 + $0x5c]] }
 0x124   : > { %1729 = vrot.lane.b32.xlu0 %v1725_v13, %s3620_s12  ;;  %v846_v13 = vmul.f32 %v4164_v17, %v845_v47  ;;  %v1753_v47 = vmul.f32 %v4224_v32, %v1752_v10  ;;  %v881_v24 = vmul.f32 %v4164_v17, %v880_v44  ;;  %v899_v48 = vmul.f32 %v4171_v26, %v897_v59 }
 0x125   : > { %v4291_v57 = vpop.permute.xlu1 %1012  ;;  %v900_v15 = vmul.f32 %v3472_v8, %v897_v59  ;;  %v667_v63 = vrot.slane %v661_v3, 1  ;;  %v854_v56 = vrot.slane %v847_v45, 2  ;;  %v871_v33 = vrot.slane %v865_v6, 2 }
 0x126   : > { %5924 = vst [vmem:[#allocation39_spill] sm:$0xff] %v4291_v57  ;;  %v4298_v41 = vpop.permute.xlu0 %1010  ;;  %v1754_v57 = vmul.f32 %v4212_v1, %v1752_v10  ;;  %v853_v51 = vrot.slane %v846_v13, 2  ;;  %v873_v44 = vrot.slane %v866_v14, 2  ;;  %v870_v22 = vrot.slane %v864_v46, 2 }
 0x127   : > { %5925 = vst [vmem:[#allocation40_spill] sm:$0xff] %v4298_v41  ;;  %1745 = vrot.lane.b32.xlu1 %v1740_v16, %s3620_s12  ;;  %v1766_v41 = vstv %s4239_s9  ;;  %v898_v16 = vmul.f32 %v4164_v17, %v897_v59  ;;  %v888_v26 = vrot.slane %v882_v50, 2  ;;  %v890_v8 = vrot.slane %v883_v35, 2  ;;  %s4336_s9 = sld [smem:[#allocation2 + $0x5e]] }
 0x128   : > { %1743 = vrot.lane.b32.xlu0 %v1739_v40, %s3620_s12  ;;  %v856_v40 = vrot.slane %v848_v52, 2  ;;  %v1768_v17 = vmul.f32 %v4212_v1, %v1766_v41  ;;  %v1767_v3 = vmul.f32 %v4224_v32, %v1766_v41  ;;  %v1780_v45 = vstv %s4285_s13  ;;  %s4352_s13 = sld [smem:[#allocation2 + $0x75]] }
 0x129   : > { %v4317_v5 = vpop.permute.xlu1 %1033  ;;  %v887_v52 = vrot.slane %v881_v24, 2  ;;  %v905_v13 = vrot.slane %v899_v48, 2  ;;  %v907_v59 = vrot.slane %v900_v15, 2  ;;  %v904_v6 = vrot.slane %v898_v16, 2 }
 0x12a   : > { %5926 = vst [vmem:[#allocation41_spill] sm:$0xff] %v4317_v5  ;;  %v4321_v10 = vpop.permute.xlu0 %1031  ;;  %v4339_v35 = vsel %vm615_vm0, %v668_v25, %v670_v55  ;;  %v4342_v50 = vsel %vm615_vm0, %v667_v63, %v668_v25  ;;  %v4345_v41 = vsel %vm852_vm1, %v854_v56, %v856_v40  ;;  %v4348_v24 = vsel %vm852_vm1, %v853_v51, %v854_v56 }
 0x12b   : > { %5927 = vst [vmem:[#allocation42_spill] sm:$0xff] %v4321_v10  ;;  %1759 = vrot.lane.b32.xlu1 %v1754_v57, %s3620_s12  ;;  %v4355_v15 = vsel %vm852_vm1, %v871_v33, %v873_v44  ;;  %v1782_v63 = vmul.f32 %v4212_v1, %v1780_v45  ;;  %v1087_v25 = vstv %s4293_s14  ;;  %v1794_v55 = vstv %s4306_s22  ;;  %v4383_v44 = vld [vmem:[%s3774_s8 + $0x10] sm:$0x3]  ;;  %s4395_s14 = sld [smem:[#allocation2 + $0x82]] }
 0x12c   : > { %1757 = vrot.lane.b32.xlu0 %v1753_v47, %s3620_s12  ;;  %v4362_v46 = vsel %vm852_vm1, %v870_v22, %v871_v33  ;;  %v4365_v51 = vsel %vm852_vm1, %v888_v26, %v890_v8  ;;  %v1781_v56 = vmul.f32 %v4224_v32, %v1780_v45  ;;  %v1904_v47 = vstv %s4312_s24  ;;  %s4419_s22 = sld [smem:[#allocation2 + $0xc]] }
 0x12d   : > { %v4334_v57 = vpop.permute.xlu1 %1054  ;;  %v4371_v48 = vsel %vm852_vm1, %v887_v52, %v888_v26  ;;  %v4374_v16 = vsel %vm852_vm1, %v905_v13, %v907_v59  ;;  %v4377_v40 = vsel %vm852_vm1, %v904_v6, %v905_v13  ;;  %v1093_v33 = vstv %s4300_s21  ;;  %s4402_s21 = sld [smem:[#allocation2 + $0x17]] }
 0x12e   : > { %5928 = vst [vmem:[#allocation43_spill] sm:$0xff] %v4334_v57  ;;  %v4350_v14 = vpop.permute.xlu0 %1052  ;;  %5930 = vst [vmem:[#allocation45_spill] sm:$0xff] %v4374_v16  ;;  %v4388_v8 = vmul.f32 %v3927_v12, %v1087_v25  ;;  %v4391_v26 = vmul.f32 %v3931_v61, %v1087_v25  ;;  %v1808_v45 = vstv %s4323_s10  ;;  %v1795_v52 = vmul.f32 %v4224_v32, %v1794_v55  ;;  %s4438_s24 = sld [smem:[#allocation2 + $0x3b]] }
 0x12f   : > { %5929 = vst [vmem:[#allocation44_spill] sm:$0xff] %v4350_v14  ;;  %1773 = vrot.lane.b32.xlu1 %v1768_v17, %s3620_s12  ;;  %5931 = vst [vmem:[#allocation46_spill] sm:$0xff] %v4377_v40  ;;  %v1099_v13 = vstv %s4319_s27  ;;  %v1822_v59 = vstv %s4327_s11  ;;  %v1906_v6 = vmul.f32 %v4212_v1, %v1904_v47  ;;  %v4406_v25 = vmul.f32 %v3927_v12, %v1093_v33  ;;  %s4467_s27 = sld [smem:[#allocation2 + $0x30]] }
 0x130   : > { %1771 = vrot.lane.b32.xlu0 %v1767_v3, %s3620_s12  ;;  %5934 = vst [vmem:[#allocation49_spill] sm:$0xff] %v4388_v8  ;;  %5935 = vst [vmem:[#allocation50_spill] sm:$0xff] %v4391_v26  ;;  %v1796_v3 = vmul.f32 %v4212_v1, %v1794_v55  ;;  %v1907_v14 = vmul.f32 %v4383_v44, %v1904_v47  ;;  %v1905_v57 = vmul.f32 %v4224_v32, %v1904_v47  ;;  %s4484_s10 = sld [smem:[#allocation2 + $0x5f]] }
 0x131   : > { %v4379_v22 = vpop.permute.xlu1 %1075  ;;  %5936 = vst [vmem:[#allocation51_spill] sm:$0xff] %v4406_v25  ;;  %v1925_v26 = vstv %s4332_s5  ;;  %v4414_v55 = vmul.f32 %v3931_v61, %v1093_v33  ;;  %v1810_v10 = vmul.f32 %v4212_v1, %v1808_v45  ;;  %v1809_v5 = vmul.f32 %v4224_v32, %v1808_v45  ;;  %s4502_s11 = sld [smem:[#allocation2 + $0x54]] }
 0x132   : > { %5932 = vst [vmem:[#allocation47_spill] sm:$0xff] %v4379_v22  ;;  %v4385_v17 = vpop.permute.xlu0 %1073  ;;  %v1946_v8 = vstv %s4336_s9  ;;  %v4424_v25 = vmul.f32 %v3927_v12, %v1099_v13  ;;  %v4427_v47 = vmul.f32 %v3931_v61, %v1099_v13  ;;  %v1912_v33 = vrot.slane %v1906_v6, 1  ;;  %s4515_s5 = sld [smem:[#allocation2 + $0x83]] }
 0x133   : > { %5933 = vst [vmem:[#allocation48_spill] sm:$0xff] %v4385_v17  ;;  %1787 = vrot.lane.b32.xlu1 %v1782_v63, %s3621_s6  ;;  %5938 = vst [vmem:[#allocation53_spill] sm:$0xff] %v4414_v55  ;;  %v1105_v17 = vstv %s4352_s13  ;;  %v1927_v55 = vmul.f32 %v4212_v1, %v1925_v26  ;;  %v1928_v45 = vmul.f32 %v4383_v44, %v1925_v26  ;;  %s4558_s9 = sld [smem:[#allocation2 + $0x78]] }
 0x134   : > { %1785 = vrot.lane.b32.xlu0 %v1781_v56, %s3621_s6  ;;  %5940 = vst [vmem:[#allocation55_spill] sm:$0xff] %v4424_v25  ;;  %5941 = vst [vmem:[#allocation56_spill] sm:$0xff] %v4427_v47  ;;  %v1926_v22 = vmul.f32 %v4224_v32, %v1925_v26  ;;  %v1911_v25 = vrot.slane %v1905_v57, 1  ;;  %v1948_v13 = vmul.f32 %v4212_v1, %v1946_v8  ;;  %s4577_s13 = sld [smem:[#allocation2 + $0x19]] }
 0x135   : > { %v4411_v63 = vpop.permute.xlu1 %1118  ;;  %v1949_v47 = vmul.f32 %v4383_v44, %v1946_v8  ;;  %v1823_v26 = vmul.f32 %v4224_v32, %v1822_v59  ;;  %v4448_v40 = vmul.f32 %v3927_v12, %v1105_v17  ;;  %v4451_v57 = vmul.f32 %v3931_v61, %v1105_v17 }
 0x136   : > { %5937 = vst [vmem:[#allocation52_spill] sm:$0xff] %v4411_v63  ;;  %v4421_v56 = vpop.permute.xlu0 %1116  ;;  %v1824_v63 = vmul.f32 %v4212_v1, %v1822_v59  ;;  %v1933_v59 = vrot.slane %v1927_v55, 1  ;;  %v1932_v17 = vrot.slane %v1926_v22, 1  ;;  %v1223_v22 = vstv %s4419_s22  ;;  %s4622_s22 = sld [smem:[#allocation2 + $0x85]] }
 0x137   : > { %5939 = vst [vmem:[#allocation54_spill] sm:$0xff] %v4421_v56  ;;  %1801 = vrot.lane.b32.xlu1 %v1796_v3, %s3621_s6  ;;  %v1914_v56 = vrot.slane %v1907_v14, 1  ;;  %v4442_v3 = vadd.f32 %v3957_v18, %v4167_v20  ;;  %5943 = vst [vmem:[#allocation58_spill] sm:$0xff] %v4448_v40  ;;  %v4455_v14 = vadd.f32 %v3962_v21, %v4189_v54  ;;  %v1935_v40 = vrot.slane %v1928_v45, 1 }
 0x138   : > { %1799 = vrot.lane.b32.xlu0 %v1795_v52, %s3621_s6  ;;  %5944 = vst [vmem:[#allocation59_spill] sm:$0xff] %v4451_v57  ;;  %v4459_v52 = vadd.f32 %v3970_v27, %v4174_v29  ;;  %v1947_v20 = vmul.f32 %v4224_v32, %v1946_v8  ;;  %v1988_v57 = vstv %s4402_s21  ;;  %v1913_v27 = vsel %vm615_vm0, %v1911_v25, %v1912_v33  ;;  %s4618_s21 = sld [smem:[#allocation2 + $0x61]] }
 0x139   : > { %v4444_v6 = vpop.permute.xlu1 %1132  ;;  %v1915_v21 = vsel %vm615_vm0, %v1912_v33, %v1914_v56  ;;  %v1954_v29 = vrot.slane %v1948_v13, 1  ;;  %v1956_v54 = vrot.slane %v1949_v47, 1  ;;  %v508_v45 = vadd.f32 %v3973_v30, %v4199_v2 }
 0x13a   : > { %5942 = vst [vmem:[#allocation57_spill] sm:$0xff] %v4444_v6  ;;  %v4461_v18 = vpop.permute.xlu0 %1130  ;;  %v1967_v6 = vstv %s4395_s14  ;;  %v1953_v56 = vrot.slane %v1947_v20, 1  ;;  %v1990_v25 = vmul.f32 %v4212_v1, %v1988_v57  ;;  %v1991_v47 = vmul.f32 %v4383_v44, %v1988_v57  ;;  %s4600_s14 = sld [smem:[#allocation2 + $0x3d]] }
 0x13b   : > { %5945 = vst [vmem:[#allocation60_spill] sm:$0xff] %v4461_v18  ;;  %1815 = vrot.lane.b32.xlu1 %v1810_v10, %s3621_s6  ;;  %v1969_v8 = vmul.f32 %v4212_v1, %v1967_v6  ;;  %v1970_v10 = vmul.f32 %v4383_v44, %v1967_v6  ;;  %v1968_v55 = vmul.f32 %v4224_v32, %v1967_v6 }
 0x13c   : > { %1813 = vrot.lane.b32.xlu0 %v1809_v5, %s3621_s6  ;;  %v4488_v33 = vadd.f32 %v3981_v39, %v4234_v38  ;;  %v1936_v13 = vsel %vm615_vm0, %v1933_v59, %v1935_v40  ;;  %v1934_v6 = vsel %vm615_vm0, %v1932_v17, %v1933_v59  ;;  %v1989_v30 = vmul.f32 %v4224_v32, %v1988_v57 }
 0x13d   : > { %v4472_v18 = vpop.permute.xlu1 %1146  ;;  %v1225_v2 = vmul.f32 %v3927_v12, %v1223_v22  ;;  %v1226_v20 = vmul.f32 %v3960_v19, %v1223_v22  ;;  %v1957_v38 = vsel %vm615_vm0, %v1954_v29, %v1956_v54  ;;  %v1977_v40 = vrot.slane %v1970_v10, 1 }
 0x13e   : > { %5946 = vst [vmem:[#allocation61_spill] sm:$0xff] %v4472_v18  ;;  %v4480_v5 = vpop.permute.xlu0 %1144  ;;  %v2009_v18 = vstv %s4438_s24  ;;  %v1974_v16 = vrot.slane %v1968_v55, 1  ;;  %v1955_v57 = vsel %vm615_vm0, %v1953_v56, %v1954_v29  ;;  %v1998_v59 = vrot.slane %v1991_v47, 1  ;;  %s4675_s24 = sld [smem:[#allocation2 + $0x1a]] }
 0x13f   : > { %5947 = vst [vmem:[#allocation62_spill] sm:$0xff] %v4480_v5  ;;  %1829 = vrot.lane.b32.xlu1 %v1824_v63, %s3621_s6  ;;  %v1224_v5 = vmul.f32 %v3931_v61, %v1223_v22  ;;  %v1975_v63 = vrot.slane %v1969_v8, 1  ;;  %v1996_v61 = vrot.slane %v1990_v25, 1  ;;  %v1995_v17 = vrot.slane %v1989_v30, 1 }
 0x140   : > { %1827 = vrot.lane.b32.xlu0 %v1823_v26, %s3621_s6  ;;  %v4506_v26 = vadd.f32 %v3984_v42, %v4242_v62  ;;  %v2011_v54 = vmul.f32 %v4212_v1, %v2009_v18  ;;  %v2012_v8 = vmul.f32 %v4383_v44, %v2009_v18  ;;  %v1240_v10 = vstv %s4467_s27  ;;  %s4680_s27 = sld [smem:[#allocation2 + $0xf]] }
 0x141   : > { %v4499_v39 = vpop.permute.xlu1 %1160  ;;  %v1231_v42 = vrot.slane %v1225_v2, 1  ;;  %v1233_v62 = vrot.slane %v1226_v20, 1  ;;  %v1230_v55 = vrot.slane %v1224_v5, 1  ;;  %v2010_v29 = vmul.f32 %v4224_v32, %v2009_v18  ;;  %v4535_v5 = vld [vmem:[%s3772_s7 + $0x18] sm:$0xff] }
 0x142   : > { %v4508_v12 = vpop.permute.xlu0 %1158  ;;  %v4525_v22 = vadd.f32 %v3995_v53, %v4256_v31  ;;  %v1978_v25 = vsel %vm615_vm0, %v1975_v63, %v1977_v40  ;;  %v1976_v47 = vsel %vm615_vm0, %v1974_v16, %v1975_v63  ;;  %v2030_v53 = vstv %s4484_s10  ;;  %s4694_s10 = sld [smem:[#allocation2 + $0x3e]] }
 0x143   : > { %1918 = vrot.lane.b32.xlu1 %v1915_v21, %s3620_s12  ;;  %v4521_v21 = vadd.f32 %v3991_v49, %v4245_v60  ;;  %v4538_v49 = vmul.f32 %v4535_v5, %v1240_v10  ;;  %v1243_v60 = vmul.f32 %v3960_v19, %v1240_v10  ;;  %v563_v31 = vadd.f32 %v4006_v0, %v4455_v14 }
 0x144   : > { %1916 = vrot.lane.b32.xlu0 %v1913_v27, %s3620_s12  ;;  %v564_v27 = vadd.f32 %v4002_v58, %v508_v45  ;;  %v4546_v16 = vsel %vm615_vm0, %v1996_v61, %v1998_v59  ;;  %v2017_v58 = vrot.slane %v2011_v54, 1  ;;  %v2019_v18 = vrot.slane %v2012_v8, 1 }
 0x145   : > { %v4527_v56 = vpop.permute.xlu1 %1174  ;;  %v4550_v45 = vsel %vm615_vm0, %v1995_v17, %v1996_v61  ;;  %v4553_v2 = vsel %vm615_vm0, %v1231_v42, %v1233_v62  ;;  %v4556_v19 = vsel %vm615_vm0, %v1230_v55, %v1231_v42  ;;  %v2016_v0 = vrot.slane %v2010_v29, 1  ;;  %v4592_v55 = vld [vmem:[%s3774_s8 + $0x8] sm:$0x3] }
 0x146   : > { %v4532_v30 = vpop.permute.xlu0 %1172  ;;  %v2033_v63 = vmul.f32 %v4383_v44, %v2030_v53  ;;  %v1257_v40 = vstv %s4502_s11  ;;  %v578_v61 = vadd.f32 %v4013_v7, %v4459_v52  ;;  %v4572_v59 = vadd.f32 %v4259_v37, %v564_v27  ;;  %s4713_s11 = sld [smem:[#allocation2 + $0x33]] }
 0x147   : > { %1939 = vrot.lane.b32.xlu1 %v1936_v13, %s3620_s12  ;;  %v4563_v13 = vld [vmem:[%s3772_s7 + $0x10] sm:$0xff]  ;;  %v1248_v54 = vrot.slane %v4538_v49, 1  ;;  %v1250_v8 = vrot.slane %v1243_v60, 1  ;;  %v2020_v42 = vsel %vm615_vm0, %v2017_v58, %v2019_v18  ;;  %v2031_v62 = vmul.f32 %v4224_v32, %v2030_v53 }
 0x148   : > { %1937 = vrot.lane.b32.xlu0 %v1934_v6, %s3620_s12  ;;  %v1241_v20 = vmul.f32 %v4563_v13, %v1240_v10  ;;  %v2032_v6 = vmul.f32 %v4212_v1, %v2030_v53  ;;  %v4580_v10 = vadd.f32 %v4262_v9, %v563_v31  ;;  %v2051_v7 = vstv %s4515_s5  ;;  %s4742_s5 = sld [smem:[#allocation2 + $0x62]] }
 0x149   : > { %v4560_v14 = vpop.permute.xlu1 %1188  ;;  %v4588_v37 = vsel %vm615_vm0, %v2016_v0, %v2017_v58  ;;  %v1259_v52 = vmul.f32 %v4535_v5, %v1257_v40  ;;  %v1260_v29 = vmul.f32 %v4592_v55, %v1257_v40  ;;  %v1258_v9 = vmul.f32 %v4563_v13, %v1257_v40 }
 0x14a   : > { %v4574_v17 = vpop.permute.xlu0 %1186  ;;  %v1247_v49 = vrot.slane %v1241_v20, 1  ;;  %v2038_v60 = vrot.slane %v2032_v6, 1  ;;  %v2040_v53 = vrot.slane %v2033_v63, 1  ;;  %v4608_v58 = vsel %vm615_vm0, %v1248_v54, %v1250_v8 }
 0x14b   : > { %1960 = vrot.lane.b32.xlu1 %v1957_v38, %s3620_s12  ;;  %v577_v38 = vadd.f32 %v4017_v11, %v4442_v3  ;;  %5950 = vst [vmem:[#allocation65_spill] sm:$0xff] %v4608_v58  ;;  %v2053_v18 = vmul.f32 %v4212_v1, %v2051_v7  ;;  %v2054_v11 = vmul.f32 %v4383_v44, %v2051_v7  ;;  %v2037_v20 = vrot.slane %v2031_v62, 1 }
 0x14c   : > { %1958 = vrot.lane.b32.xlu0 %v1955_v57, %s3620_s12  ;;  %v4603_v57 = vadd.f32 %v4265_v34, %v578_v61  ;;  %v592_v3 = vadd.f32 %v4024_v23, %v4488_v33  ;;  %v591_v0 = vadd.f32 %v4028_v28, %v4506_v26  ;;  %v2052_v34 = vmul.f32 %v4224_v32, %v2051_v7 }
 0x14d   : > { %v4598_v27 = vpop.permute.xlu1 %1202  ;;  %v1265_v6 = vrot.slane %v1259_v52, 1  ;;  %v1267_v63 = vrot.slane %v1260_v29, 1  ;;  %v1264_v40 = vrot.slane %v1258_v9, 1  ;;  %v1274_v61 = vstv %s4558_s9  ;;  %v5952_v29 = vld [vmem:[#allocation37_spill] sm:$0xff]  ;;  %s4769_s9 = sld [smem:[#allocation2 + $0x57]] }
 0x14e   : > { %5948 = vst [vmem:[#allocation63_spill] sm:$0xff] %v4598_v27  ;;  %v4605_v31 = vpop.permute.xlu0 %1200  ;;  %v606_v23 = vadd.f32 %v4035_v36, %v4521_v21  ;;  %v4627_v28 = vadd.f32 %v4270_v4, %v577_v38  ;;  %v4632_v26 = vsel %vm615_vm0, %v1247_v49, %v1248_v54  ;;  %v2059_v62 = vrot.slane %v2053_v18, 1 }
 0x14f   : > { %5949 = vst [vmem:[#allocation64_spill] sm:$0xff] %v4605_v31  ;;  %1981 = vrot.lane.b32.xlu1 %v1978_v25, %s3620_s12  ;;  %5951 = vst [vmem:[#allocation66_spill] sm:$0xff] %v4632_v26  ;;  %v2041_v25 = vsel %vm615_vm0, %v2038_v60, %v2040_v53  ;;  %v2061_v7 = vrot.slane %v2054_v11, 1  ;;  %v2140_v52 = vstv %s4577_s13  ;;  %v2039_v36 = vsel %vm615_vm0, %v2037_v20, %v2038_v60  ;;  %s4779_s13 = sld [smem:[#allocation2 + $0x86]] }
 0x150   : > { %1979 = vrot.lane.b32.xlu0 %v1976_v47, %s3620_s12  ;;  %v605_v47 = vadd.f32 %v4039_v43, %v4525_v22  ;;  %v2058_v4 = vrot.slane %v2052_v34, 1  ;;  %v1276_v21 = vmul.f32 %v4535_v5, %v1274_v61  ;;  %v1277_v54 = vmul.f32 %v4592_v55, %v1274_v61  ;;  %v5953_v43 = vld [vmem:[#allocation38_spill] sm:$0xff] }
 0x151   : > { %v4629_v33 = vpop.permute.xlu1 %1216  ;;  %v4646_v9 = vadd.f32 %v5952_v29, %v592_v3  ;;  %v4649_v22 = vadd.f32 %v5953_v43, %v591_v0  ;;  %v4654_v38 = vsel %vm615_vm0, %v1265_v6, %v1267_v63  ;;  %v1275_v60 = vmul.f32 %v4563_v13, %v1274_v61 }
 0x152   : > { %v4637_v8 = vpop.permute.xlu0 %1214  ;;  %5954 = vst [vmem:[#allocation37_spill] sm:$0xff] %v4654_v38  ;;  %v2142_v53 = vmul.f32 %v4212_v1, %v2140_v52  ;;  %v2143_v18 = vmul.f32 %v4383_v44, %v2140_v52  ;;  %v2161_v11 = vstv %s4600_s14  ;;  %v4666_v3 = vadd.f32 %v4339_v35, %v606_v23  ;;  %s4785_s14 = sld [smem:[#allocation2 + $0x7b]] }
 0x153   : > { %2002 = vrot.lane.b32.xlu1 %v4546_v16, %s3621_s6  ;;  %v4657_v16 = vsel %vm615_vm0, %v1264_v40, %v1265_v6  ;;  %v2062_v20 = vsel %vm615_vm0, %v2059_v62, %v2061_v7  ;;  %v2141_v34 = vmul.f32 %v4224_v32, %v2140_v52  ;;  %v2060_v6 = vsel %vm615_vm0, %v2058_v4, %v2059_v62  ;;  %v5957_v7 = vld [vmem:[#allocation13_spill] sm:$0xff] }
 0x154   : > { %2000 = vrot.lane.b32.xlu0 %v4550_v45, %s3621_s6  ;;  %5955 = vst [vmem:[#allocation38_spill] sm:$0xff] %v4657_v16  ;;  %v4669_v45 = vadd.f32 %v4342_v50, %v605_v47  ;;  %v1282_v63 = vrot.slane %v1276_v21, 1  ;;  %v1284_v40 = vrot.slane %v1277_v54, 1  ;;  %v2182_v35 = vstv %s4618_s21  ;;  %s4842_s21 = sld [smem:[#allocation2 + $0x1c]] }
 0x155   : > { %v4659_v49 = vpop.permute.xlu1 %1305  ;;  %v2163_v50 = vmul.f32 %v4212_v1, %v2161_v11  ;;  %v2164_v61 = vmul.f32 %v4383_v44, %v2161_v11  ;;  %v2162_v23 = vmul.f32 %v4224_v32, %v2161_v11  ;;  %v2203_v47 = vstv %s4622_s22  ;;  %s4850_s22 = sld [smem:[#allocation2 + $0x40]] }
 0x156   : > { %v4671_v0 = vpop.permute.xlu0 %1303  ;;  %v1281_v52 = vrot.slane %v1275_v60, 1  ;;  %v2148_v4 = vrot.slane %v2142_v53, 2  ;;  %v2150_v21 = vrot.slane %v2143_v18, 2  ;;  %v2147_v43 = vrot.slane %v2141_v34, 2 }
 0x157   : > { %5956 = vst [vmem:[#allocation67_spill] sm:$0xff] %v4671_v0  ;;  %2023 = vrot.lane.b32.xlu1 %v2020_v42, %s3621_s6  ;;  %v4690_v42 = vadd.f32 %v5957_v7, %v4572_v59  ;;  %v2184_v11 = vmul.f32 %v4212_v1, %v2182_v35  ;;  %v2185_v16 = vmul.f32 %v4383_v44, %v2182_v35  ;;  %v2171_v34 = vrot.slane %v2164_v61, 2 }
 0x158   : > { %2021 = vrot.lane.b32.xlu0 %v4588_v37, %s3621_s6  ;;  %v5959_v37 = vld [vmem:[#allocation14_spill] sm:$0xff]  ;;  %v4706_v59 = vsel %vm615_vm0, %v1282_v63, %v1284_v40  ;;  %v2183_v60 = vmul.f32 %v4224_v32, %v2182_v35  ;;  %v2205_v53 = vmul.f32 %v4212_v1, %v2203_v47  ;;  %v2206_v18 = vmul.f32 %v4383_v44, %v2203_v47  ;;  %v5962_v35 = vld [vmem:[#allocation16_spill] sm:$0xff] }
 0x159   : > { %v4692_v62 = vpop.permute.xlu1 %1326  ;;  %v4698_v54 = vadd.f32 %v5959_v37, %v4580_v10  ;;  %v2169_v10 = vrot.slane %v2163_v50, 2  ;;  %v2168_v7 = vrot.slane %v2162_v23, 2  ;;  %v2204_v37 = vmul.f32 %v4224_v32, %v2203_v47 }
 0x15a   : > { %5958 = vst [vmem:[#allocation13_spill] sm:$0xff] %v4692_v62  ;;  %v4700_v29 = vpop.permute.xlu0 %1324  ;;  %v4721_v38 = vadd.f32 %v5962_v35, %v4627_v28  ;;  %v2151_v50 = vsel %vm852_vm1, %v2148_v4, %v2150_v21  ;;  %v2149_v23 = vsel %vm852_vm1, %v2147_v43, %v2148_v4  ;;  %v2190_v47 = vrot.slane %v2184_v11, 2 }
 0x15b   : > { %5960 = vst [vmem:[#allocation14_spill] sm:$0xff] %v4700_v29  ;;  %2044 = vrot.lane.b32.xlu1 %v2041_v25, %s3621_s6  ;;  %v5961_v25 = vld [vmem:[#allocation15_spill] sm:$0xff]  ;;  %v2192_v62 = vrot.slane %v2185_v16, 2  ;;  %v2224_v26 = vstv %s4675_s24  ;;  %v2211_v28 = vrot.slane %v2205_v53, 2  ;;  %v1459_v35 = vstv %s4680_s27  ;;  %s4862_s24 = sld [smem:[#allocation2 + $0x12]] }
 0x15c   : > { %2042 = vrot.lane.b32.xlu0 %v2039_v36, %s3621_s6  ;;  %v4717_v40 = vadd.f32 %v5961_v25, %v4603_v57  ;;  %v4726_v36 = vsel %vm615_vm0, %v1281_v52, %v1282_v63  ;;  %v2189_v57 = vrot.slane %v2183_v60, 2  ;;  %v2213_v25 = vrot.slane %v2206_v18, 2  ;;  %s4868_s27 = sld [smem:[#allocation2 + $0x64]] }
 0x15d   : > { %v4723_v29 = vpop.permute.xlu1 %1347  ;;  %v2172_v52 = vsel %vm852_vm1, %v2169_v10, %v2171_v34  ;;  %v2170_v4 = vsel %vm852_vm1, %v2168_v7, %v2169_v10  ;;  %v2210_v21 = vrot.slane %v2204_v37, 2  ;;  %v2227_v43 = vmul.f32 %v4383_v44, %v2224_v26  ;;  %v5967_v34 = vld [vmem:[#allocation19_spill] sm:$0xff] }
 0x15e   : > { %5963 = vst [vmem:[#allocation15_spill] sm:$0xff] %v4723_v29  ;;  %v4729_v61 = vpop.permute.xlu0 %1345  ;;  %v5965_v29 = vld [vmem:[#allocation17_spill] sm:$0xff]  ;;  %v2225_v11 = vmul.f32 %v4224_v32, %v2224_v26  ;;  %v2245_v60 = vstv %s4694_s10  ;;  %v1461_v53 = vmul.f32 %v4535_v5, %v1459_v35  ;;  %v1462_v18 = vmul.f32 %v4592_v55, %v1459_v35  ;;  %s4876_s10 = sld [smem:[#allocation2 + $0x88]] }
 0x15f   : > { %5964 = vst [vmem:[#allocation16_spill] sm:$0xff] %v4729_v61  ;;  %2065 = vrot.lane.b32.xlu1 %v2062_v20, %s3621_s6  ;;  %v4737_v63 = vadd.f32 %v5965_v29, %v4646_v9  ;;  %v2226_v20 = vmul.f32 %v4212_v1, %v2224_v26  ;;  %v5966_v9 = vld [vmem:[#allocation18_spill] sm:$0xff]  ;;  %v1460_v10 = vmul.f32 %v4563_v13, %v1459_v35 }
 0x160   : > { %2063 = vrot.lane.b32.xlu0 %v2060_v6, %s3621_s6  ;;  %v4752_v6 = vadd.f32 %v5966_v9, %v4649_v22  ;;  %v4761_v7 = vadd.f32 %v5967_v34, %v4666_v3  ;;  %v2193_v26 = vsel %vm852_vm1, %v2190_v47, %v2192_v62  ;;  %v2191_v37 = vsel %vm852_vm1, %v2189_v57, %v2190_v47 }
 0x161   : > { %v4744_v16 = vpop.permute.xlu1 %1368  ;;  %v4767_v22 = vsel %vm852_vm1, %v2211_v28, %v2213_v25  ;;  %v2247_v9 = vmul.f32 %v4212_v1, %v2245_v60  ;;  %v2248_v35 = vmul.f32 %v4383_v44, %v2245_v60  ;;  %v2246_v3 = vmul.f32 %v4224_v32, %v2245_v60  ;;  %v5969_v25 = vld [vmem:[#allocation21_spill] sm:$0xff]  ;;  %v5971_v60 = vld [vmem:[#allocation20_spill] sm:$0xff] }
 0x162   : > { %v4754_v29 = vpop.permute.xlu0 %1366  ;;  %v1476_v34 = vstv %s4713_s11  ;;  %v2212_v62 = vsel %vm852_vm1, %v2210_v21, %v2211_v28  ;;  %v2234_v47 = vrot.slane %v2227_v43, 2  ;;  %v2231_v57 = vrot.slane %v2225_v11, 2  ;;  %v5972_v28 = vld [vmem:[#allocation22_spill] sm:$0xff]  ;;  %s4881_s11 = sld [smem:[#allocation2 + $0x1d]] }
 0x163   : > { %2154 = vrot.lane.b32.xlu1 %v2151_v50, %s3620_s12  ;;  %v2232_v50 = vrot.slane %v2226_v20, 2  ;;  %v1467_v58 = vrot.slane %v1461_v53, 2  ;;  %v1469_v27 = vrot.slane %v1462_v18, 2  ;;  %v1466_v0 = vrot.slane %v1460_v10, 2 }
 0x164   : > { %2152 = vrot.lane.b32.xlu0 %v2149_v23, %s3620_s12  ;;  %v780_v23 = vadd.f32 %v5969_v25, %v4690_v42  ;;  %v779_v21 = vadd.f32 %v5972_v28, %v4698_v54  ;;  %v4795_v20 = vmul.f32 %v4535_v5, %v1476_v34  ;;  %v1479_v42 = vmul.f32 %v4592_v55, %v1476_v34  ;;  %v5975_v28 = vld [vmem:[#allocation24_spill] sm:$0xff] }
 0x165   : > { %v4776_v61 = vpop.permute.xlu1 %1389  ;;  %v2253_v43 = vrot.slane %v2247_v9, 2  ;;  %v2255_v11 = vrot.slane %v2248_v35, 2  ;;  %v2252_v53 = vrot.slane %v2246_v3, 2  ;;  %v2266_v18 = vstv %s4742_s5  ;;  %s4894_s5 = sld [smem:[#allocation2 + $0x41]] }
 0x166   : > { %5968 = vst [vmem:[#allocation17_spill] sm:$0xff] %v4776_v61  ;;  %v4783_v31 = vpop.permute.xlu0 %1387  ;;  %v4789_v61 = vadd.f32 %v5971_v60, %v4669_v45  ;;  %v5973_v45 = vld [vmem:[#allocation23_spill] sm:$0xff]  ;;  %v2235_v54 = vsel %vm852_vm1, %v2232_v50, %v2234_v47  ;;  %v1477_v60 = vmul.f32 %v4563_v13, %v1476_v34  ;;  %v4815_v35 = vsel %vm852_vm1, %v1467_v58, %v1469_v27 }
 0x167   : > { %5970 = vst [vmem:[#allocation18_spill] sm:$0xff] %v4783_v31  ;;  %2175 = vrot.lane.b32.xlu1 %v2172_v52, %s3620_s12  ;;  %v801_v10 = vadd.f32 %v5973_v45, %v4717_v40  ;;  %v2233_v52 = vsel %vm852_vm1, %v2231_v57, %v2232_v50  ;;  %v800_v31 = vadd.f32 %v5975_v28, %v4721_v38  ;;  %5977 = vst [vmem:[#allocation20_spill] sm:$0xff] %v4815_v35 }
 0x168   : > { %2173 = vrot.lane.b32.xlu0 %v2170_v4, %s3620_s12  ;;  %v4810_v4 = vadd.f32 %v4345_v41, %v780_v23  ;;  %v4818_v40 = vsel %vm852_vm1, %v1466_v0, %v1467_v58  ;;  %v1484_v3 = vrot.slane %v4795_v20, 2  ;;  %v1486_v34 = vrot.slane %v1479_v42, 2 }
 0x169   : > { %v4802_v25 = vpop.permute.xlu1 %1410  ;;  %5978 = vst [vmem:[#allocation22_spill] sm:$0xff] %v4818_v40  ;;  %v2268_v50 = vmul.f32 %v4212_v1, %v2266_v18  ;;  %v1493_v38 = vstv %s4769_s9  ;;  %v4825_v41 = vadd.f32 %v4348_v24, %v779_v21  ;;  %v4829_v27 = vsel %vm852_vm1, %v2253_v43, %v2255_v11  ;;  %s4898_s9 = sld [smem:[#allocation2 + $0x1f]] }
 0x16a   : > { %5974 = vst [vmem:[#allocation19_spill] sm:$0xff] %v4802_v25  ;;  %v4812_v9 = vpop.permute.xlu0 %1408  ;;  %v4832_v58 = vsel %vm852_vm1, %v2252_v53, %v2253_v43  ;;  %v2269_v0 = vmul.f32 %v4383_v44, %v2266_v18  ;;  %v1483_v57 = vrot.slane %v1477_v60, 2  ;;  %v2267_v23 = vmul.f32 %v4224_v32, %v2266_v18 }
 0x16b   : > { %5976 = vst [vmem:[#allocation21_spill] sm:$0xff] %v4812_v9  ;;  %2196 = vrot.lane.b32.xlu1 %v2193_v26, %s3620_s12  ;;  %v4836_v26 = vadd.f32 %v4355_v15, %v801_v10  ;;  %v2287_v24 = vstv %s4779_s13  ;;  %v1495_v21 = vmul.f32 %v4535_v5, %v1493_v38  ;;  %v1496_v20 = vmul.f32 %v4592_v55, %v1493_v38  ;;  %v5981_v15 = vld [vmem:[#allocation25_spill] sm:$0xff]  ;;  %s4906_s13 = sld [smem:[#allocation2 + $0x36]] }
 0x16c   : > { %2194 = vrot.lane.b32.xlu0 %v2191_v37, %s3620_s12  ;;  %v1494_v42 = vmul.f32 %v4563_v13, %v1493_v38  ;;  %v1510_v43 = vstv %s4785_s14  ;;  %v822_v11 = vadd.f32 %v5981_v15, %v4737_v63  ;;  %v4855_v53 = vadd.f32 %v4362_v46, %v800_v31  ;;  %v5983_v46 = vld [vmem:[#allocation26_spill] sm:$0xff]  ;;  %s4923_s14 = sld [smem:[#allocation2 + $0x43]] }
 0x16d   : > { %v4838_v47 = vpop.permute.xlu1 %1431  ;;  %v4860_v18 = vsel %vm852_vm1, %v1484_v3, %v1486_v34  ;;  %v2274_v45 = vrot.slane %v2268_v50, 2  ;;  %v2276_v10 = vrot.slane %v2269_v0, 2  ;;  %v2289_v60 = vmul.f32 %v4212_v1, %v2287_v24 }
 0x16e   : > { %5979 = vst [vmem:[#allocation23_spill] sm:$0xff] %v4838_v47  ;;  %v4844_v37 = vpop.permute.xlu0 %1429  ;;  %5982 = vst [vmem:[#allocation25_spill] sm:$0xff] %v4860_v18  ;;  %v2290_v28 = vmul.f32 %v4383_v44, %v2287_v24  ;;  %v2288_v63 = vmul.f32 %v4224_v32, %v2287_v24  ;;  %v821_v31 = vadd.f32 %v5983_v46, %v4752_v6  ;;  %v2273_v34 = vrot.slane %v2267_v23, 2  ;;  %v5984_v6 = vld [vmem:[#allocation27_spill] sm:$0xff]  ;;  %v5985_v23 = vld [vmem:[#allocation28_spill] sm:$0xff] }
 0x16f   : > { %5980 = vst [vmem:[#allocation24_spill] sm:$0xff] %v4844_v37  ;;  %2217 = vrot.lane.b32.xlu1 %v4767_v22, %s3620_s12  ;;  %v1512_v50 = vmul.f32 %v4535_v5, %v1510_v43  ;;  %v1513_v38 = vmul.f32 %v4592_v55, %v1510_v43  ;;  %v1501_v1 = vrot.slane %v1495_v21, 2  ;;  %v1503_v0 = vrot.slane %v1496_v20, 2 }
 0x170   : > { %2215 = vrot.lane.b32.xlu0 %v2212_v62, %s3620_s12  ;;  %v1500_v15 = vrot.slane %v1494_v42, 2  ;;  %v1511_v32 = vmul.f32 %v4563_v13, %v1510_v43  ;;  %v843_v24 = vadd.f32 %v5984_v6, %v4761_v7  ;;  %v842_v46 = vadd.f32 %v5985_v23, %v4789_v61 }
 0x171   : > { %v4872_v22 = vpop.permute.xlu1 %1452  ;;  %v4888_v5 = vadd.f32 %v4365_v51, %v822_v11  ;;  %v4892_v55 = vsel %vm852_vm1, %v1483_v57, %v1484_v3  ;;  %v2277_v13 = vsel %vm852_vm1, %v2274_v45, %v2276_v10  ;;  %v2295_v7 = vrot.slane %v2289_v60, 2  ;;  %v4917_v11 = vld [vmem:[%s3772_s7 + $0x38] sm:$0xff]  ;;  %v4921_v60 = vld [vmem:[%s3772_s7 + $0x30] sm:$0xff] }
 0x172   : > { %v4878_v62 = vpop.permute.xlu0 %1450  ;;  %5986 = vst [vmem:[#allocation26_spill] sm:$0xff] %v4892_v55  ;;  %v2297_v21 = vrot.slane %v2290_v28, 2  ;;  %v2294_v61 = vrot.slane %v2288_v63, 2  ;;  %v4901_v51 = vadd.f32 %v4371_v48, %v821_v31  ;;  %v2275_v3 = vsel %vm852_vm1, %v2273_v34, %v2274_v45  ;;  %v5991_v45 = vld [vmem:[#allocation29_spill] sm:$0xff]  ;;  %v5993_v34 = vld [vmem:[#allocation46_spill] sm:$0xff] }
 0x173   : > { %2238 = vrot.lane.b32.xlu1 %v2235_v54, %s3621_s6  ;;  %v1518_v57 = vrot.slane %v1512_v50, 2  ;;  %v4911_v42 = vsel %vm852_vm1, %v1501_v1, %v1503_v0  ;;  %v4914_v43 = vsel %vm852_vm1, %v1500_v15, %v1501_v1  ;;  %v1517_v48 = vrot.slane %v1511_v32, 2  ;;  %v5992_v63 = vld [vmem:[#allocation45_spill] sm:$0xff]  ;;  %v5994_v1 = vld [vmem:[#allocation30_spill] sm:$0xff] }
 0x174   : > { %2236 = vrot.lane.b32.xlu0 %v2233_v52, %s3621_s6  ;;  %v1520_v52 = vrot.slane %v1513_v38, 2  ;;  %5989 = vst [vmem:[#allocation68_spill] sm:$0xff] %v4911_v42  ;;  %5990 = vst [vmem:[#allocation69_spill] sm:$0xff] %v4914_v43  ;;  %v2337_v10 = vstv %s4842_s21  ;;  %v4927_v28 = vadd.f32 %v5991_v45, %v4810_v4  ;;  %v4930_v31 = vadd.f32 %v5992_v63, %v843_v24  ;;  %s4938_s21 = sld [smem:[#allocation2 + $0x65]]  ;;  %v6000_v63 = vld [vmem:[#allocation32_spill] sm:$0xff]  ;;  %v6005_v55 = vld [vmem:[#allocation33_spill] sm:$0xff] }
 0x175   : > { %v4903_v54 = vpop.permute.xlu1 %1541  ;;  %v4933_v50 = vadd.f32 %v5993_v34, %v842_v46  ;;  %v2351_v38 = vstv %s4850_s22  ;;  %v4942_v0 = vadd.f32 %v5994_v1, %v4825_v41  ;;  %v2298_v4 = vsel %vm852_vm1, %v2295_v7, %v2297_v21  ;;  %s4969_s22 = sld [smem:[#allocation2 + $0x7e]]  ;;  %v5015_v43 = vld [vmem:[%s3774_s8 + $0x18] sm:$0x3] }
 0x176   : > { %5987 = vst [vmem:[#allocation27_spill] sm:$0xff] %v4903_v54  ;;  %v4908_v20 = vpop.permute.xlu0 %1539  ;;  %v2296_v15 = vsel %vm852_vm1, %v2294_v61, %v2295_v7  ;;  %v2365_v32 = vstv %s4868_s27  ;;  %v4954_v6 = vsel %vm852_vm1, %v1518_v57, %v1520_v52  ;;  %v2339_v24 = vmul.f32 %v4917_v11, %v2337_v10  ;;  %v5999_v52 = vld [vmem:[#allocation31_spill] sm:$0xff]  ;;  %s4983_s27 = sld [smem:[#allocation2 + $0x89]] }
 0x177   : > { %5988 = vst [vmem:[#allocation28_spill] sm:$0xff] %v4908_v20  ;;  %2259 = vrot.lane.b32.xlu1 %v4829_v27, %s3621_s6  ;;  %5996 = vst [vmem:[#allocation45_spill] sm:$0xff] %v4954_v6  ;;  %v2338_v41 = vmul.f32 %v4921_v60, %v2337_v10  ;;  %v2379_v23 = vstv %s4876_s10  ;;  %v4965_v7 = vmul.f32 %v4917_v11, %v2351_v38  ;;  %v2393_v21 = vstv %s4881_s11  ;;  %s5050_s10 = sld [smem:[#allocation2 + $0x15]] }
 0x178   : > { %2257 = vrot.lane.b32.xlu0 %v4832_v58, %s3621_s6  ;;  %v4962_v58 = vsel %vm852_vm1, %v1517_v48, %v1518_v57  ;;  %v1700_v61 = vstv %s4862_s24  ;;  %v4973_v45 = vadd.f32 %v5999_v52, %v4836_v26  ;;  %v4977_v10 = vmul.f32 %v4921_v60, %v2351_v38  ;;  %s5017_s24 = sld [smem:[#allocation2 + $0x67]] }
 0x179   : > { %v4951_v27 = vpop.permute.xlu1 %1562  ;;  %5998 = vst [vmem:[#allocation30_spill] sm:$0xff] %v4962_v58  ;;  %v4980_v57 = vmul.f32 %v4917_v11, %v2365_v32  ;;  %v2407_v48 = vstv %s4894_s5  ;;  %v4987_v34 = vadd.f32 %v6000_v63, %v4855_v53  ;;  %v4991_v26 = vmul.f32 %v4921_v60, %v2365_v32  ;;  %v5009_v63 = vld [vmem:[%s3772_s7 + $0x28] sm:$0xff]  ;;  %s5174_s11 = sld [smem:[#allocation2 + $0x20]] }
 0x17a   : > { %5995 = vst [vmem:[#allocation29_spill] sm:$0xff] %v4951_v27  ;;  %v4959_v46 = vpop.permute.xlu0 %1560  ;;  %v2517_v38 = vstv %s4898_s9  ;;  %v5000_v52 = vmul.f32 %v4921_v60, %v2379_v23  ;;  %v5003_v53 = vmul.f32 %v4917_v11, %v2393_v21  ;;  %v5012_v32 = vmul.f32 %v5009_v63, %v1700_v61  ;;  %s5252_s5 = sld [smem:[#allocation2 + $0x44]] }
 0x17b   : > { %5997 = vst [vmem:[#allocation46_spill] sm:$0xff] %v4959_v46  ;;  %2280 = vrot.lane.b32.xlu1 %v2277_v13, %s3621_s6  ;;  %v4994_v13 = vmul.f32 %v4917_v11, %v2379_v23  ;;  %v5022_v23 = vld [vmem:[%s3772_s7 + $0x20] sm:$0xff]  ;;  %v1706_v46 = vstv %s4906_s13  ;;  %v2538_v27 = vstv %s4923_s14  ;;  %v5038_v37 = vmul.f32 %v4921_v60, %v2407_v48  ;;  %s5280_s9 = sld [smem:[#allocation2 + $0x39]] }
 0x17c   : > { %2278 = vrot.lane.b32.xlu0 %v2275_v3, %s3621_s6  ;;  %v5006_v3 = vmul.f32 %v4921_v60, %v2393_v21  ;;  %6002 = vst [vmem:[#allocation32_spill] sm:$0xff] %v5012_v32  ;;  %v5025_v42 = vmul.f32 %v5022_v23, %v1700_v61  ;;  %v5028_v21 = vmul.f32 %v4917_v11, %v2407_v48  ;;  %v6007_v61 = vld [vmem:[#allocation34_spill] sm:$0xff]  ;;  %v1712_v47 = vstv %s4949_s30  ;;  %s5086_s30 = sld [smem:[#allocation2 + $0x8b]] }
 0x17d   : > { %v4997_v1 = vpop.permute.xlu1 %1583  ;;  %v5034_v32 = vadd.f32 %v6005_v55, %v4888_v5  ;;  %6006 = vst [vmem:[#allocation33_spill] sm:$0xff] %v5038_v37  ;;  %v2519_v18 = vmul.f32 %v4917_v11, %v2517_v38  ;;  %v2520_v20 = vmul.f32 %v5015_v43, %v2517_v38  ;;  %v2518_v5 = vmul.f32 %v4921_v60, %v2517_v38  ;;  %s5306_s13 = sld [smem:[#allocation2 + $0x68]] }
 0x17e   : > { %6001 = vst [vmem:[#allocation31_spill] sm:$0xff] %v4997_v1  ;;  %v5019_v1 = vpop.permute.xlu0 %1581  ;;  %6004 = vst [vmem:[#allocation71_spill] sm:$0xff] %v5025_v42  ;;  %v5044_v42 = vadd.f32 %v6007_v61, %v4901_v51  ;;  %v5058_v48 = vmul.f32 %v5022_v23, %v1706_v46  ;;  %v2540_v51 = vmul.f32 %v4917_v11, %v2538_v27  ;;  %v6011_v61 = vld [vmem:[#allocation35_spill] sm:$0xff]  ;;  %v1718_v35 = vstv %s4969_s22  ;;  %s5320_s14 = sld [smem:[#allocation2 + $0x5d]] }
 0x17f   : > { %6003 = vst [vmem:[#allocation70_spill] sm:$0xff] %v5019_v1  ;;  %2301 = vrot.lane.b32.xlu1 %v2298_v4, %s3621_s6  ;;  %v2421_v1 = vstv %s4938_s21  ;;  %v5055_v4 = vmul.f32 %v5009_v63, %v1706_v46  ;;  %v996_v54 = vadd.f32 %v6011_v61, %v4930_v31  ;;  %v6015_v46 = vld [vmem:[#allocation36_spill] sm:$0xff]  ;;  %v2525_v25 = vrot.slane %v2519_v18, 1  ;;  %v6016_v31 = vld [vmem:[#allocation39_spill] sm:$0xff]  ;;  %s5344_s21 = sld [smem:[#allocation2 + $0x8c]] }
 0x180   : > { %2299 = vrot.lane.b32.xlu0 %v2296_v15, %s3621_s6  ;;  %6010 = vst [vmem:[#allocation73_spill] sm:$0xff] %v5058_v48  ;;  %v2541_v15 = vmul.f32 %v5015_v43, %v2538_v27  ;;  %v5067_v38 = vmul.f32 %v4917_v11, %v2421_v1  ;;  %v5070_v9 = vmul.f32 %v4921_v60, %v2421_v1  ;;  %v2527_v1 = vrot.slane %v2520_v20, 1  ;;  %s5366_s22 = sld [smem:[#allocation2 + $0x81]] }
 0x181   : > { %v5052_v55 = vpop.permute.xlu1 %1604  ;;  %6009 = vst [vmem:[#allocation72_spill] sm:$0xff] %v5055_v4  ;;  %v2539_v4 = vmul.f32 %v4921_v60, %v2538_v27  ;;  %v995_v48 = vadd.f32 %v6015_v46, %v4933_v50  ;;  %v1017_v61 = vadd.f32 %v6016_v31, %v4927_v28  ;;  %v2546_v6 = vrot.slane %v2540_v51, 1  ;;  %v6024_v31 = vld [vmem:[#allocation59_spill] sm:$0xff] }
 0x182   : > { %6008 = vst [vmem:[#allocation34_spill] sm:$0xff] %v5052_v55  ;;  %v5064_v40 = vpop.permute.xlu0 %1602  ;;  %6013 = vst [vmem:[#allocation74_spill] sm:$0xff] %v5067_v38  ;;  %v2435_v55 = vstv %s4983_s27  ;;  %v6018_v38 = vld [vmem:[#allocation48_spill] sm:$0xff]  ;;  %v2548_v50 = vrot.slane %v2541_v15, 1  ;;  %v2559_v46 = vstv %s5017_s24  ;;  %v5091_v28 = vmul.f32 %v5009_v63, %v1712_v47  ;;  %s5377_s27 = sld [smem:[#allocation2 + $0x22]] }
 0x183   : > { %6012 = vst [vmem:[#allocation35_spill] sm:$0xff] %v5064_v40  ;;  %6014 = vst [vmem:[#allocation75_spill] sm:$0xff] %v5070_v9  ;;  %2344 = vrot.lane.b32.xlu1 %v2339_v24, %s3620_s12  ;;  %v6017_v40 = vld [vmem:[#allocation47_spill] sm:$0xff]  ;;  %v2524_v9 = vrot.slane %v2518_v5, 1  ;;  %v1079_v37 = vadd.f32 %v6018_v38, %v995_v48  ;;  %v2545_v20 = vrot.slane %v2539_v4, 1  ;;  %v6021_v24 = vld [vmem:[#allocation40_spill] sm:$0xff]  ;;  %v5104_v5 = vmul.f32 %v4921_v60, %v2435_v55 }
 0x184   : > { %v1080_v58 = vadd.f32 %v6017_v40, %v996_v54  ;;  %2342 = vrot.lane.b32.xlu0 %v2338_v41, %s3620_s12  ;;  %6019 = vst [vmem:[#allocation36_spill] sm:$0xff] %v5091_v28  ;;  %v5094_v40 = vmul.f32 %v5022_v23, %v1712_v47  ;;  %v5097_v54 = vmul.f32 %v4917_v11, %v2435_v55  ;;  %v6022_v47 = vld [vmem:[#allocation58_spill] sm:$0xff]  ;;  %v6023_v55 = vld [vmem:[#allocation49_spill] sm:$0xff]  ;;  %s5407_s24 = sld [smem:[#allocation2 + $0x46]] }
 0x185   : > { %v5083_v27 = vpop.permute.xlu1 %1625  ;;  %v1016_v41 = vadd.f32 %v6021_v24, %v4942_v0  ;;  %v5107_v48 = vmul.f32 %v5009_v63, %v1718_v35  ;;  %v5110_v51 = vmul.f32 %v5022_v23, %v1718_v35  ;;  %v5116_v4 = vsel %vm615_vm0, %v2525_v25, %v2527_v1 }
 0x186   : > { %v5088_v18 = vpop.permute.xlu0 %1623  ;;  %6020 = vst [vmem:[#allocation39_spill] sm:$0xff] %v5094_v40  ;;  %v1109_v15 = vadd.f32 %v6022_v47, %v1080_v58  ;;  %v5119_v0 = vmul.f32 %v4917_v11, %v2559_v46  ;;  %v1091_v38 = vadd.f32 %v6023_v55, %v1017_v61  ;;  %v1108_v24 = vadd.f32 %v6024_v31, %v1079_v37  ;;  %v6026_v55 = vld [vmem:[#allocation42_spill] sm:$0xff] }
 0x187   : > { %2358 = vrot.lane.b32.xlu1 %v4965_v7, %s3620_s12  ;;  %v5122_v7 = vstv %s5050_s10  ;;  %v5129_v35 = vsel %vm615_vm0, %v2524_v9, %v2525_v25  ;;  %v5132_v58 = vsel %vm615_vm0, %v2546_v6, %v2548_v50  ;;  %v5140_v61 = vsel %vm615_vm0, %v2545_v20, %v2546_v6  ;;  %v6027_v9 = vld [vmem:[#allocation50_spill] sm:$0xff]  ;;  %s5420_s10 = sld [smem:[#allocation2 + $0x6a]] }
 0x188   : > { %2356 = vrot.lane.b32.xlu0 %v4977_v10, %s3620_s12  ;;  %v6025_v10 = vld [vmem:[#allocation41_spill] sm:$0xff]  ;;  %v1165_v47 = vadd.f32 %v4499_v39, %v1109_v15  ;;  %v2562_v37 = vmul.f32 %v5015_v43, %v2559_v46  ;;  %v1037_v25 = vadd.f32 %v6026_v55, %v4987_v34  ;;  %v1090_v31 = vadd.f32 %v6027_v9, %v1016_v41  ;;  %v6029_v20 = vld [vmem:[#allocation54_spill] sm:$0xff] }
 0x189   : > { %v5126_v40 = vpop.permute.xlu1 %1646  ;;  %v1038_v1 = vadd.f32 %v6025_v10, %v4973_v45  ;;  %v1164_v50 = vadd.f32 %v4508_v12, %v1108_v24  ;;  %v2560_v39 = vmul.f32 %v4921_v60, %v2559_v46  ;;  %v6028_v45 = vld [vmem:[#allocation52_spill] sm:$0xff]  ;;  %v2567_v6 = vrot.slane %v5119_v0, 1  ;;  %v6031_v24 = vld [vmem:[#allocation51_spill] sm:$0xff] }
 0x18a   : > { %v5137_v28 = vpop.permute.xlu0 %1644  ;;  %v1123_v15 = vadd.f32 %v6028_v45, %v1091_v38  ;;  %v1221_v10 = vadd.f32 %v4629_v33, %v1165_v47  ;;  %v5157_v34 = vmul.f32 %v5009_v63, %v5122_v7  ;;  %v1122_v12 = vadd.f32 %v6029_v20, %v1090_v31  ;;  %v6030_v33 = vld [vmem:[#allocation43_spill] sm:$0xff]  ;;  %v6034_v20 = vld [vmem:[#allocation57_spill] sm:$0xff] }
 0x18b   : > { %2372 = vrot.lane.b32.xlu1 %v4980_v57, %s3620_s12  ;;  %v1220_v41 = vadd.f32 %v4637_v8, %v1164_v50  ;;  %v2580_v46 = vstv %s5086_s30  ;;  %v5166_v38 = vmul.f32 %v4383_v44, %v5122_v7  ;;  %v1097_v0 = vadd.f32 %v6031_v24, %v1038_v1  ;;  %v6032_v8 = vld [vmem:[#allocation44_spill] sm:$0xff]  ;;  %v6033_v50 = vld [vmem:[#allocation53_spill] sm:$0xff]  ;;  %s5430_s30 = sld [smem:[#allocation2 + $0x18]] }
 0x18c   : > { %2370 = vrot.lane.b32.xlu0 %v4991_v26, %s3620_s12  ;;  %v1059_v26 = vadd.f32 %v6030_v33, %v5034_v32  ;;  %v1179_v47 = vadd.f32 %v4527_v56, %v1123_v15  ;;  %v2569_v9 = vrot.slane %v2562_v37, 1  ;;  %v1058_v31 = vadd.f32 %v6032_v8, %v5044_v42  ;;  %v6037_v8 = vld [vmem:[#allocation56_spill] sm:$0xff] }
 0x18d   : > { %v5161_v57 = vpop.permute.xlu1 %1667  ;;  %v1096_v45 = vadd.f32 %v6033_v50, %v1037_v25  ;;  %v1178_v44 = vadd.f32 %v4532_v30, %v1122_v12  ;;  %v2566_v32 = vrot.slane %v2560_v39, 1  ;;  %v1137_v1 = vadd.f32 %v6034_v20, %v1097_v0  ;;  %v6035_v25 = vld [vmem:[#allocation60_spill] sm:$0xff] }
 0x18e   : > { %v5172_v55 = vpop.permute.xlu0 %1665  ;;  %v1289_v56 = vadd.f32 %v4706_v59, %v1221_v10  ;;  %v5187_v37 = vmul.f32 %v4917_v11, %v2580_v46  ;;  %v5190_v42 = vmul.f32 %v5015_v43, %v2580_v46  ;;  %v1288_v30 = vadd.f32 %v4726_v36, %v1220_v41  ;;  %v6036_v59 = vld [vmem:[#allocation55_spill] sm:$0xff] }
 0x18f   : > { %2386 = vrot.lane.b32.xlu1 %v4994_v13, %s3620_s12  ;;  %v1136_v15 = vadd.f32 %v6035_v25, %v1096_v45  ;;  %v5195_v13 = vmul.f32 %v4921_v60, %v2580_v46  ;;  %v1844_v39 = vrot.slane %v5157_v34, 1  ;;  %v1103_v10 = vadd.f32 %v6036_v59, %v1059_v26  ;;  %v6038_v46 = vld [vmem:[#allocation61_spill] sm:$0xff]  ;;  %v6045_v59 = vld [vmem:[#allocation66_spill] sm:$0xff] }
 0x190   : > { %2384 = vrot.lane.b32.xlu0 %v5000_v52, %s3620_s12  ;;  %v1193_v52 = vadd.f32 %v4560_v14, %v1137_v1  ;;  %v1238_v33 = vadd.f32 %v4553_v2, %v1179_v47  ;;  %v1373_v24 = vadd.f32 %v4744_v16, %v1289_v56  ;;  %v1102_v50 = vadd.f32 %v6037_v8, %v1058_v31  ;;  %v6040_v47 = vld [vmem:[#allocation67_spill] sm:$0xff]  ;;  %v6043_v56 = vld [vmem:[#allocation17_spill] sm:$0xff] }
 0x191   : > { %v1689_v12 = vpop.permute.xlu1 %1688  ;;  %v1192_v45 = vadd.f32 %v4574_v17, %v1136_v15  ;;  %v1237_v36 = vadd.f32 %v4556_v19, %v1178_v44  ;;  %v1372_v41 = vadd.f32 %v4754_v29, %v1288_v30  ;;  %v1151_v26 = vadd.f32 %v6038_v46, %v1103_v10  ;;  %v6039_v17 = vld [vmem:[#allocation62_spill] sm:$0xff]  ;;  %v6044_v15 = vld [vmem:[#allocation64_spill] sm:$0xff]  ;;  %v6048_v8 = vld [vmem:[#allocation45_spill] sm:$0xff] }
 0x192   : > { %v1687_v0 = vpop.permute.xlu0 %1686  ;;  %v1310_v14 = vadd.f32 %v4659_v49, %v1238_v33  ;;  %v1457_v2 = vadd.f32 %v4872_v22, %v1373_v24  ;;  %v5214_v16 = vsel %vm615_vm0, %v2567_v6, %v2569_v9  ;;  %v1150_v19 = vadd.f32 %v6039_v17, %v1102_v50  ;;  %v6041_v49 = vld [vmem:[#allocation63_spill] sm:$0xff]  ;;  %v6042_v22 = vld [vmem:[#allocation65_spill] sm:$0xff]  ;;  %v6046_v33 = vld [vmem:[#allocation18_spill] sm:$0xff] }
 0x193   : > { %2400 = vrot.lane.b32.xlu1 %v5003_v53, %s3621_s6  ;;  %v1309_v29 = vadd.f32 %v6040_v47, %v1237_v36  ;;  %v1456_v31 = vadd.f32 %v4878_v62, %v1372_v41  ;;  %v5222_v53 = vsel %vm615_vm0, %v2566_v32, %v2567_v6  ;;  %v1207_v20 = vadd.f32 %v6041_v49, %v1151_v26  ;;  %v6047_v32 = vld [vmem:[#allocation13_spill] sm:$0xff]  ;;  %v6050_v46 = vld [vmem:[#allocation14_spill] sm:$0xff]  ;;  %v6053_v47 = vld [vmem:[#allocation19_spill] sm:$0xff] }
 0x194   : > { %2398 = vrot.lane.b32.xlu0 %v5006_v3, %s3621_s6  ;;  %v1255_v1 = vadd.f32 %v6042_v22, %v1193_v52  ;;  %v1394_v3 = vadd.f32 %v6043_v56, %v1310_v14  ;;  %v2601_v9 = vstv %s5174_s11  ;;  %v1206_v30 = vadd.f32 %v6044_v15, %v1150_v19  ;;  %v6049_v50 = vld [vmem:[#allocation33_spill] sm:$0xff]  ;;  %v6051_v26 = vld [vmem:[#allocation30_spill] sm:$0xff]  ;;  %s5435_s11 = sld [smem:[#allocation2 + $0x8e]] }
 0x195   : > { %v5219_v44 = vpop.permute.xlu1 %1731  ;;  %v1254_v10 = vadd.f32 %v6045_v59, %v1192_v45  ;;  %v1393_v62 = vadd.f32 %v6046_v33, %v1309_v29  ;;  %v2588_v6 = vrot.slane %v5187_v37, 1  ;;  %v1525_v52 = vadd.f32 %v6048_v8, %v1457_v2  ;;  %v6052_v2 = vld [vmem:[#allocation37_spill] sm:$0xff]  ;;  %v6054_v29 = vld [vmem:[#allocation20_spill] sm:$0xff]  ;;  %v6055_v49 = vld [vmem:[#allocation34_spill] sm:$0xff] }
 0x196   : > { %v5227_v25 = vpop.permute.xlu0 %1729  ;;  %v1331_v24 = vadd.f32 %v6047_v32, %v1255_v1  ;;  %v2590_v36 = vrot.slane %v5190_v42, 1  ;;  %v2587_v41 = vrot.slane %v5195_v13, 1  ;;  %v1524_v14 = vadd.f32 %v6051_v26, %v1456_v31  ;;  %v6056_v31 = vld [vmem:[#allocation38_spill] sm:$0xff]  ;;  %v6057_v15 = vld [vmem:[#allocation21_spill] sm:$0xff]  ;;  %v6059_v32 = vld [vmem:[#allocation35_spill] sm:$0xff] }
 0x197   : > { %2414 = vrot.lane.b32.xlu1 %v5028_v21, %s3621_s6  ;;  %v1330_v45 = vadd.f32 %v6050_v46, %v1254_v10  ;;  %v5247_v21 = vmul.f32 %v4917_v11, %v2601_v9  ;;  %v5250_v37 = vmul.f32 %v5015_v43, %v2601_v9  ;;  %v1272_v19 = vadd.f32 %v6052_v2, %v1207_v20  ;;  %v6058_v10 = vld [vmem:[#allocation22_spill] sm:$0xff]  ;;  %v6061_v20 = vld [vmem:[#allocation15_spill] sm:$0xff] }
 0x198   : > { %2412 = vrot.lane.b32.xlu0 %v6049_v50, %s3621_s6  ;;  %v1415_v42 = vadd.f32 %v6053_v47, %v1331_v24  ;;  %v1474_v13 = vadd.f32 %v6054_v29, %v1394_v3  ;;  %v1609_v22 = vadd.f32 %v6055_v49, %v1525_v52  ;;  %v1271_v56 = vadd.f32 %v6056_v31, %v1206_v30  ;;  %v6060_v50 = vld [vmem:[#allocation74_spill] sm:$0xff]  ;;  %v6062_v24 = vld [vmem:[#allocation27_spill] sm:$0xff]  ;;  %v6064_v30 = vld [vmem:[#allocation16_spill] sm:$0xff] }
 0x199   : > { %v5244_v17 = vpop.permute.xlu1 %1745  ;;  %v1414_v59 = vadd.f32 %v6057_v15, %v1330_v45  ;;  %v1473_v33 = vadd.f32 %v6058_v10, %v1393_v62  ;;  %v1608_v8 = vadd.f32 %v6059_v32, %v1524_v14  ;;  %v1352_v46 = vadd.f32 %v6061_v20, %v1272_v19  ;;  %v6063_v52 = vld [vmem:[#allocation75_spill] sm:$0xff]  ;;  %v6065_v47 = vld [vmem:[#allocation28_spill] sm:$0xff]  ;;  %v6069_v10 = vld [vmem:[#allocation26_spill] sm:$0xff] }
 0x19a   : > { %v5258_v1 = vpop.permute.xlu0 %1743  ;;  %v1546_v26 = vadd.f32 %v6062_v24, %v1474_v13  ;;  %v1693_v3 = vadd.f32 %v1689_v12, %v1609_v22  ;;  %v5271_v2 = vmul.f32 %v4921_v60, %v2601_v9  ;;  %v1351_v45 = vadd.f32 %v6064_v30, %v1271_v56  ;;  %v6066_v19 = vld [vmem:[#allocation23_spill] sm:$0xff]  ;;  %v6067_v13 = vld [vmem:[#allocation25_spill] sm:$0xff] }
 0x19b   : > { %2428 = vrot.lane.b32.xlu1 %v6060_v50, %s3621_s6  ;;  %v1545_v62 = vadd.f32 %v6065_v47, %v1473_v33  ;;  %v1692_v29 = vadd.f32 %v1687_v0, %v1608_v8  ;;  %v5278_v49 = vsel %vm615_vm0, %v2588_v6, %v2590_v36  ;;  %v1436_v12 = vadd.f32 %v6066_v19, %v1352_v46  ;;  %v6068_v0 = vld [vmem:[#allocation24_spill] sm:$0xff]  ;;  %v6071_v50 = vld [vmem:[#allocation46_spill] sm:$0xff] }
 0x19c   : > { %2426 = vrot.lane.b32.xlu0 %v6063_v52, %s3621_s6  ;;  %v1491_v22 = vadd.f32 %v6067_v13, %v1415_v42  ;;  %v1630_v31 = vadd.f32 %v5083_v27, %v1546_v26  ;;  %v5288_v56 = vsel %vm615_vm0, %v2587_v41, %v2588_v6  ;;  %v1435_v15 = vadd.f32 %v6068_v0, %v1351_v45  ;;  %v6070_v42 = vld [vmem:[#allocation29_spill] sm:$0xff]  ;;  %v6073_v26 = vld [vmem:[#allocation32_spill] sm:$0xff]  ;;  %v6077_v19 = vld [vmem:[#allocation70_spill] sm:$0xff] }
 0x19d   : > { %v5275_v14 = vpop.permute.xlu1 %1759  ;;  %v1490_v33 = vadd.f32 %v6069_v10, %v1414_v59  ;;  %v1629_v36 = vadd.f32 %v5088_v18, %v1545_v62  ;;  %v1846_v32 = vrot.slane %v5166_v38, 1  ;;  %v1722_v27 = vadd.f32 %v5107_v48, %v1693_v3  ;;  %v6072_v38 = vld [vmem:[#allocation68_spill] sm:$0xff] }
 0x19e   : > { %v5285_v9 = vpop.permute.xlu0 %1757  ;;  %v1567_v8 = vadd.f32 %v6070_v42, %v1491_v22  ;;  %v2609_v6 = vrot.slane %v5247_v21, 1  ;;  %v2611_v41 = vrot.slane %v5250_v37, 1  ;;  %v1721_v18 = vadd.f32 %v5110_v51, %v1692_v29  ;;  %v6074_v37 = vld [vmem:[#allocation69_spill] sm:$0xff]  ;;  %v6075_v51 = vld [vmem:[#allocation71_spill] sm:$0xff] }
 0x19f   : > { %2442 = vrot.lane.b32.xlu1 %v5097_v54, %s3621_s6  ;;  %v1566_v59 = vadd.f32 %v6071_v50, %v1490_v33  ;;  %v2608_v54 = vrot.slane %v5271_v2, 1  ;;  %v2622_v46 = vstv %s5252_s5  ;;  %v1508_v24 = vadd.f32 %v6072_v38, %v1436_v12  ;;  %s5449_s5 = sld [smem:[#allocation2 + $0x23]] }
 0x1a0   : > { %2440 = vrot.lane.b32.xlu0 %v5104_v5, %s3621_s6  ;;  %v1651_v5 = vadd.f32 %v5126_v40, %v1567_v8  ;;  %v1704_v48 = vadd.f32 %v6073_v26, %v1630_v31  ;;  %v1507_v52 = vadd.f32 %v6074_v37, %v1435_v15  ;;  %v1703_v45 = vadd.f32 %v6075_v51, %v1629_v36  ;;  %v6076_v40 = vld [vmem:[#allocation31_spill] sm:$0xff] }
 0x1a1   : > { %v1774_v20 = vpop.permute.xlu1 %1773  ;;  %v1650_v30 = vadd.f32 %v5137_v28, %v1566_v59  ;;  %v1588_v47 = vadd.f32 %v6076_v40, %v1508_v24  ;;  %v5329_v28 = vsel %vm615_vm0, %v1844_v39, %v1846_v32  ;;  %v1837_v29 = vmul.f32 %v5022_v23, %v5122_v7  ;;  %v5361_v59 = vld [vmem:[%s3774_s8 + $0x10] sm:$0x3] }
 0x1a2   : > { %v5311_v3 = vadd.f32 %v1774_v20, %v1722_v27  ;;  %v1772_v21 = vpop.permute.xlu0 %1771  ;;  %v1736_v62 = vadd.f32 %v5219_v44, %v1704_v48  ;;  %v1587_v12 = vadd.f32 %v6077_v19, %v1507_v52  ;;  %v5336_v22 = vsel %vm615_vm0, %v2609_v6, %v2611_v41  ;;  %v6081_v24 = vld [vmem:[#allocation39_spill] sm:$0xff] }
 0x1a3   : > { %v5316_v2 = vadd.f32 %v1772_v21, %v1721_v18  ;;  %2531 = vrot.lane.b32.xlu1 %v5116_v4, %s3620_s12  ;;  %v1735_v4 = vadd.f32 %v5227_v25, %v1703_v45  ;;  %v1853_v44 = vstv %s5280_s9  ;;  %v1672_v31 = vadd.f32 %v5161_v57, %v1588_v47  ;;  %v6079_v25 = vld [vmem:[#allocation73_spill] sm:$0xff]  ;;  %s5473_s9 = sld [smem:[#allocation2 + $0x47]] }
 0x1a4   : > { %2529 = vrot.lane.b32.xlu0 %v5129_v35, %s3620_s12  ;;  %v6078_v35 = vld [vmem:[#allocation72_spill] sm:$0xff]  ;;  %v2624_v33 = vmul.f32 %v4917_v11, %v2622_v46  ;;  %v1671_v7 = vadd.f32 %v5172_v55, %v1587_v12  ;;  %v1709_v36 = vadd.f32 %v6079_v25, %v1650_v30  ;;  %v2625_v57 = vmul.f32 %v5015_v43, %v2622_v46 }
 0x1a5   : > { %v1788_v13 = vpop.permute.xlu1 %1787  ;;  %v1710_v0 = vadd.f32 %v6078_v35, %v1651_v5  ;;  %v2610_v8 = vsel %vm615_vm0, %v2608_v54, %v2609_v6  ;;  %v2623_v27 = vmul.f32 %v4921_v60, %v2622_v46  ;;  %v1855_v55 = vmul.f32 %v5009_v63, %v1853_v44 }
 0x1a6   : > { %v5341_v15 = vadd.f32 %v1788_v13, %v1736_v62  ;;  %v1786_v10 = vpop.permute.xlu0 %1785  ;;  %v1749_v41 = vadd.f32 %v5258_v1, %v1709_v36  ;;  %v1854_v20 = vmul.f32 %v5022_v23, %v1853_v44  ;;  %v1843_v46 = vrot.slane %v1837_v29, 1 }
 0x1a7   : > { %v5348_v32 = vadd.f32 %v1786_v10, %v1735_v4  ;;  %2552 = vrot.lane.b32.xlu1 %v5132_v58, %s3620_s12  ;;  %v1750_v42 = vadd.f32 %v5244_v17, %v1710_v0  ;;  %v1856_v58 = vmul.f32 %v5361_v59, %v1853_v44  ;;  %v2643_v17 = vstv %s5306_s13  ;;  %s5481_s13 = sld [smem:[#allocation2 + $0x3c]] }
 0x1a8   : > { %2550 = vrot.lane.b32.xlu0 %v5140_v61, %s3620_s12  ;;  %v6080_v61 = vld [vmem:[#allocation36_spill] sm:$0xff]  ;;  %v2630_v38 = vrot.slane %v2624_v33, 1  ;;  %v1715_v1 = vadd.f32 %v6081_v24, %v1671_v7  ;;  %v2632_v26 = vrot.slane %v2625_v57, 1  ;;  %v1870_v48 = vstv %s5320_s14  ;;  %s5495_s14 = sld [smem:[#allocation2 + $0x6b]] }
 0x1a9   : > { %v1802_v50 = vpop.permute.xlu1 %1801  ;;  %v1716_v18 = vadd.f32 %v6080_v61, %v1672_v31  ;;  %v2629_v37 = vrot.slane %v2623_v27, 1  ;;  %v2645_v52 = vmul.f32 %v4917_v11, %v2643_v17  ;;  %v2646_v30 = vmul.f32 %v5015_v43, %v2643_v17 }
 0x1aa   : > { %v5369_v6 = vadd.f32 %v1802_v50, %v1750_v42  ;;  %v1800_v54 = vpop.permute.xlu0 %1799  ;;  %v1763_v51 = vadd.f32 %v5285_v9, %v1715_v1  ;;  %v1861_v40 = vrot.slane %v1855_v55, 1  ;;  %v1860_v47 = vrot.slane %v1854_v20, 1 }
 0x1ab   : > { %v5372_v5 = vadd.f32 %v1800_v54, %v1749_v41  ;;  %2573 = vrot.lane.b32.xlu1 %v5214_v16, %s3620_s12  ;;  %v1764_v21 = vadd.f32 %v5275_v14, %v1716_v18  ;;  %v1863_v16 = vrot.slane %v1856_v58, 1  ;;  %v1845_v14 = vsel %vm615_vm0, %v1843_v46, %v1844_v39 }
 0x1ac   : > { %2571 = vrot.lane.b32.xlu0 %v5222_v53, %s3620_s12  ;;  %v2644_v53 = vmul.f32 %v4921_v60, %v2643_v17  ;;  %v2664_v19 = vstv %s5344_s21  ;;  %v2633_v9 = vsel %vm615_vm0, %v2630_v38, %v2632_v26  ;;  %v1872_v4 = vmul.f32 %v5009_v63, %v1870_v48  ;;  %s5502_s21 = sld [smem:[#allocation2 + $0x60]] }
 0x1ad   : > { %v1816_v45 = vpop.permute.xlu1 %1815  ;;  %v1873_v13 = vmul.f32 %v5361_v59, %v1870_v48  ;;  %v2631_v34 = vsel %vm615_vm0, %v2629_v37, %v2630_v38  ;;  %v2651_v39 = vrot.slane %v2645_v52, 1  ;;  %v2653_v44 = vrot.slane %v2646_v30, 1 }
 0x1ae   : > { %v5385_v62 = vadd.f32 %v1816_v45, %v1764_v21  ;;  %v1814_v29 = vpop.permute.xlu0 %1813  ;;  %v1871_v31 = vmul.f32 %v5022_v23, %v1870_v48  ;;  %v1864_v0 = vsel %vm615_vm0, %v1861_v40, %v1863_v16  ;;  %v2666_v10 = vmul.f32 %v4917_v11, %v2664_v19 }
 0x1af   : > { %v5392_v12 = vadd.f32 %v1814_v29, %v1763_v51  ;;  %2594 = vrot.lane.b32.xlu1 %v5278_v49, %s3620_s12  ;;  %v1862_v49 = vsel %vm615_vm0, %v1860_v47, %v1861_v40  ;;  %v1887_v33 = vstv %s5366_s22  ;;  %v2650_v25 = vrot.slane %v2644_v53, 1  ;;  %s5520_s22 = sld [smem:[#allocation2 + $0x84]] }
 0x1b0   : > { %2592 = vrot.lane.b32.xlu0 %v5288_v56, %s3620_s12  ;;  %v2667_v36 = vmul.f32 %v5015_v43, %v2664_v19  ;;  %v2665_v57 = vmul.f32 %v4921_v60, %v2664_v19  ;;  %v1878_v27 = vrot.slane %v1872_v4, 1  ;;  %v1880_v55 = vrot.slane %v1873_v13, 1 }
 0x1b1   : > { %v1830_v35 = vpop.permute.xlu1 %1829  ;;  %v2753_v41 = vstv %s5377_s27  ;;  %v2654_v50 = vsel %vm615_vm0, %v2651_v39, %v2653_v44  ;;  %v1877_v58 = vrot.slane %v1871_v31, 1  ;;  %v1889_v20 = vmul.f32 %v5009_v63, %v1887_v33  ;;  %s5526_s27 = sld [smem:[#allocation2 + $0x8f]] }
 0x1b2   : > { %v5410_v7 = vadd.f32 %v1830_v35, %v5311_v3  ;;  %v1828_v56 = vpop.permute.xlu0 %1827  ;;  %v1851_v3 = vadd.f32 %v5329_v28, %v5341_v15  ;;  %v1850_v17 = vadd.f32 %v1845_v14, %v5348_v32  ;;  %v2672_v61 = vrot.slane %v2666_v10, 1 }
 0x1b3   : > { %v5415_v42 = vadd.f32 %v1828_v56, %v5316_v2  ;;  %2615 = vrot.lane.b32.xlu1 %v5336_v22, %s3621_s6  ;;  %v1890_v22 = vmul.f32 %v5361_v59, %v1887_v33  ;;  %v1888_v18 = vmul.f32 %v5022_v23, %v1887_v33  ;;  %v2674_v46 = vrot.slane %v2667_v36, 1 }
 0x1b4   : > { %2613 = vrot.lane.b32.xlu0 %v2610_v8, %s3621_s6  ;;  %v2671_v28 = vrot.slane %v2665_v57, 1  ;;  %v2755_v15 = vmul.f32 %v4917_v11, %v2753_v41  ;;  %v2652_v32 = vsel %vm615_vm0, %v2650_v25, %v2651_v39  ;;  %v2756_v24 = vmul.f32 %v5015_v43, %v2753_v41 }
 0x1b5   : > { %v1919_v2 = vpop.permute.xlu1 %1918  ;;  %v2754_v1 = vmul.f32 %v4921_v60, %v2753_v41  ;;  %v1868_v26 = vadd.f32 %v1864_v0, %v5369_v6  ;;  %v1881_v48 = vsel %vm615_vm0, %v1878_v27, %v1880_v55  ;;  %v1879_v21 = vsel %vm615_vm0, %v1877_v58, %v1878_v27 }
 0x1b6   : > { %v5432_v54 = vadd.f32 %v1919_v2, %v1851_v3  ;;  %v1917_v8 = vpop.permute.xlu0 %1916  ;;  %v1895_v37 = vrot.slane %v1889_v20, 1  ;;  %v1867_v30 = vadd.f32 %v1862_v49, %v5372_v5  ;;  %v1897_v51 = vrot.slane %v1890_v22, 1 }
 0x1b7   : > { %v5437_v38 = vadd.f32 %v1917_v8, %v1850_v17  ;;  %2636 = vrot.lane.b32.xlu1 %v2633_v9, %s3621_s6  ;;  %v1894_v45 = vrot.slane %v1888_v18, 1  ;;  %v2774_v40 = vstv %s5407_s24  ;;  %v2675_v29 = vsel %vm615_vm0, %v2672_v61, %v2674_v46  ;;  %s3307_s24 = sld [smem:[#allocation2 + $0x3f]] }
 0x1b8   : > { %2634 = vrot.lane.b32.xlu0 %v2631_v34, %s3621_s6  ;;  %v2673_v6 = vsel %vm615_vm0, %v2671_v28, %v2672_v61  ;;  %v2761_v14 = vrot.slane %v2755_v15, 2  ;;  %v2763_v19 = vrot.slane %v2756_v24, 2  ;;  %v2760_v5 = vrot.slane %v2754_v1, 2 }
 0x1b9   : > { %v1940_v52 = vpop.permute.xlu1 %1939  ;;  %v2795_v9 = vstv %s5420_s10  ;;  %v1885_v4 = vadd.f32 %v1881_v48, %v5385_v62  ;;  %v2776_v13 = vmul.f32 %v4917_v11, %v2774_v40  ;;  %v2777_v34 = vmul.f32 %v5015_v43, %v2774_v40  ;;  %s3309_s10 = sld [smem:[#allocation2 + $0x87]] }
 0x1ba   : > { %v5451_v16 = vadd.f32 %v1940_v52, %v1868_v26  ;;  %v1938_v47 = vpop.permute.xlu0 %1937  ;;  %v2775_v39 = vmul.f32 %v4921_v60, %v2774_v40  ;;  %v1884_v31 = vadd.f32 %v1879_v21, %v5392_v12  ;;  %v1898_v35 = vsel %vm615_vm0, %v1895_v37, %v1897_v51 }
 0x1bb   : > { %v5455_v53 = vadd.f32 %v1938_v47, %v1867_v30  ;;  %2657 = vrot.lane.b32.xlu1 %v2654_v50, %s3621_s6  ;;  %v1896_v0 = vsel %vm615_vm0, %v1894_v45, %v1895_v37  ;;  %v2072_v49 = vstv %s5430_s30  ;;  %v2797_v56 = vmul.f32 %v4917_v11, %v2795_v9  ;;  %s3319_s30 = sld [smem:[#allocation2 + $0x42]] }
 0x1bc   : > { %2655 = vrot.lane.b32.xlu0 %v2652_v32, %s3621_s6  ;;  %v2798_v62 = vmul.f32 %v5015_v43, %v2795_v9  ;;  %v2816_v25 = vstv %s5435_s11  ;;  %v2764_v12 = vsel %vm852_vm1, %v2761_v14, %v2763_v19  ;;  %v2762_v57 = vsel %vm852_vm1, %v2760_v5, %v2761_v14  ;;  %s3320_s11 = sld [smem:[#allocation2 + $0x66]] }
 0x1bd   : > { %v1961_v44 = vpop.permute.xlu1 %1960  ;;  %v2796_v27 = vmul.f32 %v4921_v60, %v2795_v9  ;;  %v1902_v55 = vadd.f32 %v1898_v35, %v5410_v7  ;;  %v2782_v41 = vrot.slane %v2776_v13, 2  ;;  %v2784_v3 = vrot.slane %v2777_v34, 2 }
 0x1be   : > { %v5468_v10 = vadd.f32 %v1961_v44, %v1885_v4  ;;  %v1959_v33 = vpop.permute.xlu0 %1958  ;;  %v2781_v50 = vrot.slane %v2775_v39, 2  ;;  %v1901_v20 = vadd.f32 %v1896_v0, %v5415_v42  ;;  %v2818_v2 = vmul.f32 %v4917_v11, %v2816_v25 }
 0x1bf   : > { %v5475_v36 = vadd.f32 %v1959_v33, %v1884_v31  ;;  %2678 = vrot.lane.b32.xlu1 %v2675_v29, %s3621_s6  ;;  %v2819_v17 = vmul.f32 %v5015_v43, %v2816_v25  ;;  %v2837_v61 = vstv %s5449_s5  ;;  %v2803_v8 = vrot.slane %v2797_v56, 2  ;;  %s3321_s5 = sld [smem:[#allocation2 + $0x8a]] }
 0x1c0   : > { %2676 = vrot.lane.b32.xlu0 %v2673_v6, %s3621_s6  ;;  %v2805_v46 = vrot.slane %v2798_v62, 2  ;;  %v2817_v28 = vmul.f32 %v4921_v60, %v2816_v25  ;;  %v2802_v7 = vrot.slane %v2796_v27, 2  ;;  %v2785_v42 = vsel %vm852_vm1, %v2782_v41, %v2784_v3 }
 0x1c1   : > { %v1982_v58 = vpop.permute.xlu1 %1981  ;;  %v2839_v32 = vmul.f32 %v4917_v11, %v2837_v61  ;;  %v2840_v24 = vmul.f32 %v5015_v43, %v2837_v61  ;;  %v2838_v1 = vmul.f32 %v4921_v60, %v2837_v61  ;;  %v2783_v48 = vsel %vm852_vm1, %v2781_v50, %v2782_v41 }
 0x1c2   : > { %v5489_v22 = vadd.f32 %v1982_v58, %v1902_v55  ;;  %v1980_v18 = vpop.permute.xlu0 %1979  ;;  %v2824_v21 = vrot.slane %v2818_v2, 2  ;;  %v2826_v37 = vrot.slane %v2819_v17, 2  ;;  %v2074_v52 = vmul.f32 %v5009_v63, %v2072_v49 }
 0x1c3   : > { %v5492_v15 = vadd.f32 %v1980_v18, %v1901_v20  ;;  %2767 = vrot.lane.b32.xlu1 %v2764_v12, %s3620_s12  ;;  %v2806_v45 = vsel %vm852_vm1, %v2803_v8, %v2805_v46  ;;  %v2823_v40 = vrot.slane %v2817_v28, 2  ;;  %v2858_v47 = vstv %s5473_s9  ;;  %s3330_s9 = sld [smem:[#allocation2 + $0x21]] }
 0x1c4   : > { %2765 = vrot.lane.b32.xlu0 %v2762_v57, %s3620_s12  ;;  %v2804_v6 = vsel %vm852_vm1, %v2802_v7, %v2803_v8  ;;  %v2075_v14 = vmul.f32 %v5361_v59, %v2072_v49  ;;  %v2089_v19 = vstv %s5481_s13  ;;  %v2845_v5 = vrot.slane %v2839_v32, 2  ;;  %s5672_s13 = sld [smem:[#allocation2 + $0x45]] }
 0x1c5   : > { %v2003_v26 = vpop.permute.xlu1 %2002  ;;  %v2844_v9 = vrot.slane %v2838_v1, 2  ;;  %v2073_v4 = vmul.f32 %v5022_v23, %v2072_v49  ;;  %v2860_v34 = vmul.f32 %v4917_v11, %v2858_v47  ;;  %v2861_v39 = vmul.f32 %v5015_v43, %v2858_v47 }
 0x1c6   : > { %v5507_v30 = vadd.f32 %v2003_v26, %v5432_v54  ;;  %v2001_v51 = vpop.permute.xlu0 %2000  ;;  %v2847_v54 = vrot.slane %v2840_v24, 2  ;;  %v2859_v44 = vmul.f32 %v4921_v60, %v2858_v47  ;;  %v2825_v0 = vsel %vm852_vm1, %v2823_v40, %v2824_v21 }
 0x1c7   : > { %v5512_v29 = vadd.f32 %v2001_v51, %v5437_v38  ;;  %2788 = vrot.lane.b32.xlu1 %v2785_v42, %s3620_s12  ;;  %v2827_v38 = vsel %vm852_vm1, %v2824_v21, %v2826_v37  ;;  %v2091_v49 = vmul.f32 %v5009_v63, %v2089_v19  ;;  %v2092_v33 = vmul.f32 %v5361_v59, %v2089_v19 }
 0x1c8   : > { %2786 = vrot.lane.b32.xlu0 %v2783_v48, %s3620_s12  ;;  %v2080_v62 = vrot.slane %v2074_v52, 2  ;;  %v2082_v25 = vrot.slane %v2075_v14, 2  ;;  %v2879_v12 = vstv %s5495_s14  ;;  %v2846_v57 = vsel %vm852_vm1, %v2844_v9, %v2845_v5  ;;  %s5676_s14 = sld [smem:[#allocation2 + $0x69]] }
 0x1c9   : > { %v2024_v13 = vpop.permute.xlu1 %2023  ;;  %v2079_v27 = vrot.slane %v2073_v4, 2  ;;  %v2106_v55 = vstv %s5502_s21  ;;  %v2866_v3 = vrot.slane %v2860_v34, 2  ;;  %v2868_v50 = vrot.slane %v2861_v39, 2  ;;  %s5748_s21 = sld [smem:[#allocation5]] }
 0x1ca   : > { %v5529_v31 = vadd.f32 %v2024_v13, %v5451_v16  ;;  %v2022_v35 = vpop.permute.xlu0 %2021  ;;  %v2848_v16 = vsel %vm852_vm1, %v2845_v5, %v2847_v54  ;;  %v2865_v58 = vrot.slane %v2859_v44, 2  ;;  %v2097_v17 = vrot.slane %v2091_v49, 2 }
 0x1cb   : > { %v5535_v56 = vadd.f32 %v2022_v35, %v5455_v53  ;;  %2809 = vrot.lane.b32.xlu1 %v2806_v45, %s3620_s12  ;;  %v2090_v53 = vmul.f32 %v5022_v23, %v2089_v19  ;;  %v2099_v61 = vrot.slane %v2092_v33, 2  ;;  %v2881_v18 = vmul.f32 %v4917_v11, %v2879_v12 }
 0x1cc   : > { %2807 = vrot.lane.b32.xlu0 %v2804_v6, %s3620_s12  ;;  %v2882_v46 = vmul.f32 %v5015_v43, %v2879_v12  ;;  %v2880_v28 = vmul.f32 %v4921_v60, %v2879_v12  ;;  %v2108_v7 = vmul.f32 %v5009_v63, %v2106_v55  ;;  %v2081_v42 = vsel %vm852_vm1, %v2079_v27, %v2080_v62 }
 0x1cd   : > { %v2045_v41 = vpop.permute.xlu1 %2044  ;;  %v2109_v32 = vmul.f32 %v5361_v59, %v2106_v55  ;;  %v2123_v24 = vstv %s5520_s22  ;;  %v2867_v26 = vsel %vm852_vm1, %v2865_v58, %v2866_v3  ;;  %v2096_v48 = vrot.slane %v2090_v53, 2  ;;  %s5757_s22 = sld [smem:[#allocation5 + $0x1]] }
 0x1ce   : > { %v5545_v20 = vadd.f32 %v2045_v41, %v5468_v10  ;;  %v2043_v2 = vpop.permute.xlu0 %2042  ;;  %v2083_v10 = vsel %vm852_vm1, %v2080_v62, %v2082_v25  ;;  %v2900_v21 = vstv %s5526_s27  ;;  %v2100_v51 = vsel %vm852_vm1, %v2097_v17, %v2099_v61  ;;  %s5783_s27 = sld [smem:[#allocation5 + $0x2]] }
 0x1cf   : > { %v5549_v8 = vadd.f32 %v2043_v2, %v5475_v36  ;;  %2830 = vrot.lane.b32.xlu1 %v2827_v38, %s3620_s12  ;;  %v2869_v36 = vsel %vm852_vm1, %v2866_v3, %v2868_v50  ;;  %v2887_v45 = vrot.slane %v2881_v18, 2  ;;  %v2107_v40 = vmul.f32 %v5022_v23, %v2106_v55 }
 0x1d0   : > { %2828 = vrot.lane.b32.xlu0 %v2825_v0, %s3620_s12  ;;  %v2889_v6 = vrot.slane %v2882_v46, 2  ;;  %v2886_v14 = vrot.slane %v2880_v28, 2  ;;  %v2114_v19 = vrot.slane %v2108_v7, 2  ;;  %v2087_v5 = vadd.f32 %v2083_v10, %v5507_v30  ;;  %s3306_s12 = sld [smem:[#allocation2 + $0x1b]] }
 0x1d1   : > { %v2066_v1 = vpop.permute.xlu1 %2065  ;;  %v2116_v54 = vrot.slane %v2109_v32, 2  ;;  %v2903_v9 = vmul.f32 %v5015_v43, %v2900_v21  ;;  %v2086_v13 = vadd.f32 %v2081_v42, %v5512_v29  ;;  %v2901_v38 = vmul.f32 %v4921_v60, %v2900_v21 }
 0x1d2   : > { %v2070_v37 = vadd.f32 %v2066_v1, %v5489_v22  ;;  %v2064_v52 = vpop.permute.xlu0 %2063  ;;  %v2902_v22 = vmul.f32 %v4917_v11, %v2900_v21  ;;  %v2126_v34 = vmul.f32 %v5361_v59, %v2123_v24  ;;  %v2098_v35 = vsel %vm852_vm1, %v2096_v48, %v2097_v17 }
 0x1d3   : > { %v2069_v47 = vadd.f32 %v2064_v52, %v5492_v15  ;;  %2851 = vrot.lane.b32.xlu1 %v2848_v16, %s3621_s6  ;;  %v2125_v15 = vmul.f32 %v5009_v63, %v2123_v24  ;;  %v2113_v0 = vrot.slane %v2107_v40, 2  ;;  %v2124_v30 = vmul.f32 %v5022_v23, %v2123_v24 }
 0x1d4   : > { %2849 = vrot.lane.b32.xlu0 %v2846_v57, %s3621_s6  ;;  %v2890_v43 = vsel %vm852_vm1, %v2887_v45, %v2889_v6  ;;  %v2888_v11 = vsel %vm852_vm1, %v2886_v14, %v2887_v45  ;;  %v2104_v60 = vadd.f32 %v2100_v51, %v5529_v31  ;;  %v2117_v63 = vsel %vm852_vm1, %v2114_v19, %v2116_v54 }
 0x1d5   : > { %v2155_v4 = vpop.permute.xlu1 %2154  ;;  %v2908_v59 = vrot.slane %v2902_v22, 2  ;;  %v2910_v29 = vrot.slane %v2903_v9, 2  ;;  %v2103_v62 = vadd.f32 %v2098_v35, %v5535_v56  ;;  %v2907_v25 = vrot.slane %v2901_v38, 2 }
 0x1d6   : > { %v2159_v39 = vadd.f32 %v2155_v4, %v2087_v5  ;;  %v2153_v44 = vpop.permute.xlu0 %2152  ;;  %v2131_v23 = vrot.slane %v2125_v15, 2  ;;  %v2133_v12 = vrot.slane %v2126_v34, 2  ;;  %v2115_v27 = vsel %vm852_vm1, %v2113_v0, %v2114_v19  ;;  %v5601_v19 = vld [vmem:[%s3772_s7 + $0x30] sm:$0xff] }
 0x1d7   : > { %v2158_v49 = vadd.f32 %v2153_v44, %v2086_v13  ;;  %2872 = vrot.lane.b32.xlu1 %v2869_v36, %s3621_s6  ;;  %v2130_v55 = vrot.slane %v2124_v30, 2  ;;  %v2121_v31 = vadd.f32 %v2117_v63, %v5545_v20  ;;  %v2911_v3 = vsel %vm852_vm1, %v2908_v59, %v2910_v29 }
 0x1d8   : > { %2870 = vrot.lane.b32.xlu0 %v2867_v26, %s3621_s6  ;;  %v2120_v56 = vadd.f32 %v2115_v27, %v5549_v8  ;;  %v2909_v58 = vsel %vm852_vm1, %v2907_v25, %v2908_v59  ;;  %v2134_v53 = vsel %vm852_vm1, %v2131_v23, %v2133_v12  ;;  %v2313_v51 = vstv %s3306_s12  ;;  %s5792_s12 = sld [smem:[#allocation5 + $0x3]] }
 0x1d9   : > { %v2176_v33 = vpop.permute.xlu1 %2175  ;;  %v2132_v61 = vsel %vm852_vm1, %v2130_v55, %v2131_v23  ;;  %v2138_v46 = vadd.f32 %v2134_v53, %v2070_v37  ;;  %v2314_v5 = vmul.f32 %v5601_v19, %v2313_v51  ;;  %v2319_v54 = vstv %s3307_s24  ;;  %s6086_s24 = sshll.u32 %s3766_s25, 6 }
 0x1da   : > { %v2180_v16 = vadd.f32 %v2176_v33, %v2104_v60  ;;  %v2174_v57 = vpop.permute.xlu0 %2173  ;;  %v2137_v28 = vadd.f32 %v2132_v61, %v2069_v47  ;;  %v5597_v47 = vld [vmem:[%s3772_s7 + $0x38] sm:$0xff]  ;;  %v2331_v59 = vstv %s3309_s10  ;;  %s3318_s7 = sld [smem:[#allocation2 + $0x1e]]  ;;  %s3356_s10 = sshll.u32 %s3604_s18, 10 }
 0x1db   : > { %v2179_v41 = vadd.f32 %v2174_v57, %v2103_v62  ;;  %2893 = vrot.lane.b32.xlu1 %v2890_v43, %s3621_s6  ;;  %v2315_v6 = vmul.f32 %v5597_v47, %v2313_v51  ;;  %v2321_v38 = vmul.f32 %v5597_v47, %v2319_v54  ;;  %v2333_v23 = vmul.f32 %v5597_v47, %v2331_v59  ;;  %s2973_s18 = scalar_lea.sflag [#allocation3], %s3766_s25 }
 0x1dc   : > { %2891 = vrot.lane.b32.xlu0 %v2888_v11, %s3621_s6  ;;  %v2332_v57 = vmul.f32 %v5601_v19, %v2331_v59 }
 0x1dd   : > { %v2197_v50 = vpop.permute.xlu1 %2196 }
 0x1de   : > { %v2201_v2 = vadd.f32 %v2197_v50, %v2121_v31  ;;  %v2195_v17 = vpop.permute.xlu0 %2194 }
 0x1df   : > { %v2200_v18 = vadd.f32 %v2195_v17, %v2120_v56  ;;  %2914 = vrot.lane.b32.xlu1 %v2911_v3, %s3621_s6 }
 0x1e0   : > { %2912 = vrot.lane.b32.xlu0 %v2909_v58, %s3621_s6  ;;  %s3308_s6 = sld [smem:[#allocation2 + $0x63]] }
 0x1e1   : > { %v2218_v20 = vpop.permute.xlu1 %2217 }
 0x1e2   : > { %v2222_v7 = vadd.f32 %v2218_v20, %v2138_v46  ;;  %v2216_v10 = vpop.permute.xlu0 %2215 }
 0x1e3   : > { %v2221_v42 = vadd.f32 %v2216_v10, %v2137_v28 }
 0x1e5   : > { %v2239_v8 = vpop.permute.xlu1 %2238 }
 0x1e6   : > { %v2243_v32 = vadd.f32 %v2239_v8, %v2159_v39  ;;  %v2237_v24 = vpop.permute.xlu0 %2236  ;;  %v2320_v39 = vmul.f32 %v5601_v19, %v2319_v54  ;;  %v2325_v44 = vstv %s3308_s6  ;;  %v2483_v54 = vstv %s3320_s11  ;;  %s5801_s6 = scalar_lea.vmem [#allocation9], %s6086_s24 }
 0x1e7   : > { %v2242_v1 = vadd.f32 %v2237_v24, %v2158_v49  ;;  %v2327_v43 = vmul.f32 %v5597_v47, %v2325_v44  ;;  %v2326_v63 = vmul.f32 %v5601_v19, %v2325_v44  ;;  %v2685_v44 = vstv %s3330_s9 }
 0x1e8   : > { %v2317_v13 = vadd.f32 %v2315_v6, %v2243_v32 }
 0x1e9   : > { %v2260_v36 = vpop.permute.xlu1 %2259  ;;  %v2316_v34 = vadd.f32 %v2314_v5, %v2242_v1  ;;  %v2466_v5 = vstv %s3319_s30 }
 0x1ea   : > { %v2264_v26 = vadd.f32 %v2260_v36, %v2180_v16  ;;  %v2258_v48 = vpop.permute.xlu0 %2257 }
 0x1eb   : > { %v2263_v21 = vadd.f32 %v2258_v48, %v2179_v41 }
 0x1ec   : > { %v2323_v49 = vadd.f32 %v2321_v38, %v2264_v26 }
 0x1ed   : > { %v2281_v52 = vpop.permute.xlu1 %2280  ;;  %v2322_v60 = vadd.f32 %v2320_v39, %v2263_v21  ;;  %v2449_v21 = vstv %s3318_s7  ;;  %s2988_s7 = sshll.u32 %s5801_s6, 4  ;;  %s5826_s7 = int_to_ptr.vmem [resolvable:$true] %s2988_s7 }
 0x1ee   : > { %v2285_v37 = vadd.f32 %v2281_v52, %v2201_v2  ;;  %v2279_v45 = vpop.permute.xlu0 %2278  ;;  %v2451_v51 = vmul.f32 %v5597_v47, %v2449_v21  ;;  %v2450_v6 = vmul.f32 %v5601_v19, %v2449_v21  ;;  %s3512_s9 = scalar_lea.vmem %s5826_s7, 1024 }
 0x1ef   : > { %v2284_v40 = vadd.f32 %v2279_v45, %v2200_v18  ;;  %p3513_p1 = scmp.ne.s32.totalorder %s5826_s7, %s3512_s9 }
 0x1f0   : > { %v2329_v25 = vadd.f32 %v2327_v43, %v2285_v37  ;;  %v5664_v37 = vld [vmem:[%s3774_s8 + $0x18] sm:$0x3]  ;;  %v2456_v38 = vrot.slane %v2450_v6, 1  ;;  %s5693_s8 = sld [smem:[#allocation2 + $0x8d]] }
 0x1f1   : > { %v2302_v14 = vpop.permute.xlu1 %2301  ;;  %v2328_v16 = vadd.f32 %v2326_v63, %v2284_v40  ;;  %v2452_v45 = vmul.f32 %v5664_v37, %v2449_v21  ;;  %v2486_v43 = vmul.f32 %v5664_v37, %v2483_v54  ;;  %v2702_v21 = vstv %s5672_s13  ;;  %p3514_p8 = pnand %p3513_p1, %p6087_p3  ;;  %s3622_s13 = smov [#allocation9]  }
 0x1f2   : > { %v2306_v22 = vadd.f32 %v2302_v14, %v2222_v7  ;;  %v2300_v9 = vpop.permute.xlu0 %2299 }
 0x1f3   : > { %v2305_v4 = vadd.f32 %v2300_v9, %v2221_v42  ;;  %v2459_v9 = vrot.slane %v2452_v45, 1  ;;  %p3515_p9 = pneg %p3514_p8 }
 0x1f4   : > { %v2335_v31 = vadd.f32 %v2333_v23, %v2306_v22  ;;  %v2457_v22 = vrot.slane %v2451_v51, 1  ;;  %v2688_v23 = vmul.f32 %v5664_v37, %v2685_v44 }
 0x1f5   : > { %v2345_v15 = vpop.permute.xlu1 %2344  ;;  %v2334_v50 = vadd.f32 %v2332_v57, %v2305_v4  ;;  %v2500_v4 = vstv %s3321_s5  ;;  %s5824_s5 = scalar_lea.hbm %s5882_s4, %s3356_s10 }
 0x1f6   : > { %v5606_v35 = vadd.f32 %v2345_v15, %v2317_v13  ;;  %v2343_v0 = vpop.permute.xlu0 %2342  ;;  %v2468_v15 = vmul.f32 %v5597_v47, %v2466_v5  ;;  %v2503_v63 = vmul.f32 %v5664_v37, %v2500_v4  ;;  %v2501_v59 = vmul.f32 %v5601_v19, %v2500_v4 }
 0x1f7   : > { %v5608_v30 = vadd.f32 %v2343_v0, %v2316_v34  ;;  %v2469_v34 = vmul.f32 %v5664_v37, %v2466_v5  ;;  %v2467_v0 = vmul.f32 %v5601_v19, %v2466_v5 }
 0x1f8   : > { %v2474_v57 = vrot.slane %v2468_v15, 1  ;;  %v2510_v6 = vrot.slane %v2503_v63, 1  ;;  %v2507_v5 = vrot.slane %v2501_v59, 1 }
 0x1f9   : > { %v2359_v11 = vpop.permute.xlu1 %2358 }
 0x1fa   : > { %v5612_v29 = vadd.f32 %v2359_v11, %v2323_v49  ;;  %v2357_v33 = vpop.permute.xlu0 %2356  ;;  %v2485_v49 = vmul.f32 %v5597_v47, %v2483_v54  ;;  %v2484_v11 = vmul.f32 %v5601_v19, %v2483_v54 }
 0x1fb   : > { %v5614_v62 = vadd.f32 %v2357_v33, %v2322_v60  ;;  %v2502_v60 = vmul.f32 %v5597_v47, %v2500_v4  ;;  %v2695_v4 = vrot.slane %v2688_v23, 2 }
 0x1fc   : > { %v2490_v51 = vrot.slane %v2484_v11, 1 }
 0x1fd   : > { %v2373_v12 = vpop.permute.xlu1 %2372  ;;  %v2508_v45 = vrot.slane %v2502_v60, 1  ;;  %v2703_v60 = vmul.f32 %v5601_v19, %v2702_v21 }
 0x1fe   : > { %v5618_v27 = vadd.f32 %v2373_v12, %v2329_v25  ;;  %v2371_v55 = vpop.permute.xlu0 %2370  ;;  %v2687_v25 = vmul.f32 %v5597_v47, %v2685_v44  ;;  %v2460_v12 = vsel %vm615_vm0, %v2457_v22, %v2459_v9  ;;  %v2686_v9 = vmul.f32 %v5601_v19, %v2685_v44 }
 0x1ff   : > { %v5620_v41 = vadd.f32 %v2371_v55, %v2328_v16  ;;  %v2458_v16 = vsel %vm615_vm0, %v2456_v38, %v2457_v22  ;;  %v2476_v55 = vrot.slane %v2469_v34, 1  ;;  %v2719_v22 = vstv %s5676_s14  ;;  %s3516_s14 = sshll.u32 %s3622_s13, 4  ;;  %s3517_s14 = int_to_ptr.vmem [resolvable:$false] %s3516_s14 }
 0x200   : > { %v2693_v54 = vrot.slane %v2687_v25, 2  ;;  %v5721_v63 = vsel %vm615_vm0, %v2507_v5, %v2508_v45  ;;  %v2721_v59 = vmul.f32 %v5597_v47, %v2719_v22  ;;  %v2692_v23 = vrot.slane %v2686_v9, 2  ;;  %p3519_p10 = scmp.lt.s32.totalorder %s5826_s7, %s3517_s14 }
 0x201   : > { %v2387_v3 = vpop.permute.xlu1 %2386  ;;  %v2477_v15 = vsel %vm615_vm0, %v2474_v57, %v2476_v55  ;;  %v2720_v5 = vmul.f32 %v5601_v19, %v2719_v22 }
 0x202   : > { %v5622_v56 = vadd.f32 %v2387_v3, %v2335_v31  ;;  %v2385_v58 = vpop.permute.xlu0 %2384  ;;  %v2473_v3 = vrot.slane %v2467_v0, 1  ;;  %v2704_v0 = vmul.f32 %v5597_v47, %v2702_v21  ;;  %v2696_v25 = vsel %vm852_vm1, %v2693_v54, %v2695_v4 }
 0x203   : > { %v5624_v53 = vadd.f32 %v2385_v58, %v2334_v50  ;;  %v2491_v50 = vrot.slane %v2485_v49, 1  ;;  %v2493_v58 = vrot.slane %v2486_v43, 1  ;;  %v2705_v49 = vmul.f32 %v5664_v37, %v2702_v21 }
 0x204   : > { %v2475_v11 = vsel %vm615_vm0, %v2473_v3, %v2474_v57  ;;  %v2736_v57 = vstv %s5693_s8  ;;  %v2727_v9 = vrot.slane %v2721_v59, 2  ;;  %s3518_s8 = scalar_lea.vmem %s3517_s14, 2048 }
 0x205   : > { %v5626_v2 = vpop.permute.xlu1 %2400  ;;  %v2494_v44 = vsel %vm615_vm0, %v2491_v50, %v2493_v58  ;;  %v2712_v58 = vrot.slane %v2705_v49, 2  ;;  %p3520_p0 = scmp.lt.s32.totalorder %s3518_s8, %s3512_s9 }
 0x206   : > { %v5628_v17 = vpop.permute.xlu0 %2398  ;;  %v2405_v38 = vadd.f32 %v5626_v2, %v5606_v35  ;;  %v2492_v35 = vsel %vm615_vm0, %v2490_v51, %v2491_v50  ;;  %v5718_v2 = vsel %vm615_vm0, %v2508_v45, %v2510_v6  ;;  %v2710_v50 = vrot.slane %v2704_v0, 2 }
 0x207   : > { %v2404_v43 = vadd.f32 %v5628_v17, %v5608_v30  ;;  %v2722_v17 = vmul.f32 %v5664_v37, %v2719_v22  ;;  %v2709_v6 = vrot.slane %v2703_v60, 2  ;;  %p3521_p2 = por %p3520_p0, %p3519_p10 }
 0x208   : > { %v2464_v3 = vadd.f32 %v2460_v12, %v2405_v38 }
 0x209   : > { %v5630_v61 = vpop.permute.xlu1 %2414  ;;  %v2463_v45 = vadd.f32 %v2458_v16, %v2404_v43  ;;  %p3522_p6 = pnand %p3521_p2, %p3515_p9 }
 0x20a   : > { %v5632_v18 = vpop.permute.xlu0 %2412  ;;  %v2419_v55 = vadd.f32 %v5630_v61, %v5612_v29  ;;  %v2739_v29 = vmul.f32 %v5664_v37, %v2736_v57  ;;  %v2713_v37 = vsel %vm852_vm1, %v2710_v50, %v2712_v58 }
 0x20b   : > { %v2418_v51 = vadd.f32 %v5632_v18, %v5614_v62  ;;  %v2729_v18 = vrot.slane %v2722_v17, 2 }
 0x20c   : > { %v2746_v0 = vrot.slane %v2739_v29, 2 }
 0x20d   : > { %v5634_v46 = vpop.permute.xlu1 %2428 }
 0x20e   : > { %v5636_v20 = vpop.permute.xlu0 %2426  ;;  %v2433_v61 = vadd.f32 %v5634_v46, %v5618_v27  ;;  %v2480_v27 = vadd.f32 %v2475_v11, %v2418_v51  ;;  %v2730_v11 = vsel %vm852_vm1, %v2727_v9, %v2729_v18  ;;  %v2934_v51 = vstv %s5757_s22 }
 0x20f   : > { %v2432_v12 = vadd.f32 %v5636_v20, %v5620_v41  ;;  %v2711_v41 = vsel %vm852_vm1, %v2709_v6, %v2710_v50  ;;  %v2726_v20 = vrot.slane %v2720_v5, 2 }
 0x210   : > { %v2498_v49 = vadd.f32 %v2494_v44, %v2433_v61 }
 0x211   : > { %v5638_v28 = vpop.permute.xlu1 %2442  ;;  %v2497_v43 = vadd.f32 %v2492_v35, %v2432_v12 }
 0x212   : > { %v5640_v7 = vpop.permute.xlu0 %2440 }
 0x215   : > { %v5642_v10 = vpop.permute.xlu1 %2531 }
 0x216   : > { %v5644_v42 = vpop.permute.xlu0 %2529  ;;  %v2536_v4 = vadd.f32 %v5642_v10, %v2464_v3  ;;  %v2481_v10 = vadd.f32 %v2477_v15, %v2419_v55 }
 0x217   : > { %v2535_v62 = vadd.f32 %v5644_v42, %v2463_v45 }
 0x219   : > { %v5646_v8 = vpop.permute.xlu1 %2552 }
 0x21a   : > { %v5648_v32 = vpop.permute.xlu0 %2550  ;;  %v2557_v42 = vadd.f32 %v5646_v8, %v2481_v10  ;;  %v2446_v8 = vadd.f32 %v5640_v7, %v5624_v53 }
 0x21d   : > { %v5650_v24 = vpop.permute.xlu1 %2573 }
 0x21e   : > { %v5652_v1 = vpop.permute.xlu0 %2571 }
 0x221   : > { %v5654_v36 = vpop.permute.xlu1 %2594 }
 0x222   : > { %v5656_v26 = vpop.permute.xlu0 %2592 }
 0x225   : > { %v5658_v48 = vpop.permute.xlu1 %2615 }
 0x226   : > { %v5660_v52 = vpop.permute.xlu0 %2613  ;;  %v2620_v22 = vadd.f32 %v5658_v48, %v2536_v4  ;;  %v2737_v48 = vmul.f32 %v5601_v19, %v2736_v57  ;;  %v2578_v19 = vadd.f32 %v5650_v24, %v2498_v49  ;;  %v2921_v24 = vstv %s5748_s21 }
 0x227   : > { %v2619_v46 = vadd.f32 %v5660_v52, %v2535_v62  ;;  %v2447_v52 = vadd.f32 %v5638_v28, %v5622_v56  ;;  %v2728_v56 = vsel %vm852_vm1, %v2726_v20, %v2727_v9 }
 0x228   : > { %v2700_v59 = vadd.f32 %v2696_v25, %v2620_v22  ;;  %v2743_v53 = vrot.slane %v2737_v48, 2 }
 0x229   : > { %v5667_v40 = vpop.permute.xlu1 %2636 }
 0x22a   : > { %v5670_v14 = vpop.permute.xlu0 %2634 }
 0x22d   : > { %v5674_v13 = vpop.permute.xlu1 %2657 }
 0x22e   : > { %v5680_v39 = vpop.permute.xlu0 %2655  ;;  %v2662_v7 = vadd.f32 %v5674_v13, %v2578_v19 }
 0x230   : > { %v2734_v5 = vadd.f32 %v2730_v11, %v2662_v7 }
 0x231   : > { %v5689_v33 = vpop.permute.xlu1 %2678 }
 0x232   : > { %6082 = vst [vmem:[#allocation47_spill] sm:$0xff] %v5689_v33  ;;  %v5697_v31 = vpop.permute.xlu0 %2676 }
 0x233   : > { %6083 = vst [vmem:[#allocation48_spill] sm:$0xff] %v5697_v31  ;;  %v5738_v31 = vmul.f32 %v5597_v47, %v2736_v57  ;;  %v2694_v47 = vsel %vm852_vm1, %v2692_v23, %v2693_v54  ;;  %v2556_v54 = vadd.f32 %v5648_v32, %v2480_v27  ;;  %v2577_v32 = vadd.f32 %v5652_v1, %v2497_v43 }
 0x234   : > { %v2699_v35 = vadd.f32 %v2694_v47, %v2619_v46  ;;  %v2515_v1 = vadd.f32 %v5718_v2, %v2447_v52 }
 0x235   : > { %v5700_v33 = vpop.permute.xlu1 %2767  ;;  %v2744_v15 = vrot.slane %v5738_v31, 2  ;;  %v2641_v31 = vadd.f32 %v5667_v40, %v2557_v42  ;;  %v2640_v44 = vadd.f32 %v5670_v14, %v2556_v54  ;;  %v2661_v40 = vadd.f32 %v5680_v39, %v2577_v32 }
 0x236   : > { %v5707_v34 = vpop.permute.xlu0 %2765  ;;  %v2772_v17 = vadd.f32 %v5700_v33, %v2700_v59  ;;  %v2514_v14 = vadd.f32 %v5721_v63, %v2446_v8  ;;  %v2599_v13 = vadd.f32 %v5654_v36, %v2515_v1  ;;  %v2960_v59 = vstv %s5792_s12 }
 0x237   : > { %v2747_v28 = vsel %vm852_vm1, %v2744_v15, %v2746_v0  ;;  %v2771_v25 = vadd.f32 %v5707_v34, %v2699_v35  ;;  %v2717_v33 = vadd.f32 %v2713_v37, %v2641_v31  ;;  %v2716_v50 = vadd.f32 %v2711_v41, %v2640_v44 }
 0x238   : > { %v2598_v39 = vadd.f32 %v5656_v26, %v2514_v14  ;;  %v2733_v2 = vadd.f32 %v2728_v56, %v2661_v40  ;;  %v2745_v10 = vsel %vm852_vm1, %v2743_v53, %v2744_v15  ;;  %v2947_v41 = vstv %s5783_s27 }
 0x239   : > { %v5725_v30 = vpop.permute.xlu1 %2788  ;;  %v6084_v9 = vld [vmem:[#allocation47_spill] sm:$0xff] }
 0x23a   : > { %v5731_v21 = vpop.permute.xlu0 %2786  ;;  %v2793_v34 = vadd.f32 %v5725_v30, %v2717_v33  ;;  %v2683_v29 = vadd.f32 %v6084_v9, %v2599_v13  ;;  %v6085_v26 = vld [vmem:[#allocation48_spill] sm:$0xff] }
 0x23b   : > { %v2792_v6 = vadd.f32 %v5731_v21, %v2716_v50  ;;  %v2682_v62 = vadd.f32 %v6085_v26, %v2598_v39 }
 0x23c   : > { %v2751_v42 = vadd.f32 %v2747_v28, %v2683_v29 }
 0x23d   : > { %v5746_v16 = vpop.permute.xlu1 %2809  ;;  %v2750_v0 = vadd.f32 %v2745_v10, %v2682_v62 }
 0x23e   : > { %v5753_v38 = vpop.permute.xlu0 %2807  ;;  %v2814_v21 = vadd.f32 %v5746_v16, %v2734_v5 }
 0x23f   : > { %v2813_v37 = vadd.f32 %v5753_v38, %v2733_v2 }
 0x241   : > { %v5764_v60 = vpop.permute.xlu1 %2830 }
 0x242   : > { %v5771_v23 = vpop.permute.xlu0 %2828  ;;  %v2835_v49 = vadd.f32 %v5764_v60, %v2751_v42 }
 0x243   : > { %v2834_v52 = vadd.f32 %v5771_v23, %v2750_v0 }
 0x245   : > { %v2852_v57 = vpop.permute.xlu1 %2851 }
 0x246   : > { %v2856_v55 = vadd.f32 %v2852_v57, %v2772_v17  ;;  %v2850_v3 = vpop.permute.xlu0 %2849 }
 0x247   : > { %v2855_v58 = vadd.f32 %v2850_v3, %v2771_v25 }
 0x248   : > { %v2923_v45 = vadd.f32 %v2921_v24, %v2856_v55 }
 0x249   : > { %v2922_v4 = vadd.f32 %v2921_v24, %v2855_v58  ;;  %v2873_v63 = vpop.permute.xlu1 %2872 }
 0x24a   : > { %vm2925_vm3 = vcmp.ge.f32.partialorder %v2923_v45, 0.0  ;;  %v2927_v61 = vmul.f32 0.01, %v2923_v45  ;;  %v2877_v36 = vadd.f32 %v2873_v63, %v2793_v34  ;;  %v2871_v12 = vpop.permute.xlu0 %2870 }
 0x24b   : > { %vm2924_vm4 = vcmp.ge.f32.partialorder %v2922_v4, 0.0  ;;  %v2926_v30 = vmul.f32 0.01, %v2922_v4  ;;  %v2876_v18 = vadd.f32 %v2871_v12, %v2792_v6 }
 0x24c   : > { %v2929_v22 = vsel %vm2925_vm3, %v2923_v45, %v2927_v61  ;;  %v2936_v47 = vadd.f32 %v2934_v51, %v2877_v36 }
 0x24d   : > { %2932 = vst.msk [vmem:[%s5801_s6 + $0x8] sm:$0xff] %vm2930_vm2, %v2929_v22  ;;  %v2928_v27 = vsel %vm2924_vm4, %v2922_v4, %v2926_v30  ;;  %v2935_v46 = vadd.f32 %v2934_v51, %v2876_v18  ;;  %v2894_v20 = vpop.permute.xlu1 %2893 }
 0x24e   : > { %2931 = vst.msk [vmem:[%s5801_s6] sm:$0xff] %vm2930_vm2, %v2928_v27  ;;  %vm2938_vm5 = vcmp.ge.f32.partialorder %v2936_v47, 0.0  ;;  %v2940_v16 = vmul.f32 0.01, %v2936_v47  ;;  %v2898_v38 = vadd.f32 %v2894_v20, %v2814_v21  ;;  %v2892_v15 = vpop.permute.xlu0 %2891 }
 0x24f   : > { %vm2937_vm6 = vcmp.ge.f32.partialorder %v2935_v46, 0.0  ;;  %v2939_v48 = vmul.f32 0.01, %v2935_v46  ;;  %v2897_v54 = vadd.f32 %v2892_v15, %v2813_v37 }
 0x250   : > { %v2942_v43 = vsel %vm2938_vm5, %v2936_v47, %v2940_v16  ;;  %v2949_v11 = vadd.f32 %v2947_v41, %v2898_v38 }
 0x251   : > { %3344 = vst.msk [vmem:[%s5801_s6 + $0x18] sm:$0xff] %vm2930_vm2, %v2942_v43  ;;  %v2941_v8 = vsel %vm2937_vm6, %v2935_v46, %v2939_v48  ;;  %v2948_v31 = vadd.f32 %v2947_v41, %v2897_v54  ;;  %v2915_v19 = vpop.permute.xlu1 %2914 }
 0x252   : > { %3343 = vst.msk [vmem:[%s5801_s6 + $0x10] sm:$0xff] %vm2930_vm2, %v2941_v8  ;;  %vm2951_vm7 = vcmp.ge.f32.partialorder %v2949_v11, 0.0  ;;  %v2953_v32 = vmul.f32 0.01, %v2949_v11  ;;  %v2919_v44 = vadd.f32 %v2915_v19, %v2835_v49  ;;  %v2913_v60 = vpop.permute.xlu0 %2912 }
 0x253   : > { %vm2950_vm8 = vcmp.ge.f32.partialorder %v2948_v31, 0.0  ;;  %v2952_v35 = vmul.f32 0.01, %v2948_v31  ;;  %v2918_v17 = vadd.f32 %v2913_v60, %v2834_v52 }
 0x254   : > { %v2955_v23 = vsel %vm2951_vm7, %v2949_v11, %v2953_v32  ;;  %v2962_v56 = vadd.f32 %v2960_v59, %v2919_v44 }
 0x255   : > { %3347 = vst.msk [vmem:[%s5801_s6 + $0x28] sm:$0xff] %vm2930_vm2, %v2955_v23  ;;  %v2954_v28 = vsel %vm2950_vm8, %v2948_v31, %v2952_v35  ;;  %v2961_v53 = vadd.f32 %v2960_v59, %v2918_v17 }
 0x256   : > { %3346 = vst.msk [vmem:[%s5801_s6 + $0x20] sm:$0xff] %vm2930_vm2, %v2954_v28  ;;  %vm2964_vm9 = vcmp.ge.f32.partialorder %v2962_v56, 0.0  ;;  %v2966_v7 = vmul.f32 0.01, %v2962_v56 }
 0x257   : > { %vm2963_vm10 = vcmp.ge.f32.partialorder %v2961_v53, 0.0  ;;  %v2965_v40 = vmul.f32 0.01, %v2961_v53 }
 0x258   : > { %v2968_v25 = vsel %vm2964_vm9, %v2962_v56, %v2966_v7 }
 0x259   : > { %3350 = vst.msk [vmem:[%s5801_s6 + $0x38] sm:$0xff] %vm2930_vm2, %v2968_v25  ;;  %v2967_v24 = vsel %vm2963_vm10, %v2961_v53, %v2965_v40 }
 0x25a   : > { %3349 = vst.msk [vmem:[%s5801_s6 + $0x30] sm:$0xff] %vm2930_vm2, %v2967_v24 }
 0x25b   : > { %3525 = shalt.err (!%p3522_p6)
}
 0x25c   : > { %s3526_s21 = scalar_lea.hbm %s5824_s5, 1024  ;;  %s3530_s12 = scalar_lea.hbm %s5882_s4, 2048 }
 0x25d   : > { %p3527_p7 = scmp.ne.s32.totalorder %s5824_s5, %s3526_s21  ;;  %p3531_p12 = scmp.lt.s32.totalorder %s5824_s5, %s5882_s4 }
 0x25e   : > { %p3532_p13 = scmp.lt.s32.totalorder %s3530_s12, %s3526_s21 }
 0x25f   : > { %p3528_p4 = pnand %p3527_p7, %p6087_p3 }
 0x260   : > { %p3533_p1 = por %p3532_p13, %p3531_p12 }
 0x261   : > { %p3529_p5 = pneg %p3528_p4 }
 0x263   : > { %p3534_p8 = pnand %p3533_p1, %p3529_p5 }
 0x265   : > { %3537 = shalt.err (!%p3534_p8)
}
 0x266   : > { %s3623_s10 = smov 128   ;;  %s3624_s30 = smov 8  }
 0x267   : > { %3366 = dma.vmem_to_hbm [thread:$0]  (%p6087_p3), %s5826_s7, 1024, %s5824_s5, %s2973_s18, %s3623_s10, %s3623_s10, %s3624_s30  }
 0x268 PF: > { %s3003_s11 = sand.u32 1, %s3592_s15   ;;  %p6088_p9 = scmp.ne.s32.totalorder %s5890_s29, 0 }
 0x269   : > { %s3004_s9 = scalar_lea.sflag [#allocation3], %s3003_s11 }
 0x26a   : > { %p3376_p10 = pnand %p3167_p11, %p6088_p9 }
 0x26c   : > { %p3377_p0 = pneg %p3376_p10 }
 0x26e   : > { %3587 = dma.done.wait (%p3377_p0), %s3004_s9, 1024  }
 0x26f   : > { %3589 = vsyncadd (%p3377_p0), %s3004_s9, 4294966272  ;;  %s19_s20 = sadd.s32 1, %s3612_s20   ;;  %s6089_s15 = smov %s3596_s16 }
 0x270   : > { %p16_p2 = scmp.ge.s32.totalorder %s19_s20, 4   ;;  %s6090_s16 = smov %s3600_s17 }
 0x271   : > { %s6091_s17 = smov %s3704_s28  ;;  %s6092_s18 = smov %s3608_s19 }
 0x272   : > { %s6093_s19 = smov %s6095_s23  ;;  %18 = sbr.rel (!%p16_p2) target bundleno = 6 (0x6), region = 222 }
 0x277   :  { %3009 = vsyncpa [#allocation3], 1 }
 0x278   :  { %3011 = vsyncpa [#allocation3 + $0x1], 1 }
 0x279   :  { %3012 = vsyncpa [#allocation4], 1 }
 0x27a   :  { %3014 = vsyncpa [#allocation4 + $0x1], 1 }
 0x27b   :  { %3015 = vsyncpa [#allocation6], 1 }

</bundles_post_ra>
